<compile_context>
chip_gen: v7x
topology: tpu7x:2x2x1
jax: 0.10.0
libtpu: 0.0.40
codegen_flags: <defaults>
</compile_context>

<pallas_src>
import functools
import math

import numpy as np
import jax
import jax.numpy as jnp
from jax import lax
from jax.experimental import pallas as pl
from jax.experimental.pallas import tpu as pltpu


# ----------------------------- kernel body ---------------------------------


def _depth_to_space_kernel(x_ref, p_ref, o_ref, *, bb, precision):
    """One (batch, channel-tile) grid step.

    x_ref : (1, bb, Mt, K)  input slab; s = i*b + j major, M = (channel, row-group)
    p_ref : (bb, K, N)      one-hot interleave matrices (disjoint supports per s)
    o_ref : (1, Mt, N)      output slab (height+width interleave live in lanes)
    """
    acc = jnp.dot(x_ref[0, 0], p_ref[0],
                  preferred_element_type=o_ref.dtype, precision=precision)
    for s in range(1, bb):
        acc = acc + jnp.dot(x_ref[0, s], p_ref[s],
                            preferred_element_type=o_ref.dtype, precision=precision)
    # Single full-width (N-lane) unmasked store.
    o_ref[0] = acc


# --------------------------- sizing helpers ---------------------------------


def _round_up(n, m):
    return -(-n // m) * m


def _sublane_pad(n, itemsize):
    # Sublane tiles are 8 x 32-bit; sub-32-bit dtypes pack along sublanes.
    return _round_up(n, 8 * max(1, 4 // itemsize))


def _lane_pad(n):
    return _round_up(n, 128)


def _step_vmem_bytes(mt, bb, K, N, isz):
    """Padded VMEM footprint of one grid step (pipeline buffers + temporaries)."""
    in_blk = bb * _sublane_pad(mt, isz) * _lane_pad(K) * isz
    out_blk = _sublane_pad(mt, isz) * _lane_pad(N) * isz
    p_blk = bb * _sublane_pad(K, isz) * _lane_pad(N) * isz
    pipeline = 2 * (in_blk + out_blk + p_blk)   # double-buffered (P counted 2x, conservative)
    temps = (_sublane_pad(mt, isz) * _lane_pad(K) * isz          # one loaded LHS slice
             + 2 * _sublane_pad(mt, 4) * _lane_pad(N) * 4)       # acc + dot result in flight
    return pipeline + temps


def _vmem_capacity_bytes():
    try:
        return int(pltpu.get_tpu_info().vmem_capacity_bytes)
    except Exception:
        return 64 << 20   # conservative default (v7x has the smallest VMEM)


def _pick_channel_tile(od, ng, bb, K, N, isz, batch, budget):
    """Largest legal output-channel tile whose padded step footprint fits the budget."""
    # Legal: oc_t | od, and the block's second-to-last dim (oc_t*ng) is a
    # multiple of 8 or the full axis (oc_t == od).
    cands = [c for c in range(od, 0, -1)
             if od % c == 0 and (c == od or (c * ng) % 8 == 0)]
    fitting = [c for c in cands
               if _step_vmem_bytes(c * ng, bb, K, N, isz) <= budget]
    if not fitting:
        # Even the smallest legal tile exceeds the budget; take it and let the
        # caller raise vmem_limit_bytes to cover it.
        # TODO(synk): add a row-group grid axis for feature maps so large that a
        # single output channel's image exceeds the per-step VMEM budget.
        return cands[-1]
    # Largest fitting tile; but prefer a (still >= ~1 MiB) smaller tile if it
    # yields >= 4 grid steps, so v7x's two TensorCores both get pipelined work.
    for c in fitting:
        if (batch * (od // c) >= 4
                and _step_vmem_bytes(c * ng, bb, K, N, isz) >= (1 << 20)):
            return c
    return fitting[0]


def _build_interleave_onehot(b, W, rg, dtype):
    """P[s, r*W + w, (r*b + i)*W*b + w*b + j] = 1 for s = i*b + j (0/1, exact in any dtype)."""
    K = rg * W
    N = rg * b * b * W
    p = np.zeros((b * b, K, N), dtype=np.float32)
    r = np.repeat(np.arange(rg), W)   # (K,) row within the group
    w = np.tile(np.arange(W), rg)     # (K,) column
    k = np.arange(K)
    for i in range(b):
        for j in range(b):
            m = (r * b + i) * (W * b) + w * b + j
            p[i * b + j, k, m] = 1.0
    return jnp.asarray(p, dtype=dtype)


# ------------------------------- wrapper ------------------------------------


def depth_to_space(x, block_size):
    """Pallas TPU implementation of the PyTorch DepthToSpace forward pass."""
    B, C, H, W = x.shape
    b = int(block_size)
    bb = b * b
    assert C % bb == 0, "channels must be divisible by block_size**2"
    od = C // bb
    isz = x.dtype.itemsize

    # Fold rows into the lane axis in groups of rg so the input block's last
    # dim is lane-dense (a multiple of 128 lanes, or the full axis).
    if W % 128 == 0:
        rg = 1
    elif 128 % W == 0:
        rg = math.gcd(H, 128 // W)
    else:
        rg = 1          # legal fallback (block last dim == full axis), just lane-padded
    ng = H // rg        # row groups per image
    K = rg * W          # input lane width per row group
    N = rg * bb * W     # output lane width per row group (= rg rows x b x (W*b) cols)

    cap = _vmem_capacity_bytes()
    budget = max(4 << 20, min(cap // 3, 40 << 20))   # ~40 MiB v5e/v6e, ~21 MiB v7x
    oc_t = _pick_channel_tile(od, ng, bb, K, N, isz, B, budget)
    mt = oc_t * ng
    n_ct = od // oc_t
    step_bytes = _step_vmem_bytes(mt, bb, K, N, isz)
    vmem_limit = int(min(cap * 4 // 5, max(32 << 20, step_bytes * 3 // 2)))

    # Free, contiguous reshape: (B, C, H, W) -> [n, s, d*ng + g, r*W + w].
    x_r = x.reshape(B, bb, od * ng, K)
    p = _build_interleave_onehot(b, W, rg, x.dtype)

    # Permutation matmul runs in the input dtype.  For f32, HIGHEST precision
    # makes the multi-pass MXU decomposition exact against a 0/1 matrix, and the
    # extra passes are free at the wall clock (HBM-bandwidth-bound kernel).
    precision = (lax.Precision.HIGHEST if x.dtype == jnp.float32
                 else lax.Precision.DEFAULT)

    kernel = functools.partial(_depth_to_space_kernel, bb=bb, precision=precision)

    out = pl.pallas_call(
        kernel,
        out_shape=jax.ShapeDtypeStruct((B, od * ng, N), x.dtype),
        grid=(B, n_ct),
        in_specs=[
            pl.BlockSpec((1, bb, mt, K), lambda n, c: (n, 0, c, 0)),
            pl.BlockSpec((bb, K, N), lambda n, c: (0, 0, 0)),
        ],
        out_specs=pl.BlockSpec((1, mt, N), lambda n, c: (n, c, 0)),
        compiler_params=pltpu.CompilerParams(
            dimension_semantics=("parallel", "parallel"),
            vmem_limit_bytes=vmem_limit,
        ),
        cost_estimate=pl.CostEstimate(
            flops=0,
            transcendentals=0,
            bytes_accessed=2 * x.size * isz + p.size * isz,
        ),
    )(x_r, p)

    # Free reshape: (B, od*ng, rg*b*b*W) flat order is (d, g, r, i, w, j), which
    # is exactly (B, od, H*b, W*b) with h*b + i = (g*rg + r)*b + i.
    return out.reshape(B, od, H * b, W * b)


# --------------------------------- test --------------------------------------


if __name__ == "__main__":
    key = jax.random.PRNGKey(0)
    B, C, H, W = 2, 8, 16, 16
    block_size = 2

    x = jax.random.normal(key, (B, C, H, W), dtype=jnp.float32)

    d2s = jax.jit(functools.partial(depth_to_space, block_size=block_size))
    y = jax.block_until_ready(d2s(x))

    # Pure-JAX reference implementing the exact PyTorch DepthToSpace semantics.
    b = block_size
    od = C // (b * b)
    ref = (
        x.reshape(B, b, b, od, H, W)
        .transpose(0, 3, 4, 1, 5, 2)
        .reshape(B, od, H * b, W * b)
    )

    assert y.shape == (B, od, H * b, W * b) and y.dtype == x.dtype
    # The permutation runs at HIGHEST precision on genuine f32 data (exact for
    # normal-range values); the tolerance is defensive but would still reject a
    # lossy single-pass bf16 path.
    assert bool(jnp.allclose(y, ref, atol=2e-5, rtol=2e-5)), "mismatch vs reference"
    print("KERNEL_OK")
</pallas_src>

<mosaic_0001>
module attributes {stable_mosaic.version = 11 : i64} {
  func.func @_depth_to_space_kernel(%arg0: i32, %arg1: i32, %arg2: memref<1x4x4x128xf32, #tpu.memory_space<vmem>>, %arg3: memref<4x128x512xf32, #tpu.memory_space<vmem>>, %arg4: memref<1x4x512xf32, #tpu.memory_space<vmem>>) attributes {dimension_semantics = [#tpu.dimension_semantics<parallel>, #tpu.dimension_semantics<parallel>], iteration_bounds = array<i64: 2, 1>, scalar_prefetch = 0 : i64, scratch_operands = 0 : i64, tpu.core_type = #tpu.core_type<tc>, window_params = [{transform_indices = @transform_0, window_bounds = array<i64: 1, 4, 4, 128>}, {pipeline_mode = #tpu.pipeline_mode<synchronous>, transform_indices = @transform_1, window_bounds = array<i64: 4, 128, 512>}, {transform_indices = @transform_2, window_bounds = array<i64: 1, 4, 512>}]} {
    %c0 = arith.constant 0 : index
    %c0_0 = arith.constant 0 : index
    %c0_1 = arith.constant 0 : index
    %c0_2 = arith.constant 0 : index
    %0 = vector.load %arg2[%c0, %c0_0, %c0_1, %c0_2] : memref<1x4x4x128xf32, #tpu.memory_space<vmem>>, vector<1x1x4x128xf32>
    %1 = vector.shape_cast %0 : vector<1x1x4x128xf32> to vector<4x128xf32>
    %c0_3 = arith.constant 0 : index
    %c0_4 = arith.constant 0 : index
    %c0_5 = arith.constant 0 : index
    %2 = vector.load %arg3[%c0_3, %c0_4, %c0_5] : memref<4x128x512xf32, #tpu.memory_space<vmem>>, vector<1x128x512xf32>
    %3 = vector.shape_cast %2 : vector<1x128x512xf32> to vector<128x512xf32>
    %cst = arith.constant dense<0.000000e+00> : vector<4x512xf32>
    %4 = tpu.matmul %1, %3, %cst {dimension_numbers = #tpu.dot_dimension_numbers<[1], [0], [0], [1], [0, 0, 1, 1], [], []>, precision = #tpu.contract_precision<fp32>} : vector<4x128xf32>, vector<128x512xf32>, vector<4x512xf32> -> vector<4x512xf32>
    %c0_6 = arith.constant 0 : index
    %c1 = arith.constant 1 : index
    %c0_7 = arith.constant 0 : index
    %c0_8 = arith.constant 0 : index
    %5 = vector.load %arg2[%c0_6, %c1, %c0_7, %c0_8] : memref<1x4x4x128xf32, #tpu.memory_space<vmem>>, vector<1x1x4x128xf32>
    %6 = vector.shape_cast %5 : vector<1x1x4x128xf32> to vector<4x128xf32>
    %c1_9 = arith.constant 1 : index
    %c0_10 = arith.constant 0 : index
    %c0_11 = arith.constant 0 : index
    %7 = vector.load %arg3[%c1_9, %c0_10, %c0_11] : memref<4x128x512xf32, #tpu.memory_space<vmem>>, vector<1x128x512xf32>
    %8 = vector.shape_cast %7 : vector<1x128x512xf32> to vector<128x512xf32>
    %cst_12 = arith.constant dense<0.000000e+00> : vector<4x512xf32>
    %9 = tpu.matmul %6, %8, %cst_12 {dimension_numbers = #tpu.dot_dimension_numbers<[1], [0], [0], [1], [0, 0, 1, 1], [], []>, precision = #tpu.contract_precision<fp32>} : vector<4x128xf32>, vector<128x512xf32>, vector<4x512xf32> -> vector<4x512xf32>
    %10 = arith.addf %4, %9 : vector<4x512xf32>
    %c0_13 = arith.constant 0 : index
    %c2 = arith.constant 2 : index
    %c0_14 = arith.constant 0 : index
    %c0_15 = arith.constant 0 : index
    %11 = vector.load %arg2[%c0_13, %c2, %c0_14, %c0_15] : memref<1x4x4x128xf32, #tpu.memory_space<vmem>>, vector<1x1x4x128xf32>
    %12 = vector.shape_cast %11 : vector<1x1x4x128xf32> to vector<4x128xf32>
    %c2_16 = arith.constant 2 : index
    %c0_17 = arith.constant 0 : index
    %c0_18 = arith.constant 0 : index
    %13 = vector.load %arg3[%c2_16, %c0_17, %c0_18] : memref<4x128x512xf32, #tpu.memory_space<vmem>>, vector<1x128x512xf32>
    %14 = vector.shape_cast %13 : vector<1x128x512xf32> to vector<128x512xf32>
    %cst_19 = arith.constant dense<0.000000e+00> : vector<4x512xf32>
    %15 = tpu.matmul %12, %14, %cst_19 {dimension_numbers = #tpu.dot_dimension_numbers<[1], [0], [0], [1], [0, 0, 1, 1], [], []>, precision = #tpu.contract_precision<fp32>} : vector<4x128xf32>, vector<128x512xf32>, vector<4x512xf32> -> vector<4x512xf32>
    %16 = arith.addf %10, %15 : vector<4x512xf32>
    %c0_20 = arith.constant 0 : index
    %c3 = arith.constant 3 : index
    %c0_21 = arith.constant 0 : index
    %c0_22 = arith.constant 0 : index
    %17 = vector.load %arg2[%c0_20, %c3, %c0_21, %c0_22] : memref<1x4x4x128xf32, #tpu.memory_space<vmem>>, vector<1x1x4x128xf32>
    %18 = vector.shape_cast %17 : vector<1x1x4x128xf32> to vector<4x128xf32>
    %c3_23 = arith.constant 3 : index
    %c0_24 = arith.constant 0 : index
    %c0_25 = arith.constant 0 : index
    %19 = vector.load %arg3[%c3_23, %c0_24, %c0_25] : memref<4x128x512xf32, #tpu.memory_space<vmem>>, vector<1x128x512xf32>
    %20 = vector.shape_cast %19 : vector<1x128x512xf32> to vector<128x512xf32>
    %cst_26 = arith.constant dense<0.000000e+00> : vector<4x512xf32>
    %21 = tpu.matmul %18, %20, %cst_26 {dimension_numbers = #tpu.dot_dimension_numbers<[1], [0], [0], [1], [0, 0, 1, 1], [], []>, precision = #tpu.contract_precision<fp32>} : vector<4x128xf32>, vector<128x512xf32>, vector<4x512xf32> -> vector<4x512xf32>
    %22 = arith.addf %16, %21 : vector<4x512xf32>
    %c0_27 = arith.constant 0 : index
    %c0_28 = arith.constant 0 : index
    %c0_29 = arith.constant 0 : index
    %23 = vector.load %arg4[%c0_27, %c0_28, %c0_29] : memref<1x4x512xf32, #tpu.memory_space<vmem>>, vector<1x4x512xf32>
    %24 = vector.shape_cast %23 : vector<1x4x512xf32> to vector<4x512xf32>
    %25 = vector.shape_cast %22 : vector<4x512xf32> to vector<1x4x512xf32>
    tpu.vector_store %arg4[%c0_27, %c0_28, %c0_29], %25 {strides = array<i32>} : memref<1x4x512xf32, #tpu.memory_space<vmem>>, vector<1x4x512xf32>,
    return
  }
  func.func @transform_0(%arg0: i32, %arg1: i32) -> (i32, i32, i32, i32) {
    %c0_i32 = arith.constant 0 : i32
    %c0_i32_0 = arith.constant 0 : i32
    %c0_i32_1 = arith.constant 0 : i32
    return %arg0, %c0_i32, %arg1, %c0_i32_0 : i32, i32, i32, i32
  }
  func.func @transform_1(%arg0: i32, %arg1: i32) -> (i32, i32, i32) {
    %c0_i32 = arith.constant 0 : i32
    %c0_i32_0 = arith.constant 0 : i32
    %c0_i32_1 = arith.constant 0 : i32
    %c0_i32_2 = arith.constant 0 : i32
    return %c0_i32, %c0_i32_0, %c0_i32_1 : i32, i32, i32
  }
  func.func @transform_2(%arg0: i32, %arg1: i32) -> (i32, i32, i32) {
    %c0_i32 = arith.constant 0 : i32
    %c0_i32_0 = arith.constant 0 : i32
    return %arg0, %arg1, %c0_i32 : i32, i32, i32
  }
}

</mosaic_0001>

<bundles_post_ra>
// kernel: depth_to_space.1
= control target key start
LH: loop header
LB: loop body
LE: loop exit
PB: predicated region body
PF: predicated region fallthrough
CT: control target
= control target key end

     0   :  { %7 = vsyncpa [#allocation3], 0  ;;  %s9177_s9 = smov 0   ;;  %s9179_s10 = smov 0   ;;  %s12769_s0 = inlined_call_operand.vmem [shape: f32[2,4,4,128], index: 0, kind: input, shape index: {}]   ;;  %s12770_s1 = inlined_call_operand.hbm [shape: f32[4,128,512], index: 1, kind: input, shape index: {}]   ;;  %s12771_s2 = inlined_call_operand.vmem [shape: f32[2,4,512], index: 2, kind: output, shape index: {}]  }
   0x1   :  { %s9181_s11 = smov 0  }
   0x2 LB: > { %s7418_s12 = sadd.s32 4294967295, %s9156_s11   ;;  %s25_s13 = sadd.s32 1, %s9152_s10  ;;  %s9156_s11 = sphi %s9181_s11, %s13_s11   ;;  %s9152_s10 = sphi %s9179_s10, %s14856_s10   ;;  %s9148_s9 = sphi %s9177_s9, %s14855_s9  }
   0x3   : > { %p27_p0 = scmp.ge.s32.totalorder %s25_s13, 2  ;;  %p7420_p1 = scmp.ge.s32.totalorder %s9156_s11, 1 }
   0x4   : > { %p107_p2 = scmp.lt.s32.totalorder %s9156_s11, 3  ;;  %p9202_p4 = scmp.eq.s32.totalorder %s7418_s12, 0 }
   0x5   : > { %s14858_s13 = smov (%p27_p0, %s25_s13), 0  ;;  %s9158_s16 = smov [#allocation2]  }
   0x6   : > { %p9198_p3 = pnand %p7420_p1, %p107_p2  ;;  %s119_s17 = sshll.u32 %s9158_s16, 4  ;;  %s120_s17 = int_to_ptr.vmem [resolvable:$true] %s119_s17 }
   0x7   : > { %s13446_s15 = scalar_select %p9202_p4, 1, 0 }
   0x8   : > { %s13445_s14 = scalar_select %p9198_p3, 1, 0 }
   0x9   : > { %p9068_p5 = pneg %p9198_p3  ;;  %s9102_s21 = scalar_lea.hbm %s12770_s1, 32768 }
   0xa   : > { %p9103_p7 = scmp.ne.s32.totalorder %s12770_s1, %s9102_s21  ;;  %p9109_p11 = scmp.lt.u32.totalorder %s9102_s21, %s12770_s1 }
   0xb   : > { %p9210_p6 = pnand %p9202_p4, %p9068_p5 }
   0xd   : > { %p9104_p8 = pneg %p9210_p6 }
   0xf   : > { %p9105_p9 = pnand %p9104_p8, %p9103_p7 }
  0x11   : > { %p9106_p10 = pneg %p9105_p9 }
  0x13   : > { %p9111_p12 = pnand %p9109_p11, %p9106_p10 }
  0x15   : > { %9114 = shalt.err (!%p9111_p12)
}
  0x16   : > { %s9115_s26 = scalar_lea.vmem %s120_s17, 32768  ;;  %p9123_p2 = scmp.lt.s32.totalorder %s120_s17, %s120_s17 }
  0x17   : > { %p9116_p13 = scmp.ne.s32.totalorder %s120_s17, %s9115_s26  ;;  %p9124_p5 = scmp.lt.s32.totalorder %s9115_s26, %s9115_s26 }
  0x19   : > { %p9118_p0 = pnand %p9116_p13, %p9104_p8  ;;  %p9125_p4 = por %p9124_p5, %p9123_p2 }
  0x1b   : > { %p9119_p1 = pneg %p9118_p0 }
  0x1d   : > { %p9126_p3 = pnand %p9125_p4, %p9119_p1 }
  0x1f   : > { %9129 = shalt.err (!%p9126_p3)
}
  0x20   : > { %s9159_s27 = smov 512   ;;  %s9160_s28 = smov 32  }
  0x21   : > { %9071 = dma.hbm_to_vmem [thread:$0]  (!%p9210_p6), %s12770_s1, 32768, %s120_s17, [#allocation3], %s9159_s27, %s9159_s27, %s9160_s28  }
  0x22   : > { %p13448_p7 = scmp.ne.s32.totalorder %s13445_s14, 0 }
  0x24   : > { %146 = sbr.rel (%p13448_p7) target bundleno = 1093 (0x445), region = 28 }
  0x2b   : > { %p13449_p9 = scmp.ne.s32.totalorder %s13446_s15, 0 }
  0x2d   : > { %9143 = dma.done.wait (%p13449_p9), [#allocation3], 32768  }
  0x2e   : > { %9145 = vsyncadd (%p13449_p9), [#allocation3], 4294934528  ;;  %v12775_v0 = vmov 0.0   ;;  %v261_v1 = vld [vmem:[#allocation2 + $0x208] sm:$0xff]  ;;  %v263_v3 = vld [vmem:[#allocation2 + $0x218] sm:$0xff]  ;;  %p175_p3 = scmp.lt.s32.totalorder %s9148_s9, 1 }
  0x2f   : > { %420 = vmatprep.mubr.f32.mxu0 %v12775_v0  ;;  %1275 = vmatprep.mubr.f32.mxu1 %v12775_v0  ;;  %v265_v2 = vld [vmem:[#allocation2 + $0x228] sm:$0xff]  ;;  %v324_v4 = vand.u32 4294901760, %v261_v1  ;;  %v267_v6 = vld [vmem:[#allocation2 + $0x238] sm:$0xff]  ;;  %v1179_v7 = vand.u32 4294901760, %v263_v3  ;;  %v260_v8 = vld [vmem:[#allocation2 + $0x200] sm:$0xff] }
  0x30   : > { %v328_v5 = vand.u32 4294901760, %v265_v2  ;;  %v264_v9 = vld [vmem:[#allocation2 + $0x220] sm:$0xff]  ;;  %v1183_v10 = vand.u32 4294901760, %v267_v6  ;;  %v326_v11 = vand.u32 4294901760, %v260_v8  ;;  %v262_v13 = vld [vmem:[#allocation2 + $0x210] sm:$0xff]  ;;  %v269_v15 = vld [vmem:[#allocation2 + $0x248] sm:$0xff] }
  0x31   : > { %v330_v12 = vand.u32 4294901760, %v264_v9  ;;  %v266_v14 = vld [vmem:[#allocation2 + $0x230] sm:$0xff]  ;;  %v9240_v17 = vsub.f32 %v261_v1, %v324_v4  ;;  %v9244_v19 = vsub.f32 %v263_v3, %v1179_v7  ;;  %v273_v20 = vld [vmem:[#allocation2 + $0x268] sm:$0xff]  ;;  %v271_v21 = vld [vmem:[#allocation2 + $0x258] sm:$0xff]  ;;  %v1181_v29 = vand.u32 4294901760, %v262_v13  ;;  %s14860_s9 = smov (!%p175_p3, %s9148_s9), 1 }
  0x32   : > { %v9238_v16 = vpack.c.bf16 %v328_v5, %v324_v4  ;;  %v9242_v18 = vsub.f32 %v265_v2, %v328_v5  ;;  %v275_v22 = vld [vmem:[#allocation2 + $0x278] sm:$0xff]  ;;  %v9246_v23 = vpack.c.bf16 %v1183_v10, %v1179_v7  ;;  %v9248_v24 = vsub.f32 %v267_v6, %v1183_v10  ;;  %v268_v27 = vld [vmem:[#allocation2 + $0x240] sm:$0xff]  ;;  %v270_v37 = vld [vmem:[#allocation2 + $0x250] sm:$0xff]  ;;  %s7434_s3 = sshll.u32 %s14860_s9, 4 }
  0x33   : > { %13451 = vst [vmem:[#allocation6_spill] sm:$0xff] %v9240_v17  ;;  %13453 = vst [vmem:[#allocation8_spill] sm:$0xff] %v9244_v19  ;;  %v9250_v25 = vpack.c.bf16 %v330_v12, %v326_v11  ;;  %v9252_v26 = vsub.f32 %v260_v8, %v326_v11  ;;  %v9255_v28 = vsub.f32 %v264_v9, %v330_v12  ;;  %v1185_v30 = vand.u32 4294901760, %v266_v14  ;;  %v272_v32 = vld [vmem:[#allocation2 + $0x260] sm:$0xff]  ;;  %v274_v38 = vld [vmem:[#allocation2 + $0x270] sm:$0xff]  ;;  %s9451_s6 = scalar_lea.vmem %s12769_s0, %s7434_s3  ;;  %s191_s12 = scalar_lea.vmem %s12771_s2, %s7434_s3 }
  0x34   : > { %13450 = vst [vmem:[#allocation5_spill] sm:$0xff] %v9238_v16  ;;  %13452 = vst [vmem:[#allocation7_spill] sm:$0xff] %v9242_v18  ;;  %7437 = vmatprep.subr.bf16.mxu0 %v9238_v16  ;;  %v332_v31 = vand.u32 4294901760, %v269_v15  ;;  %7629 = vmatprep.subr.bf16.mxu1 %v9246_v23  ;;  %v336_v33 = vand.u32 4294901760, %v273_v20  ;;  %v1187_v34 = vand.u32 4294901760, %v271_v21  ;;  %v1191_v35 = vand.u32 4294901760, %v275_v22 }
  0x35   : > { %13454 = vst [vmem:[#allocation9_spill] sm:$0xff] %v9246_v23  ;;  %13455 = vst [vmem:[#allocation10_spill] sm:$0xff] %v9248_v24  ;;  %7439 = vmatpush1.bf16.msra.mxu0 %v9250_v25  ;;  %v334_v36 = vand.u32 4294901760, %v268_v27  ;;  %v9259_v39 = vpack.c.bf16 %v1185_v30, %v1181_v29  ;;  %v9261_v40 = vsub.f32 %v262_v13, %v1181_v29  ;;  %v277_v43 = vld [vmem:[#allocation2 + $0x288] sm:$0xff]  ;;  %v279_v45 = vld [vmem:[#allocation2 + $0x298] sm:$0xff]  ;;  %v338_v52 = vand.u32 4294901760, %v272_v32 }
  0x36   : > { %13456 = vst [vmem:[#allocation11_spill] sm:$0xff] %v9250_v25  ;;  %13457 = vst [vmem:[#allocation12_spill] sm:$0xff] %v9255_v28  ;;  %v9263_v41 = vsub.f32 %v266_v14, %v1185_v30  ;;  %v9265_v42 = vsub.f32 %v269_v15, %v332_v31  ;;  %v281_v44 = vld [vmem:[#allocation2 + $0x2a8] sm:$0xff]  ;;  %v9267_v46 = vpack.c.bf16 %v336_v33, %v332_v31  ;;  %v283_v50 = vld [vmem:[#allocation2 + $0x2b8] sm:$0xff]  ;;  %v1189_v54 = vand.u32 4294901760, %v270_v37 }
  0x37   : > { %13458 = vst [vmem:[#allocation13_spill] sm:$0xff] %v9259_v39  ;;  %v9269_v47 = vsub.f32 %v273_v20, %v336_v33  ;;  %v9271_v48 = vpack.c.bf16 %v1191_v35, %v1187_v34  ;;  %v9273_v49 = vsub.f32 %v271_v21, %v1187_v34  ;;  %7631 = vmatpush1.bf16.msra.mxu1 %v9259_v39  ;;  %v1193_v55 = vand.u32 4294901760, %v274_v38  ;;  %v276_v59 = vld [vmem:[#allocation2 + $0x280] sm:$0xff]  ;;  %v278_v2 = vld [vmem:[#allocation2 + $0x290] sm:$0xff]  ;;  %v285_v4 = vld [vmem:[#allocation2 + $0x2c8] sm:$0xff] }
  0x38   : > { %13459 = vst [vmem:[#allocation14_spill] sm:$0xff] %v9267_v46  ;;  %v9276_v51 = vsub.f32 %v275_v22, %v1191_v35  ;;  %v9278_v53 = vsub.f32 %v268_v27, %v334_v36  ;;  %7441 = vmatprep.subr.bf16.mxu0 %v9267_v46  ;;  %v340_v56 = vand.u32 4294901760, %v277_v43  ;;  %v344_v57 = vand.u32 4294901760, %v281_v44  ;;  %v280_v60 = vld [vmem:[#allocation2 + $0x2a0] sm:$0xff]  ;;  %v282_v3 = vld [vmem:[#allocation2 + $0x2b0] sm:$0xff]  ;;  %v289_v9 = vld [vmem:[#allocation2 + $0x2e8] sm:$0xff] }
  0x39   : > { %13460 = vst [vmem:[#allocation15_spill] sm:$0xff] %v9271_v48  ;;  %7633 = vmatprep.subr.bf16.mxu1 %v9271_v48  ;;  %v1195_v58 = vand.u32 4294901760, %v279_v45  ;;  %v9282_v61 = vpack.c.bf16 %v338_v52, %v334_v36  ;;  %v9284_v62 = vsub.f32 %v272_v32, %v338_v52  ;;  %v9286_v63 = vsub.f32 %v270_v37, %v1189_v54  ;;  %v287_v10 = vld [vmem:[#allocation2 + $0x2d8] sm:$0xff]  ;;  %v284_v33 = vld [vmem:[#allocation2 + $0x2c0] sm:$0xff]  ;;  %v302_v39 = vld [vmem:[#allocation2 + $0x350] sm:$0xff] }
  0x3a   : > { %v1199_v1 = vand.u32 4294901760, %v283_v50  ;;  %v9288_v5 = vpack.c.bf16 %v1193_v55, %v1189_v54  ;;  %v9290_v6 = vsub.f32 %v274_v38, %v1193_v55  ;;  %v9292_v7 = vpack.c.bf16 %v344_v57, %v340_v56  ;;  %v291_v11 = vld [vmem:[#allocation2 + $0x2f8] sm:$0xff]  ;;  %v288_v38 = vld [vmem:[#allocation2 + $0x2e0] sm:$0xff]  ;;  %v293_v55 = vld [vmem:[#allocation2 + $0x308] sm:$0xff] }
  0x3b   : > { %13461 = vst [vmem:[#allocation16_spill] sm:$0xff] %v9282_v61  ;;  %v9294_v8 = vsub.f32 %v277_v43, %v340_v56  ;;  %7443 = vmatpush1.bf16.msra.mxu0 %v9282_v61  ;;  %v9297_v12 = vsub.f32 %v281_v44, %v344_v57  ;;  %v9301_v14 = vsub.f32 %v279_v45, %v1195_v58  ;;  %v342_v20 = vand.u32 4294901760, %v276_v59  ;;  %v286_v43 = vld [vmem:[#allocation2 + $0x2d0] sm:$0xff]  ;;  %v297_v56 = vld [vmem:[#allocation2 + $0x328] sm:$0xff]  ;;  %v295_v57 = vld [vmem:[#allocation2 + $0x318] sm:$0xff] }
  0x3c   : > { %13462 = vst [vmem:[#allocation17_spill] sm:$0xff] %v9288_v5  ;;  %13463 = vst [vmem:[#allocation18_spill] sm:$0xff] %v9292_v7  ;;  %v9299_v13 = vpack.c.bf16 %v1199_v1, %v1195_v58  ;;  %v9303_v15 = vsub.f32 %v283_v50, %v1199_v1  ;;  %7635 = vmatpush1.bf16.msra.mxu1 %v9288_v5  ;;  %7445 = vmatprep.subr.bf16.mxu0 %v9292_v7  ;;  %v346_v21 = vand.u32 4294901760, %v280_v60  ;;  %v290_v44 = vld [vmem:[#allocation2 + $0x2f0] sm:$0xff]  ;;  %v296_v0 = vld [vmem:[#allocation2 + $0x320] sm:$0xff] }
  0x3d   : > { %v1197_v22 = vand.u32 4294901760, %v278_v2  ;;  %v1201_v27 = vand.u32 4294901760, %v282_v3  ;;  %v348_v29 = vand.u32 4294901760, %v285_v4  ;;  %v352_v30 = vand.u32 4294901760, %v289_v9  ;;  %v303_v48 = vld [vmem:[#allocation2 + $0x358] sm:$0xff]  ;;  %v306_v16 = vld [vmem:[#allocation2 + $0x370] sm:$0xff] }
  0x3e   : > { %13464 = vst [vmem:[#allocation19_spill] sm:$0xff] %v9299_v13  ;;  %7637 = vmatprep.subr.bf16.mxu1 %v9299_v13  ;;  %v1203_v31 = vand.u32 4294901760, %v287_v10  ;;  %v1207_v32 = vand.u32 4294901760, %v291_v11  ;;  %v9308_v34 = vpack.c.bf16 %v346_v21, %v342_v20  ;;  %v9310_v35 = vsub.f32 %v276_v59, %v342_v20  ;;  %v305_v13 = vld [vmem:[#allocation2 + $0x368] sm:$0xff] }
  0x3f   : > { %v9312_v36 = vsub.f32 %v280_v60, %v346_v21  ;;  %v9314_v37 = vpack.c.bf16 %v1201_v27, %v1197_v22  ;;  %v9316_v45 = vsub.f32 %v278_v2, %v1197_v22  ;;  %v9318_v50 = vsub.f32 %v282_v3, %v1201_v27  ;;  %v299_v21 = vld [vmem:[#allocation2 + $0x338] sm:$0xff] }
  0x40   : > { %13465 = vst [vmem:[#allocation20_spill] sm:$0xff] %v9308_v34  ;;  %v9320_v52 = vpack.c.bf16 %v352_v30, %v348_v29  ;;  %v9322_v54 = vsub.f32 %v285_v4, %v348_v29  ;;  %7447 = vmatpush1.bf16.msra.mxu0 %v9308_v34  ;;  %v9326_v58 = vsub.f32 %v289_v9, %v352_v30  ;;  %v350_v1 = vand.u32 4294901760, %v284_v33  ;;  %v292_v30 = vld [vmem:[#allocation2 + $0x300] sm:$0xff]  ;;  %v301_v34 = vld [vmem:[#allocation2 + $0x348] sm:$0xff] }
  0x41   : > { %13466 = vst [vmem:[#allocation21_spill] sm:$0xff] %v9314_v37  ;;  %7639 = vmatpush1.bf16.msra.mxu1 %v9314_v37  ;;  %v9328_v59 = vpack.c.bf16 %v1207_v32, %v1203_v31  ;;  %v9330_v60 = vsub.f32 %v287_v10, %v1203_v31  ;;  %v9333_v2 = vsub.f32 %v291_v11, %v1207_v32  ;;  %v354_v3 = vand.u32 4294901760, %v288_v38  ;;  %v294_v10 = vld [vmem:[#allocation2 + $0x310] sm:$0xff] }
  0x42   : > { %13467 = vst [vmem:[#allocation22_spill] sm:$0xff] %v9320_v52  ;;  %7449 = vmatprep.subr.bf16.mxu0 %v9320_v52  ;;  %v1205_v4 = vand.u32 4294901760, %v286_v43  ;;  %v1209_v20 = vand.u32 4294901760, %v290_v44  ;;  %v9336_v22 = vsub.f32 %v284_v33, %v350_v1  ;;  %v356_v27 = vand.u32 4294901760, %v293_v55  ;;  %v298_v52 = vld [vmem:[#allocation2 + $0x330] sm:$0xff] }
  0x43   : > { %13468 = vst [vmem:[#allocation23_spill] sm:$0xff] %v9328_v59  ;;  %7641 = vmatprep.subr.bf16.mxu1 %v9328_v59  ;;  %v360_v9 = vand.u32 4294901760, %v297_v56  ;;  %v1211_v29 = vand.u32 4294901760, %v295_v57  ;;  %v9338_v31 = vpack.c.bf16 %v354_v3, %v350_v1  ;;  %v9340_v37 = vsub.f32 %v288_v38, %v354_v3 }
  0x44   : > { %v9342_v11 = vpack.c.bf16 %v1209_v20, %v1205_v4  ;;  %v9344_v32 = vsub.f32 %v286_v43, %v1205_v4  ;;  %v9346_v59 = vsub.f32 %v290_v44, %v1209_v20  ;;  %v9350_v5 = vsub.f32 %v293_v55, %v356_v27  ;;  %v307_v55 = vld [vmem:[#allocation2 + $0x378] sm:$0xff] }
  0x45   : > { %13469 = vst [vmem:[#allocation24_spill] sm:$0xff] %v9338_v31  ;;  %v9348_v33 = vpack.c.bf16 %v360_v9, %v356_v27  ;;  %v9352_v7 = vsub.f32 %v297_v56, %v360_v9  ;;  %7451 = vmatpush1.bf16.msra.mxu0 %v9338_v31  ;;  %v1215_v38 = vand.u32 4294901760, %v299_v21  ;;  %v9356_v1 = vsub.f32 %v295_v57, %v1211_v29  ;;  %v300_v57 = vld [vmem:[#allocation2 + $0x340] sm:$0xff] }
  0x46   : > { %13470 = vst [vmem:[#allocation25_spill] sm:$0xff] %v9342_v11  ;;  %13471 = vst [vmem:[#allocation26_spill] sm:$0xff] %v9344_v32  ;;  %7643 = vmatpush1.bf16.msra.mxu1 %v9342_v11  ;;  %v358_v43 = vand.u32 4294901760, %v292_v30  ;;  %v362_v3 = vand.u32 4294901760, %v296_v0  ;;  %v1213_v4 = vand.u32 4294901760, %v294_v10  ;;  %v1217_v44 = vand.u32 4294901760, %v298_v52 }
  0x47   : > { %13472 = vst [vmem:[#allocation27_spill] sm:$0xff] %v9346_v59  ;;  %13473 = vst [vmem:[#allocation28_spill] sm:$0xff] %v9348_v33  ;;  %7453 = vmatprep.subr.bf16.mxu0 %v9348_v33  ;;  %v364_v20 = vand.u32 4294901760, %v301_v34  ;;  %v368_v61 = vand.u32 4294901760, %v305_v13  ;;  %v9359_v56 = vpack.c.bf16 %v1215_v38, %v1211_v29  ;;  %v9361_v27 = vsub.f32 %v299_v21, %v1215_v38  ;;  %v304_v31 = vld [vmem:[#allocation2 + $0x360] sm:$0xff]  ;;  %v309_v29 = vld [vmem:[#allocation2 + $0x388] sm:$0xff] }
  0x48   : > { %13474 = vst [vmem:[#allocation29_spill] sm:$0xff] %v9356_v1  ;;  %v9363_v9 = vpack.c.bf16 %v362_v3, %v358_v43  ;;  %v9365_v11 = vsub.f32 %v292_v30, %v358_v43  ;;  %v9367_v46 = vsub.f32 %v296_v0, %v362_v3  ;;  %v9369_v33 = vpack.c.bf16 %v1217_v44, %v1213_v4  ;;  %v313_v1 = vld [vmem:[#allocation2 + $0x3a8] sm:$0xff] }
  0x49   : > { %13475 = vst [vmem:[#allocation30_spill] sm:$0xff] %v9359_v56  ;;  %13476 = vst [vmem:[#allocation31_spill] sm:$0xff] %v9361_v27  ;;  %v9371_v25 = vsub.f32 %v294_v10, %v1213_v4  ;;  %v9373_v23 = vsub.f32 %v298_v52, %v1217_v44  ;;  %7645 = vmatprep.subr.bf16.mxu1 %v9359_v56  ;;  %v9378_v21 = vpack.c.bf16 %v368_v61, %v364_v20 }
  0x4a   : > { %13477 = vst [vmem:[#allocation32_spill] sm:$0xff] %v9363_v9  ;;  %13478 = vst [vmem:[#allocation33_spill] sm:$0xff] %v9365_v11  ;;  %7455 = vmatpush1.bf16.msra.mxu0 %v9363_v9  ;;  %v9380_v30 = vsub.f32 %v301_v34, %v364_v20  ;;  %v9382_v0 = vsub.f32 %v305_v13, %v368_v61  ;;  %v1219_v38 = vand.u32 4294901760, %v303_v48  ;;  %7647 = vmatpush1.bf16.msra.mxu1 %v9369_v33  ;;  %v311_v34 = vld [vmem:[#allocation2 + $0x398] sm:$0xff] }
  0x4b   : > { %13479 = vst [vmem:[#allocation34_spill] sm:$0xff] %v9367_v46  ;;  %13480 = vst [vmem:[#allocation35_spill] sm:$0xff] %v9369_v33  ;;  %v1223_v10 = vand.u32 4294901760, %v307_v55  ;;  %v366_v52 = vand.u32 4294901760, %v300_v57  ;;  %v370_v43 = vand.u32 4294901760, %v304_v31  ;;  %v1221_v3 = vand.u32 4294901760, %v302_v39  ;;  %7457 = vmatprep.subr.bf16.mxu0 %v9378_v21 }
  0x4c   : > { %13481 = vst [vmem:[#allocation36_spill] sm:$0xff] %v9371_v25  ;;  %13482 = vst [vmem:[#allocation37_spill] sm:$0xff] %v9373_v23  ;;  %v9386_v4 = vsub.f32 %v303_v48, %v1219_v38  ;;  %v1225_v44 = vand.u32 4294901760, %v306_v16  ;;  %v372_v9 = vand.u32 4294901760, %v309_v29  ;;  %v376_v56 = vand.u32 4294901760, %v313_v1  ;;  %v315_v20 = vld [vmem:[#allocation2 + $0x3b8] sm:$0xff] }
  0x4d   : > { %13483 = vst [vmem:[#allocation38_spill] sm:$0xff] %v9378_v21  ;;  %13484 = vst [vmem:[#allocation39_spill] sm:$0xff] %v9380_v30  ;;  %v9388_v61 = vpack.c.bf16 %v1223_v10, %v1219_v38  ;;  %v9390_v13 = vsub.f32 %v307_v55, %v1223_v10  ;;  %v9392_v33 = vpack.c.bf16 %v370_v43, %v366_v52  ;;  %v308_v30 = vld [vmem:[#allocation2 + $0x380] sm:$0xff]  ;;  %v310_v25 = vld [vmem:[#allocation2 + $0x390] sm:$0xff] }
  0x4e   : > { %13485 = vst [vmem:[#allocation40_spill] sm:$0xff] %v9382_v0  ;;  %13486 = vst [vmem:[#allocation41_spill] sm:$0xff] %v9386_v4  ;;  %v9394_v0 = vsub.f32 %v300_v57, %v366_v52  ;;  %v312_v23 = vld [vmem:[#allocation2 + $0x3a0] sm:$0xff]  ;;  %v9401_v48 = vsub.f32 %v304_v31, %v370_v43  ;;  %v9403_v21 = vpack.c.bf16 %v1225_v44, %v1221_v3  ;;  %v314_v55 = vld [vmem:[#allocation2 + $0x3b0] sm:$0xff]  ;;  %v1227_v43 = vand.u32 4294901760, %v311_v34 }
  0x4f   : > { %13487 = vst [vmem:[#allocation42_spill] sm:$0xff] %v9388_v61  ;;  %13488 = vst [vmem:[#allocation43_spill] sm:$0xff] %v9390_v13  ;;  %v9405_v4 = vsub.f32 %v302_v39, %v1221_v3  ;;  %v9407_v38 = vsub.f32 %v306_v16, %v1225_v44  ;;  %v317_v10 = vld [vmem:[#allocation2 + $0x3c8] sm:$0xff]  ;;  %7649 = vmatprep.subr.bf16.mxu1 %v9388_v61  ;;  %7459 = vmatpush1.bf16.msra.mxu0 %v9392_v33  ;;  %v1231_v39 = vand.u32 4294901760, %v315_v20 }
  0x50   : > { %13489 = vst [vmem:[#allocation44_spill] sm:$0xff] %v9392_v33  ;;  %13490 = vst [vmem:[#allocation45_spill] sm:$0xff] %v9394_v0  ;;  %v321_v13 = vld [vmem:[#allocation2 + $0x3e8] sm:$0xff]  ;;  %v9411_v57 = vpack.c.bf16 %v376_v56, %v372_v9  ;;  %v9413_v52 = vsub.f32 %v309_v29, %v372_v9  ;;  %v9415_v31 = vsub.f32 %v313_v1, %v376_v56  ;;  %7651 = vmatpush1.bf16.msra.mxu1 %v9403_v21  ;;  %v323_v0 = vld [vmem:[#allocation2 + $0x3f8] sm:$0xff] }
  0x51   : > { %13491 = vst [vmem:[#allocation46_spill] sm:$0xff] %v9401_v48  ;;  %13492 = vst [vmem:[#allocation47_spill] sm:$0xff] %v9403_v21  ;;  %v374_v16 = vand.u32 4294901760, %v308_v30  ;;  %v378_v3 = vand.u32 4294901760, %v312_v23  ;;  %v1229_v44 = vand.u32 4294901760, %v310_v25  ;;  %v1233_v61 = vand.u32 4294901760, %v314_v55 }
  0x52   : > { %13493 = vst [vmem:[#allocation48_spill] sm:$0xff] %v9405_v4  ;;  %13494 = vst [vmem:[#allocation49_spill] sm:$0xff] %v9407_v38  ;;  %7461 = vmatprep.subr.bf16.mxu0 %v9411_v57  ;;  %v9419_v38 = vsub.f32 %v311_v34, %v1227_v43  ;;  %v380_v33 = vand.u32 4294901760, %v317_v10  ;;  %v384_v4 = vand.u32 4294901760, %v321_v13  ;;  %v319_v48 = vld [vmem:[#allocation2 + $0x3d8] sm:$0xff]  ;;  %v9422_v9 = vpack.c.bf16 %v1231_v39, %v1227_v43  ;;  %v316_v21 = vld [vmem:[#allocation2 + $0x3c0] sm:$0xff] }
  0x53   : > { %13495 = vst [vmem:[#allocation50_spill] sm:$0xff] %v9411_v57  ;;  %13496 = vst [vmem:[#allocation51_spill] sm:$0xff] %v9413_v52  ;;  %v9424_v1 = vsub.f32 %v315_v20, %v1231_v39  ;;  %v9426_v56 = vpack.c.bf16 %v378_v3, %v374_v16  ;;  %v9428_v29 = vsub.f32 %v308_v30, %v374_v16  ;;  %v318_v57 = vld [vmem:[#allocation2 + $0x3d0] sm:$0xff]  ;;  %v1235_v16 = vand.u32 4294901760, %v319_v48 }
  0x54   : > { %13497 = vst [vmem:[#allocation52_spill] sm:$0xff] %v9415_v31  ;;  %13498 = vst [vmem:[#allocation53_spill] sm:$0xff] %v9419_v38  ;;  %v320_v31 = vld [vmem:[#allocation2 + $0x3e0] sm:$0xff]  ;;  %v9430_v34 = vsub.f32 %v312_v23, %v378_v3  ;;  %v9432_v38 = vpack.c.bf16 %v1233_v61, %v1229_v44  ;;  %v9434_v52 = vsub.f32 %v310_v25, %v1229_v44  ;;  %v322_v43 = vld [vmem:[#allocation2 + $0x3f0] sm:$0xff]  ;;  %7653 = vmatprep.subr.bf16.mxu1 %v9422_v9 }
  0x55   : > { %13499 = vst [vmem:[#allocation54_spill] sm:$0xff] %v9422_v9  ;;  %13500 = vst [vmem:[#allocation55_spill] sm:$0xff] %v9426_v56  ;;  %v9436_v46 = vsub.f32 %v314_v55, %v1233_v61  ;;  %7463 = vmatpush1.bf16.msra.mxu0 %v9426_v56  ;;  %v9440_v20 = vpack.c.bf16 %v384_v4, %v380_v33  ;;  %v9442_v30 = vsub.f32 %v317_v10, %v380_v33  ;;  %v7429_v9 = vld [vmem:[%s9451_s6 + $0x4] sm:$0xf] }
  0x56   : > { %13501 = vst [vmem:[#allocation56_spill] sm:$0xff] %v9430_v34  ;;  %13502 = vst [vmem:[#allocation57_spill] sm:$0xff] %v9432_v38  ;;  %v9444_v39 = vsub.f32 %v321_v13, %v384_v4  ;;  %7655 = vmatpush1.bf16.msra.mxu1 %v9432_v38  ;;  %v1239_v23 = vand.u32 4294901760, %v323_v0  ;;  %v382_v25 = vand.u32 4294901760, %v316_v21  ;;  %v386_v61 = vand.u32 4294901760, %v320_v31 }
  0x57   : > { %13503 = vst [vmem:[#allocation58_spill] sm:$0xff] %v9440_v20  ;;  %13504 = vst [vmem:[#allocation59_spill] sm:$0xff] %v9442_v30  ;;  %v1237_v55 = vand.u32 4294901760, %v318_v57  ;;  %7465 = vmatprep.subr.bf16.mxu0 %v9440_v20  ;;  %v9455_v33 = vsub.f32 %v319_v48, %v1235_v16  ;;  %v1241_v4 = vand.u32 4294901760, %v322_v43  ;;  %v12853_v13 = vand.u32 4294901760, %v9240_v17 }
  0x58   : > { %13505 = vst [vmem:[#allocation60_spill] sm:$0xff] %v9444_v39  ;;  %v12852_v10 = vand.u32 4294901760, %v9242_v18  ;;  %v9459_v3 = vpack.c.bf16 %v1239_v23, %v1235_v16  ;;  %v9461_v44 = vsub.f32 %v323_v0, %v1239_v23  ;;  %v9463_v56 = vpack.c.bf16 %v386_v61, %v382_v25 }
  0x59   : > { %v9465_v38 = vsub.f32 %v316_v21, %v382_v25  ;;  %v9468_v39 = vsub.f32 %v320_v31, %v386_v61  ;;  %v9470_v30 = vpack.c.bf16 %v1241_v4, %v1237_v55  ;;  %v9472_v48 = vsub.f32 %v318_v57, %v1237_v55 }
  0x5a   : > { %13506 = vst [vmem:[#allocation61_spill] sm:$0xff] %v9459_v3  ;;  %13507 = vst [vmem:[#allocation62_spill] sm:$0xff] %v9461_v44  ;;  %v9474_v20 = vsub.f32 %v322_v43, %v1241_v4  ;;  %7657 = vmatprep.subr.bf16.mxu1 %v9459_v3  ;;  %7467 = vmatpush1.bf16.msra.mxu0 %v9463_v56  ;;  %v435_v0 = vsub.f32 %v9240_v17, %v12853_v13  ;;  %v12856_v31 = vand.u32 4294901760, %v9244_v19 }
  0x5b   : > { %13508 = vst [vmem:[#allocation63_spill] sm:$0xff] %v9463_v56  ;;  %13509 = vst [vmem:[#allocation64_spill] sm:$0xff] %v9465_v38  ;;  %v447_v21 = vsub.f32 %v9242_v18, %v12852_v10  ;;  %v12861_v16 = vand.u32 4294901760, %v9248_v24  ;;  %7659 = vmatpush1.bf16.msra.mxu1 %v9470_v30  ;;  %v9487_v57 = vand.u32 4294901760, %v7429_v9  ;;  %v12868_v43 = vand.u32 4294901760, %v9252_v26 }
  0x5c   : > { %13510 = vst [vmem:[#allocation65_spill] sm:$0xff] %v9468_v39  ;;  %13511 = vst [vmem:[#allocation66_spill] sm:$0xff] %v9470_v30  ;;  %v12869_v23 = vand.u32 4294901760, %v9255_v28  ;;  %v12875_v25 = vand.u32 4294901760, %v9261_v40  ;;  %v436_v61 = vand.u32 4294901760, %v435_v0  ;;  %v1290_v4 = vsub.f32 %v9244_v19, %v12856_v31 }
  0x5d   : > { %13512 = vst [vmem:[#allocation67_spill] sm:$0xff] %v9472_v48  ;;  %13513 = vst [vmem:[#allocation68_spill] sm:$0xff] %v9474_v20  ;;  %v448_v55 = vand.u32 4294901760, %v447_v21  ;;  %v1302_v10 = vsub.f32 %v9248_v24, %v12861_v16  ;;  %v9499_v13 = vsub.f32 %v7429_v9, %v9487_v57  ;;  %v441_v30 = vsub.f32 %v9252_v26, %v12868_v43 }
  0x5e   : > { %13514 = vst [vmem:[#allocation69_spill] sm:$0xff] %v9487_v57  ;;  %v453_v0 = vsub.f32 %v9255_v28, %v12869_v23  ;;  %v1296_v21 = vsub.f32 %v9261_v40, %v12875_v25  ;;  %v1291_v56 = vand.u32 4294901760, %v1290_v4  ;;  %v12872_v16 = vand.u32 4294901760, %v9263_v41 }
  0x5f   : > { %13515 = vst [vmem:[#allocation70_spill] sm:$0xff] %v9499_v13  ;;  %v7468_v31 = vpack.c.bf16 %v448_v55, %v436_v61  ;;  %v1303_v3 = vand.u32 4294901760, %v1302_v10  ;;  %v9512_v9 = vand.u32 4294901760, %v9499_v13  ;;  %v442_v57 = vand.u32 4294901760, %v441_v30 }
  0x60   : > { %v454_v24 = vand.u32 4294901760, %v453_v0  ;;  %v1297_v19 = vand.u32 4294901760, %v1296_v21  ;;  %v1308_v23 = vsub.f32 %v9263_v41, %v12872_v16  ;;  %v12873_v28 = vand.u32 4294901760, %v9265_v42 }
  0x61   : > { %13516 = vst [vmem:[#allocation71_spill] sm:$0xff] %v9512_v9  ;;  %7469 = vmatprep.subr.bf16.mxu0 %v7468_v31  ;;  %v7660_v43 = vpack.c.bf16 %v1303_v3, %v1291_v56  ;;  %v12874_v61 = vand.u32 4294901760, %v9269_v47  ;;  %v424_v10 = vsub.f32 %v9499_v13, %v9512_v9  ;;  %v12876_v4 = vand.u32 4294901760, %v9273_v49 }
  0x62   : > { %v7470_v55 = vpack.c.bf16 %v454_v24, %v442_v57  ;;  %v12879_v30 = vand.u32 4294901760, %v9276_v51  ;;  %v1309_v0 = vand.u32 4294901760, %v1308_v23  ;;  %v459_v56 = vsub.f32 %v9265_v42, %v12873_v28 }
  0x63   : > { %7661 = vmatprep.subr.bf16.mxu1 %v7660_v43  ;;  %v471_v3 = vsub.f32 %v9269_v47, %v12874_v61  ;;  %v12880_v31 = vand.u32 4294901760, %v9278_v53  ;;  %v425_v21 = vand.u32 4294901760, %v424_v10  ;;  %v1314_v24 = vsub.f32 %v9273_v49, %v12876_v4 }
  0x64   : > { %v1326_v57 = vsub.f32 %v9276_v51, %v12879_v30  ;;  %v12885_v43 = vand.u32 4294901760, %v9284_v62  ;;  %v7662_v23 = vpack.c.bf16 %v1309_v0, %v1297_v19  ;;  %v460_v16 = vand.u32 4294901760, %v459_v56 }
  0x65   : > { %v472_v28 = vand.u32 4294901760, %v471_v3  ;;  %v465_v61 = vsub.f32 %v9278_v53, %v12880_v31  ;;  %426 = vmatmul.mubr.f32.vlgmr.msra.gmra.mrb[0].mxu0 %v425_v21  ;;  %1281 = vmatmul.mubr.f32.vlgmr.msra.gmra.mrb[0].mxu1 %v425_v21  ;;  %v1315_v10 = vand.u32 4294901760, %v1314_v24  ;;  %v12881_v9 = vand.u32 4294901760, %v9286_v63 }
  0x66   : > { %v1327_v25 = vand.u32 4294901760, %v1326_v57  ;;  %v477_v4 = vsub.f32 %v9284_v62, %v12885_v43  ;;  %7471 = vmatpush1.bf16.msra.mxu0 %v7470_v55  ;;  %7663 = vmatpush1.bf16.msra.mxu1 %v7662_v23  ;;  %v12882_v0 = vand.u32 4294901760, %v9290_v6  ;;  %v12883_v56 = vand.u32 4294901760, %v9294_v8 }
  0x67   : > { %v7472_v30 = vpack.c.bf16 %v472_v28, %v460_v16  ;;  %v466_v19 = vand.u32 4294901760, %v465_v61  ;;  %v1320_v21 = vsub.f32 %v9286_v63, %v12881_v9  ;;  %v12884_v24 = vand.u32 4294901760, %v9297_v12 }
  0x68   : > { %v7664_v3 = vpack.c.bf16 %v1327_v25, %v1315_v10  ;;  %v478_v31 = vand.u32 4294901760, %v477_v4  ;;  %v13517_v57 = vmov 0.0   ;;  %v1332_v28 = vsub.f32 %v9290_v6, %v12882_v0 }
  0x69   : > { %656 = vmatprep.mubr.f32.mxu0 %v13517_v57  ;;  %1511 = vmatprep.mubr.f32.mxu1 %v13517_v57  ;;  %v483_v16 = vsub.f32 %v9294_v8, %v12883_v56  ;;  %v12886_v25 = vand.u32 4294901760, %v9301_v14  ;;  %v12897_v61 = vand.u32 4294901760, %v9303_v15  ;;  %v1321_v4 = vand.u32 4294901760, %v1320_v21 }
  0x6a   : > { %7473 = vmatprep.subr.bf16.mxu0 %v7472_v30  ;;  %7665 = vmatprep.subr.bf16.mxu1 %v7664_v3  ;;  %v7474_v55 = vpack.c.bf16 %v478_v31, %v466_v19  ;;  %v495_v23 = vsub.f32 %v9297_v12, %v12884_v24  ;;  %v12889_v30 = vand.u32 4294901760, %v9310_v35  ;;  %v1333_v10 = vand.u32 4294901760, %v1332_v28 }
  0x6b   : > { %v484_v9 = vand.u32 4294901760, %v483_v16  ;;  %v1338_v0 = vsub.f32 %v9301_v14, %v12886_v25  ;;  %v1350_v56 = vsub.f32 %v9303_v15, %v12897_v61  ;;  %v12890_v19 = vand.u32 4294901760, %v9312_v36 }
  0x6c   : > { %7475 = vmatpush1.bf16.msra.mxu0 %v7474_v55  ;;  %v496_v3 = vand.u32 4294901760, %v495_v23  ;;  %v489_v31 = vsub.f32 %v9310_v35, %v12889_v30  ;;  %v12894_v21 = vand.u32 4294901760, %v9316_v45  ;;  %v7666_v28 = vpack.c.bf16 %v1333_v10, %v1321_v4 }
  0x6d   : > { %v1339_v16 = vand.u32 4294901760, %v1338_v0  ;;  %v1351_v24 = vand.u32 4294901760, %v1350_v56  ;;  %v12891_v43 = vand.u32 4294901760, %v9318_v50  ;;  %v501_v55 = vsub.f32 %v9312_v36, %v12890_v19 }
  0x6e   : > { %v7476_v25 = vpack.c.bf16 %v496_v3, %v484_v9  ;;  %v490_v13 = vand.u32 4294901760, %v489_v31  ;;  %v1344_v23 = vsub.f32 %v9316_v45, %v12894_v21  ;;  %7667 = vmatpush1.bf16.msra.mxu1 %v7666_v28  ;;  %v12892_v0 = vand.u32 4294901760, %v9322_v54 }
  0x6f   : > { %v7668_v30 = vpack.c.bf16 %v1351_v24, %v1339_v16  ;;  %v1356_v4 = vsub.f32 %v9318_v50, %v12891_v43  ;;  %v12893_v56 = vand.u32 4294901760, %v9326_v58  ;;  %v502_v9 = vand.u32 4294901760, %v501_v55 }
  0x70   : > { %7477 = vmatprep.subr.bf16.mxu0 %v7476_v25  ;;  %v1345_v10 = vand.u32 4294901760, %v1344_v23  ;;  %v12895_v3 = vand.u32 4294901760, %v9330_v60  ;;  %v12896_v31 = vand.u32 4294901760, %v9333_v2  ;;  %v507_v24 = vsub.f32 %v9322_v54, %v12892_v0 }
  0x71   : > { %7669 = vmatprep.subr.bf16.mxu1 %v7668_v30  ;;  %v1357_v19 = vand.u32 4294901760, %v1356_v4  ;;  %v519_v28 = vsub.f32 %v9326_v58, %v12893_v56  ;;  %v12903_v16 = vand.u32 4294901760, %v9336_v22  ;;  %v7478_v43 = vpack.c.bf16 %v502_v9, %v490_v13 }
  0x72   : > { %v1362_v25 = vsub.f32 %v9330_v60, %v12895_v3  ;;  %v1374_v30 = vsub.f32 %v9333_v2, %v12896_v31  ;;  %v12899_v55 = vand.u32 4294901760, %v9340_v37  ;;  %v508_v4 = vand.u32 4294901760, %v507_v24 }
  0x73   : > { %v7670_v23 = vpack.c.bf16 %v1357_v19, %v1345_v10  ;;  %v520_v0 = vand.u32 4294901760, %v519_v28  ;;  %v513_v56 = vsub.f32 %v9336_v22, %v12903_v16  ;;  %7479 = vmatpush1.bf16.msra.mxu0 %v7478_v43  ;;  %v12898_v3 = vand.u32 4294901760, %v9344_v32 }
  0x74   : > { %v1363_v21 = vand.u32 4294901760, %v1362_v25  ;;  %v1375_v13 = vand.u32 4294901760, %v1374_v30  ;;  %v525_v9 = vsub.f32 %v9340_v37, %v12899_v55  ;;  %v12900_v19 = vand.u32 4294901760, %v9346_v59 }
  0x75   : > { %7671 = vmatpush1.bf16.msra.mxu1 %v7670_v23  ;;  %v7480_v31 = vpack.c.bf16 %v520_v0, %v508_v4  ;;  %v514_v61 = vand.u32 4294901760, %v513_v56  ;;  %v12901_v10 = vand.u32 4294901760, %v9350_v5  ;;  %v1368_v43 = vsub.f32 %v9344_v32, %v12898_v3  ;;  %v13518_v56 = vld [vmem:[#allocation29_spill] sm:$0xff] }
  0x76   : > { %v7672_v24 = vpack.c.bf16 %v1375_v13, %v1363_v21  ;;  %v526_v28 = vand.u32 4294901760, %v525_v9  ;;  %v12902_v25 = vand.u32 4294901760, %v9352_v7  ;;  %v1380_v30 = vsub.f32 %v9346_v59, %v12900_v19  ;;  %v13521_v32 = vld [vmem:[#allocation37_spill] sm:$0xff] }
  0x77   : > { %7481 = vmatprep.subr.bf16.mxu0 %v7480_v31  ;;  %v531_v0 = vsub.f32 %v9350_v5, %v12901_v10  ;;  %v12909_v23 = vand.u32 4294901760, %v13518_v56  ;;  %v12912_v21 = vand.u32 4294901760, %v9361_v27  ;;  %v1369_v13 = vand.u32 4294901760, %v1368_v43 }
  0x78   : > { %7673 = vmatprep.subr.bf16.mxu1 %v7672_v24  ;;  %v7482_v4 = vpack.c.bf16 %v526_v28, %v514_v61  ;;  %v543_v9 = vsub.f32 %v9352_v7, %v12902_v25  ;;  %v12911_v31 = vand.u32 4294901760, %v9365_v11  ;;  %v1381_v3 = vand.u32 4294901760, %v1380_v30  ;;  %v13519_v28 = vld [vmem:[#allocation34_spill] sm:$0xff]  ;;  %v13520_v25 = vld [vmem:[#allocation36_spill] sm:$0xff] }
  0x79   : > { %v532_v55 = vand.u32 4294901760, %v531_v0  ;;  %v1386_v19 = vsub.f32 %v13518_v56, %v12909_v23  ;;  %v1398_v10 = vsub.f32 %v9361_v27, %v12912_v21  ;;  %v12915_v43 = vand.u32 4294901760, %v13519_v28 }
  0x7a   : > { %7483 = vmatpush1.bf16.msra.mxu0 %v7482_v4  ;;  %v544_v24 = vand.u32 4294901760, %v543_v9  ;;  %v537_v61 = vsub.f32 %v9365_v11, %v12911_v31  ;;  %v12920_v16 = vand.u32 4294901760, %v13520_v25  ;;  %v7674_v30 = vpack.c.bf16 %v1381_v3, %v1369_v13  ;;  %v13523_v13 = vld [vmem:[#allocation40_spill] sm:$0xff] }
  0x7b   : > { %v1387_v0 = vand.u32 4294901760, %v1386_v19  ;;  %v1399_v59 = vand.u32 4294901760, %v1398_v10  ;;  %v12919_v57 = vand.u32 4294901760, %v13521_v32  ;;  %v549_v4 = vsub.f32 %v13519_v28, %v12915_v43  ;;  %v13522_v19 = vld [vmem:[#allocation39_spill] sm:$0xff] }
  0x7c   : > { %v7484_v23 = vpack.c.bf16 %v544_v24, %v532_v55  ;;  %v538_v56 = vand.u32 4294901760, %v537_v61  ;;  %v1392_v9 = vsub.f32 %v13520_v25, %v12920_v16  ;;  %7675 = vmatpush1.bf16.msra.mxu1 %v7674_v30  ;;  %v12922_v10 = vand.u32 4294901760, %v13522_v19  ;;  %v13524_v61 = vld [vmem:[#allocation41_spill] sm:$0xff]  ;;  %v13525_v43 = vld [vmem:[#allocation43_spill] sm:$0xff] }
  0x7d   : > { %v7676_v31 = vpack.c.bf16 %v1399_v59, %v1387_v0  ;;  %v1404_v3 = vsub.f32 %v13521_v32, %v12919_v57  ;;  %v12923_v21 = vand.u32 4294901760, %v13523_v13  ;;  %v550_v55 = vand.u32 4294901760, %v549_v4  ;;  %v13526_v0 = vld [vmem:[#allocation45_spill] sm:$0xff]  ;;  %v13527_v4 = vld [vmem:[#allocation46_spill] sm:$0xff] }
  0x7e   : > { %7485 = vmatprep.subr.bf16.mxu0 %v7484_v23  ;;  %v1393_v24 = vand.u32 4294901760, %v1392_v9  ;;  %v12925_v11 = vand.u32 4294901760, %v13524_v61  ;;  %v12927_v28 = vand.u32 4294901760, %v13525_v43  ;;  %v555_v59 = vsub.f32 %v13522_v19, %v12922_v10  ;;  %v13529_v19 = vld [vmem:[#allocation49_spill] sm:$0xff] }
  0x7f   : > { %7677 = vmatprep.subr.bf16.mxu1 %v7676_v31  ;;  %v1405_v27 = vand.u32 4294901760, %v1404_v3  ;;  %v567_v30 = vsub.f32 %v13523_v13, %v12923_v21  ;;  %v12933_v57 = vand.u32 4294901760, %v13526_v0  ;;  %v7486_v16 = vpack.c.bf16 %v550_v55, %v538_v56 }
  0x80   : > { %v1410_v23 = vsub.f32 %v13524_v61, %v12925_v11  ;;  %v1422_v31 = vsub.f32 %v13525_v43, %v12927_v28  ;;  %v12931_v9 = vand.u32 4294901760, %v13527_v4  ;;  %v556_v32 = vand.u32 4294901760, %v555_v59  ;;  %v13528_v11 = vld [vmem:[#allocation48_spill] sm:$0xff] }
  0x81   : > { %v7678_v3 = vpack.c.bf16 %v1405_v27, %v1393_v24  ;;  %v568_v10 = vand.u32 4294901760, %v567_v30  ;;  %v561_v21 = vsub.f32 %v13526_v0, %v12933_v57  ;;  %7487 = vmatpush1.bf16.msra.mxu0 %v7486_v16  ;;  %v12932_v61 = vand.u32 4294901760, %v13528_v11  ;;  %v13530_v24 = vld [vmem:[#allocation51_spill] sm:$0xff] }
  0x82   : > { %v1411_v13 = vand.u32 4294901760, %v1410_v23  ;;  %v1423_v56 = vand.u32 4294901760, %v1422_v31  ;;  %v573_v55 = vsub.f32 %v13527_v4, %v12931_v9  ;;  %v12934_v27 = vand.u32 4294901760, %v13529_v19  ;;  %v13531_v23 = vld [vmem:[#allocation52_spill] sm:$0xff] }
  0x83   : > { %7679 = vmatpush1.bf16.msra.mxu1 %v7678_v3  ;;  %v7488_v28 = vpack.c.bf16 %v568_v10, %v556_v32  ;;  %v562_v43 = vand.u32 4294901760, %v561_v21  ;;  %v12935_v59 = vand.u32 4294901760, %v13530_v24  ;;  %v1416_v16 = vsub.f32 %v13528_v11, %v12932_v61  ;;  %v13532_v21 = vld [vmem:[#allocation53_spill] sm:$0xff] }
  0x84   : > { %v7680_v30 = vpack.c.bf16 %v1423_v56, %v1411_v13  ;;  %v574_v25 = vand.u32 4294901760, %v573_v55  ;;  %v12936_v31 = vand.u32 4294901760, %v13531_v23  ;;  %v1428_v9 = vsub.f32 %v13529_v19, %v12934_v27 }
  0x85   : > { %7489 = vmatprep.subr.bf16.mxu0 %v7488_v28  ;;  %v579_v32 = vsub.f32 %v13530_v24, %v12935_v59  ;;  %v12938_v10 = vand.u32 4294901760, %v13532_v21  ;;  %v12941_v13 = vand.u32 4294901760, %v9424_v1  ;;  %v1417_v56 = vand.u32 4294901760, %v1416_v16 }
  0x86   : > { %7681 = vmatprep.subr.bf16.mxu1 %v7680_v30  ;;  %v7490_v3 = vpack.c.bf16 %v574_v25, %v562_v43  ;;  %v591_v55 = vsub.f32 %v13531_v23, %v12936_v31  ;;  %v12940_v28 = vand.u32 4294901760, %v9428_v29  ;;  %v1429_v61 = vand.u32 4294901760, %v1428_v9 }
  0x87   : > { %v580_v57 = vand.u32 4294901760, %v579_v32  ;;  %v1434_v27 = vsub.f32 %v13532_v21, %v12938_v10  ;;  %v1446_v59 = vsub.f32 %v9424_v1, %v12941_v13  ;;  %v12942_v43 = vand.u32 4294901760, %v9430_v34 }
  0x88   : > { %7491 = vmatpush1.bf16.msra.mxu0 %v7490_v3  ;;  %v592_v30 = vand.u32 4294901760, %v591_v55  ;;  %v585_v25 = vsub.f32 %v9428_v29, %v12940_v28  ;;  %v12948_v16 = vand.u32 4294901760, %v9434_v52  ;;  %v7682_v9 = vpack.c.bf16 %v1429_v61, %v1417_v56  ;;  %v13534_v56 = vld [vmem:[#allocation60_spill] sm:$0xff] }
  0x89   : > { %v1435_v32 = vand.u32 4294901760, %v1434_v27  ;;  %v1447_v31 = vand.u32 4294901760, %v1446_v59  ;;  %v12945_v23 = vand.u32 4294901760, %v9436_v46  ;;  %v597_v3 = vsub.f32 %v9430_v34, %v12942_v43  ;;  %v13533_v27 = vld [vmem:[#allocation59_spill] sm:$0xff] }
  0x8a   : > { %v7492_v10 = vpack.c.bf16 %v592_v30, %v580_v57  ;;  %v586_v21 = vand.u32 4294901760, %v585_v25  ;;  %v1440_v55 = vsub.f32 %v9434_v52, %v12948_v16  ;;  %7683 = vmatpush1.bf16.msra.mxu1 %v7682_v9  ;;  %v12946_v59 = vand.u32 4294901760, %v13533_v27 }
  0x8b   : > { %v7684_v28 = vpack.c.bf16 %v1447_v31, %v1435_v32  ;;  %v1452_v61 = vsub.f32 %v9436_v46, %v12945_v23  ;;  %v12947_v13 = vand.u32 4294901760, %v13534_v56  ;;  %v598_v57 = vand.u32 4294901760, %v597_v3 }
  0x8c   : > { %7493 = vmatprep.subr.bf16.mxu0 %v7492_v10  ;;  %v1441_v30 = vand.u32 4294901760, %v1440_v55  ;;  %v12949_v25 = vand.u32 4294901760, %v9455_v33  ;;  %v12950_v43 = vand.u32 4294901760, %v9461_v44  ;;  %v603_v31 = vsub.f32 %v13533_v27, %v12946_v59 }
  0x8d   : > { %7685 = vmatprep.subr.bf16.mxu1 %v7684_v28  ;;  %v1453_v34 = vand.u32 4294901760, %v1452_v61  ;;  %v615_v9 = vsub.f32 %v13534_v56, %v12947_v13  ;;  %v12956_v32 = vand.u32 4294901760, %v9465_v38  ;;  %v7494_v23 = vpack.c.bf16 %v598_v57, %v586_v21 }
  0x8e   : > { %v1458_v10 = vsub.f32 %v9455_v33, %v12949_v25  ;;  %v1470_v28 = vsub.f32 %v9461_v44, %v12950_v43  ;;  %v12955_v3 = vand.u32 4294901760, %v9468_v39  ;;  %v604_v61 = vand.u32 4294901760, %v603_v31 }
  0x8f   : > { %v7686_v55 = vpack.c.bf16 %v1453_v34, %v1441_v30  ;;  %v616_v59 = vand.u32 4294901760, %v615_v9  ;;  %v609_v13 = vsub.f32 %v9465_v38, %v12956_v32  ;;  %7495 = vmatpush1.bf16.msra.mxu0 %v7494_v23  ;;  %v12953_v25 = vand.u32 4294901760, %v9472_v48 }
  0x90   : > { %v1459_v16 = vand.u32 4294901760, %v1458_v10  ;;  %v1471_v21 = vand.u32 4294901760, %v1470_v28  ;;  %v621_v57 = vsub.f32 %v9468_v39, %v12955_v3  ;;  %v12954_v34 = vand.u32 4294901760, %v9474_v20 }
  0x91   : > { %7687 = vmatpush1.bf16.msra.mxu1 %v7686_v55  ;;  %v7496_v43 = vpack.c.bf16 %v616_v59, %v604_v61  ;;  %v610_v44 = vand.u32 4294901760, %v609_v13  ;;  %v1464_v9 = vsub.f32 %v9472_v48, %v12953_v25  ;;  %v7500_v10 = vpack.c.bf16 %v9242_v18, %v9240_v17  ;;  %v13535_v55 = vld [vmem:[#allocation8_spill] sm:$0xff] }
  0x92   : > { %v7688_v30 = vpack.c.bf16 %v1471_v21, %v1459_v16  ;;  %v622_v31 = vand.u32 4294901760, %v621_v57  ;;  %v1476_v23 = vsub.f32 %v9474_v20, %v12954_v34  ;;  %v13536_v16 = vld [vmem:[#allocation10_spill] sm:$0xff]  ;;  %v13537_v21 = vld [vmem:[#allocation12_spill] sm:$0xff]  ;;  %v13538_v34 = vld [vmem:[#allocation69_spill] sm:$0xff]  ;;  %v13540_v3 = vand.u32 4294901760, %v13535_v55 }
  0x93   : > { %7497 = vmatprep.subr.bf16.mxu0 %v7496_v43  ;;  %v1465_v59 = vand.u32 4294901760, %v1464_v9  ;;  %v7692_v61 = vpack.c.bf16 %v13536_v16, %v13535_v55  ;;  %v7502_v57 = vpack.c.bf16 %v13537_v21, %v9252_v26  ;;  %v7504_v43 = vpack.c.bf16 %v9269_v47, %v9265_v42 }
  0x94   : > { %7689 = vmatprep.subr.bf16.mxu1 %v7688_v30  ;;  %v7498_v28 = vpack.c.bf16 %v622_v31, %v610_v44  ;;  %v1477_v13 = vand.u32 4294901760, %v1476_v23  ;;  %v7694_v44 = vpack.c.bf16 %v9263_v41, %v9261_v40  ;;  %v7696_v30 = vpack.c.bf16 %v9276_v51, %v9273_v49 }
  0x95   : > { %v7506_v31 = vpack.c.bf16 %v9284_v62, %v9278_v53  ;;  %v7698_v9 = vpack.c.bf16 %v9290_v6, %v9286_v63  ;;  %v7508_v23 = vpack.c.bf16 %v9297_v12, %v9294_v8  ;;  %v13541_v32 = vand.u32 4294901760, %v13536_v16 }
  0x96   : > { %7499 = vmatpush1.bf16.msra.mxu0 %v7498_v28  ;;  %v7690_v25 = vpack.c.bf16 %v1477_v13, %v1465_v59  ;;  %v7702_v28 = vpack.c.bf16 %v9318_v50, %v9316_v45  ;;  %v7512_v59 = vpack.c.bf16 %v9326_v58, %v9322_v54  ;;  %v7704_v13 = vpack.c.bf16 %v9333_v2, %v9330_v60 }
  0x97   : > { %7501 = vmatprep.subr.bf16.mxu0 %v7500_v10  ;;  %v7510_v10 = vpack.c.bf16 %v9312_v36, %v9310_v35  ;;  %v9784_v18 = vpack.c.bf16 %v13541_v32, %v13540_v3  ;;  %v13542_v17 = vand.u32 4294901760, %v9252_v26  ;;  %v13544_v48 = vand.u32 4294901760, %v9261_v40 }
  0x98   : > { %7691 = vmatpush1.bf16.msra.mxu1 %v7690_v25  ;;  %v7700_v25 = vpack.c.bf16 %v9303_v15, %v9301_v14  ;;  %v13545_v39 = vand.u32 4294901760, %v9263_v41  ;;  %v13546_v55 = vand.u32 4294901760, %v9265_v42  ;;  %v13547_v32 = vand.u32 4294901760, %v9269_v47 }
  0x99   : > { %658 = vmatmul.mubr.f32.vlgmr.msra.gmra.mrb[0].mxu0 %v13538_v34  ;;  %7693 = vmatprep.subr.bf16.mxu1 %v7692_v61  ;;  %v7514_v61 = vpack.c.bf16 %v9340_v37, %v9336_v22  ;;  %v13548_v26 = vand.u32 4294901760, %v9273_v49  ;;  %v13549_v16 = vand.u32 4294901760, %v9276_v51  ;;  %v13550_v40 = vand.u32 4294901760, %v9278_v53 }
  0x9a   : > { %7503 = vmatpush1.bf16.msra.mxu0 %v7502_v57  ;;  %v7516_v57 = vpack.c.bf16 %v9352_v7, %v9350_v5  ;;  %v9797_v38 = vpack.c.bf16 %v13545_v39, %v13544_v48  ;;  %v9803_v3 = vpack.c.bf16 %v13547_v32, %v13546_v55  ;;  %v13551_v41 = vand.u32 4294901760, %v9284_v62 }
  0x9b   : > { %7505 = vmatprep.subr.bf16.mxu0 %v7504_v43  ;;  %1513 = vmatmul.mubr.f32.vlgmr.msra.gmra.mrb[0].mxu1 %v13538_v34  ;;  %v13539_v43 = vmov 0.0   ;;  %v13543_v34 = vand.u32 4294901760, %v13537_v21  ;;  %v13552_v42 = vand.u32 4294901760, %v9286_v63  ;;  %v13553_v47 = vand.u32 4294901760, %v9290_v6 }
  0x9c   : > { %792 = vmatprep.mubr.f32.mxu0 %v13539_v43  ;;  %7695 = vmatpush1.bf16.msra.mxu1 %v7694_v44  ;;  %v9815_v39 = vpack.c.bf16 %v13551_v41, %v13550_v40  ;;  %v13555_v49 = vand.u32 4294901760, %v9297_v12  ;;  %v13556_v21 = vand.u32 4294901760, %v9301_v14  ;;  %v13557_v53 = vand.u32 4294901760, %v9303_v15  ;;  %v13574_v41 = vld [vmem:[#allocation29_spill] sm:$0xff] }
  0x9d   : > { %1647 = vmatprep.mubr.f32.mxu1 %v13539_v43  ;;  %v9791_v20 = vpack.c.bf16 %v13543_v34, %v13542_v17  ;;  %7697 = vmatprep.subr.bf16.mxu1 %v7696_v30  ;;  %v9809_v17 = vpack.c.bf16 %v13549_v16, %v13548_v26  ;;  %v9821_v48 = vpack.c.bf16 %v13553_v47, %v13552_v42  ;;  %v13554_v34 = vand.u32 4294901760, %v9294_v8  ;;  %v13570_v16 = vld [vmem:[#allocation27_spill] sm:$0xff] }
  0x9e   : > { %7507 = vmatpush1.bf16.msra.mxu0 %v7506_v31  ;;  %v9833_v62 = vpack.c.bf16 %v13557_v53, %v13556_v21  ;;  %v13558_v44 = vand.u32 4294901760, %v9310_v35  ;;  %v13559_v63 = vand.u32 4294901760, %v9312_v36  ;;  %v13560_v30 = vand.u32 4294901760, %v9316_v45  ;;  %v13580_v21 = vld [vmem:[#allocation34_spill] sm:$0xff] }
  0x9f   : > { %7509 = vmatprep.subr.bf16.mxu0 %v7508_v23  ;;  %v9827_v51 = vpack.c.bf16 %v13555_v49, %v13554_v34  ;;  %v13561_v8 = vand.u32 4294901760, %v9318_v50  ;;  %v13562_v12 = vand.u32 4294901760, %v9322_v54  ;;  %v13563_v14 = vand.u32 4294901760, %v9326_v58  ;;  %v13568_v50 = vld [vmem:[#allocation26_spill] sm:$0xff]  ;;  %v13578_v34 = vld [vmem:[#allocation33_spill] sm:$0xff] }
  0xa0   : > { %v9839_v6 = vpack.c.bf16 %v13559_v63, %v13558_v44  ;;  %v13564_v15 = vand.u32 4294901760, %v9330_v60  ;;  %v13565_v35 = vand.u32 4294901760, %v9333_v2  ;;  %v13566_v36 = vand.u32 4294901760, %v9336_v22  ;;  %7699 = vmatpush1.bf16.msra.mxu1 %v7698_v9  ;;  %v13576_v22 = vld [vmem:[#allocation31_spill] sm:$0xff]  ;;  %v13583_v63 = vld [vmem:[#allocation36_spill] sm:$0xff] }
  0xa1   : > { %v9845_v31 = vpack.c.bf16 %v13561_v8, %v13560_v30  ;;  %v9851_v23 = vpack.c.bf16 %v13563_v14, %v13562_v12  ;;  %v13567_v45 = vand.u32 4294901760, %v9340_v37  ;;  %v13569_v26 = vand.u32 4294901760, %v13568_v50  ;;  %v13585_v30 = vld [vmem:[#allocation37_spill] sm:$0xff]  ;;  %7701 = vmatprep.subr.bf16.mxu1 %v7700_v25  ;;  %v13590_v14 = vld [vmem:[#allocation40_spill] sm:$0xff] }
  0xa2   : > { %v9857_v55 = vpack.c.bf16 %v13565_v35, %v13564_v15  ;;  %v13571_v54 = vand.u32 4294901760, %v13570_v16  ;;  %v13572_v58 = vand.u32 4294901760, %v9350_v5  ;;  %v13573_v60 = vand.u32 4294901760, %v9352_v7  ;;  %7511 = vmatpush1.bf16.msra.mxu0 %v7510_v10  ;;  %v13588_v7 = vld [vmem:[#allocation39_spill] sm:$0xff] }
  0xa3   : > { %v9863_v32 = vpack.c.bf16 %v13567_v45, %v13566_v36  ;;  %v13575_v42 = vand.u32 4294901760, %v13574_v41  ;;  %v13577_v47 = vand.u32 4294901760, %v13576_v22  ;;  %v13579_v49 = vand.u32 4294901760, %v13578_v34  ;;  %v13593_v36 = vld [vmem:[#allocation41_spill] sm:$0xff]  ;;  %7513 = vmatprep.subr.bf16.mxu0 %v7512_v59 }
  0xa4   : > { %v9869_v40 = vpack.c.bf16 %v13571_v54, %v13569_v26  ;;  %v9875_v2 = vpack.c.bf16 %v13573_v60, %v13572_v58  ;;  %v13581_v53 = vand.u32 4294901760, %v13580_v21  ;;  %v13584_v9 = vand.u32 4294901760, %v13583_v63  ;;  %v13595_v26 = vld [vmem:[#allocation43_spill] sm:$0xff]  ;;  %7703 = vmatpush1.bf16.msra.mxu1 %v7702_v28 }
  0xa5   : > { %v9881_v37 = vpack.c.bf16 %v13577_v47, %v13575_v42  ;;  %v13586_v5 = vand.u32 4294901760, %v13585_v30  ;;  %v13589_v12 = vand.u32 4294901760, %v13588_v7  ;;  %v13591_v15 = vand.u32 4294901760, %v13590_v14  ;;  %7705 = vmatprep.subr.bf16.mxu1 %v7704_v13 }
  0xa6   : > { %v9887_v44 = vpack.c.bf16 %v13581_v53, %v13579_v49  ;;  %v13594_v45 = vand.u32 4294901760, %v13593_v36  ;;  %v13596_v54 = vand.u32 4294901760, %v13595_v26  ;;  %v13598_v60 = vand.u32 4294901760, %v13526_v0  ;;  %7515 = vmatpush1.bf16.msra.mxu0 %v7514_v61 }
  0xa7   : > { %v9893_v8 = vpack.c.bf16 %v13586_v5, %v13584_v9  ;;  %v9899_v35 = vpack.c.bf16 %v13591_v15, %v13589_v12  ;;  %v13599_v42 = vand.u32 4294901760, %v13527_v4  ;;  %v13601_v25 = vand.u32 4294901760, %v13528_v11  ;;  %v13605_v9 = vld [vmem:[#allocation52_spill] sm:$0xff]  ;;  %v13608_v15 = vld [vmem:[#allocation53_spill] sm:$0xff]  ;;  %7517 = vmatprep.subr.bf16.mxu0 %v7516_v57 }
  0xa8   : > { %13582 = vst [vmem:[#allocation45_spill] sm:$0xff] %v9887_v44  ;;  %v9905_v58 = vpack.c.bf16 %v13596_v54, %v13594_v45  ;;  %v13602_v10 = vand.u32 4294901760, %v13529_v19  ;;  %v13604_v53 = vand.u32 4294901760, %v13530_v24  ;;  %v13606_v5 = vand.u32 4294901760, %v13605_v9 }
  0xa9   : > { %13587 = vst [vmem:[#allocation46_spill] sm:$0xff] %v9893_v8  ;;  %13592 = vst [vmem:[#allocation48_spill] sm:$0xff] %v9899_v35  ;;  %v9911_v47 = vpack.c.bf16 %v13599_v42, %v13598_v60  ;;  %v13609_v45 = vand.u32 4294901760, %v13608_v15  ;;  %v13610_v54 = vand.u32 4294901760, %v9424_v1  ;;  %v13612_v59 = vand.u32 4294901760, %v9428_v29  ;;  %v13613_v60 = vld [vmem:[#allocation56_spill] sm:$0xff] }
  0xaa   : > { %13597 = vst [vmem:[#allocation49_spill] sm:$0xff] %v9905_v58  ;;  %v9917_v49 = vpack.c.bf16 %v13602_v10, %v13601_v25  ;;  %v9923_v12 = vpack.c.bf16 %v13606_v5, %v13604_v53  ;;  %v13614_v42 = vand.u32 4294901760, %v13613_v60  ;;  %v13616_v25 = vand.u32 4294901760, %v9434_v52 }
  0xab   : > { %13600 = vst [vmem:[#allocation51_spill] sm:$0xff] %v9911_v47  ;;  %v9929_v58 = vpack.c.bf16 %v13610_v54, %v13609_v45  ;;  %v13617_v10 = vand.u32 4294901760, %v9436_v46  ;;  %v13619_v53 = vand.u32 4294901760, %v13533_v27  ;;  %v13620_v5 = vand.u32 4294901760, %v13534_v56  ;;  %v13623_v54 = vld [vmem:[#allocation62_spill] sm:$0xff] }
  0xac   : > { %13603 = vst [vmem:[#allocation59_spill] sm:$0xff] %v9917_v49  ;;  %13607 = vst [vmem:[#allocation60_spill] sm:$0xff] %v9923_v12  ;;  %v9935_v47 = vpack.c.bf16 %v13614_v42, %v13612_v59  ;;  %v13622_v45 = vand.u32 4294901760, %v9455_v33  ;;  %v13625_v59 = vld [vmem:[#allocation64_spill] sm:$0xff]  ;;  %v7520_v28 = vpack.c.bf16 %v13590_v14, %v13588_v7  ;;  %v7712_v13 = vpack.c.bf16 %v13595_v26, %v13593_v36  ;;  %v13645_v14 = vld [vmem:[#allocation22_spill] sm:$0xff] }
  0xad   : > { %13611 = vst [vmem:[#allocation8_spill] sm:$0xff] %v9929_v58  ;;  %v9941_v49 = vpack.c.bf16 %v13617_v10, %v13616_v25  ;;  %v9947_v12 = vpack.c.bf16 %v13620_v5, %v13619_v53  ;;  %v13624_v58 = vand.u32 4294901760, %v13623_v54  ;;  %v13626_v42 = vand.u32 4294901760, %v13625_v59  ;;  %v13629_v10 = vld [vmem:[#allocation67_spill] sm:$0xff]  ;;  %v13631_v53 = vld [vmem:[#allocation68_spill] sm:$0xff] }
  0xae   : > { %13615 = vst [vmem:[#allocation10_spill] sm:$0xff] %v9935_v47  ;;  %v13627_v47 = vld [vmem:[#allocation65_spill] sm:$0xff]  ;;  %v7706_v25 = vpack.c.bf16 %v13570_v16, %v13568_v50  ;;  %v13632_v5 = vand.u32 4294901760, %v13631_v53  ;;  %v7710_v50 = vpack.c.bf16 %v13585_v30, %v13583_v63  ;;  %v7522_v61 = vpack.c.bf16 %v13527_v4, %v13526_v0  ;;  %v13643_v30 = vld [vmem:[#allocation19_spill] sm:$0xff]  ;;  %v13644_v7 = vld [vmem:[#allocation20_spill] sm:$0xff] }
  0xaf   : > { %13618 = vst [vmem:[#allocation12_spill] sm:$0xff] %v9941_v49  ;;  %13621 = vst [vmem:[#allocation26_spill] sm:$0xff] %v9947_v12  ;;  %v9953_v8 = vpack.c.bf16 %v13624_v58, %v13622_v45  ;;  %v13628_v35 = vand.u32 4294901760, %v13627_v47  ;;  %v13630_v49 = vand.u32 4294901760, %v13629_v10  ;;  %v7708_v58 = vpack.c.bf16 %v13576_v22, %v13574_v41  ;;  %v13642_v63 = vld [vmem:[#allocation17_spill] sm:$0xff]  ;;  %v13647_v36 = vld [vmem:[#allocation23_spill] sm:$0xff] }
  0xb0   : > { %v7518_v45 = vpack.c.bf16 %v13580_v21, %v13578_v34  ;;  %7707 = vmatpush1.bf16.msra.mxu1 %v7706_v25  ;;  %v7524_v16 = vpack.c.bf16 %v13605_v9, %v13530_v24  ;;  %v7714_v57 = vpack.c.bf16 %v13529_v19, %v13528_v11  ;;  %v7716_v41 = vpack.c.bf16 %v9424_v1, %v13608_v15  ;;  %v13634_v24 = vld [vmem:[#allocation70_spill] sm:$0xff]  ;;  %v13640_v34 = vld [vmem:[#allocation16_spill] sm:$0xff] }
  0xb1   : > { %v9959_v44 = vpack.c.bf16 %v13628_v35, %v13626_v42  ;;  %v9967_v12 = vpack.c.bf16 %v13632_v5, %v13630_v49  ;;  %7709 = vmatprep.subr.bf16.mxu1 %v7708_v58  ;;  %v7526_v22 = vpack.c.bf16 %v13613_v60, %v9428_v29  ;;  %v7528_v0 = vpack.c.bf16 %v13534_v56, %v13533_v27  ;;  %v13633_v29 = vld [vmem:[#allocation5_spill] sm:$0xff]  ;;  %v13639_v56 = vld [vmem:[#allocation15_spill] sm:$0xff]  ;;  %v13641_v21 = vld [vmem:[#allocation18_spill] sm:$0xff] }
  0xb2   : > { %7519 = vmatpush1.bf16.msra.mxu0 %v7518_v45  ;;  %v7718_v4 = vpack.c.bf16 %v9436_v46, %v9434_v52  ;;  %v7720_v11 = vpack.c.bf16 %v13623_v54, %v9455_v33  ;;  %v7530_v19 = vpack.c.bf16 %v13627_v47, %v13625_v59  ;;  %v7722_v1 = vpack.c.bf16 %v13631_v53, %v13629_v10  ;;  %v13635_v46 = vld [vmem:[#allocation9_spill] sm:$0xff]  ;;  %v13636_v52 = vld [vmem:[#allocation11_spill] sm:$0xff]  ;;  %v13637_v33 = vld [vmem:[#allocation14_spill] sm:$0xff] }
  0xb3   : > { %7521 = vmatprep.subr.bf16.mxu0 %v7520_v28  ;;  %v13638_v27 = vld [vmem:[#allocation13_spill] sm:$0xff]  ;;  %v13648_v26 = vld [vmem:[#allocation24_spill] sm:$0xff]  ;;  %v13651_v9 = vld [vmem:[#allocation30_spill] sm:$0xff] }
  0xb4   : > { %7711 = vmatpush1.bf16.msra.mxu1 %v7710_v50  ;;  %v13646_v35 = vld [vmem:[#allocation21_spill] sm:$0xff]  ;;  %v13649_v47 = vld [vmem:[#allocation28_spill] sm:$0xff]  ;;  %v13653_v60 = vld [vmem:[#allocation38_spill] sm:$0xff] }
  0xb5   : > { %7713 = vmatprep.subr.bf16.mxu1 %v7712_v13  ;;  %v13650_v49 = vld [vmem:[#allocation25_spill] sm:$0xff]  ;;  %v13652_v15 = vld [vmem:[#allocation32_spill] sm:$0xff]  ;;  %v13654_v54 = vld [vmem:[#allocation35_spill] sm:$0xff] }
  0xb6   : > { %7523 = vmatpush1.bf16.msra.mxu0 %v7522_v61  ;;  %v13655_v59 = vld [vmem:[#allocation42_spill] sm:$0xff]  ;;  %v13656_v42 = vld [vmem:[#allocation44_spill] sm:$0xff]  ;;  %v13658_v10 = vld [vmem:[#allocation47_spill] sm:$0xff] }
  0xb7   : > { %7525 = vmatprep.subr.bf16.mxu0 %v7524_v16  ;;  %v13657_v25 = vld [vmem:[#allocation50_spill] sm:$0xff]  ;;  %v13660_v5 = vld [vmem:[#allocation55_spill] sm:$0xff]  ;;  %v13666_v16 = vld [vmem:[#allocation57_spill] sm:$0xff] }
  0xb8   : > { %7715 = vmatpush1.bf16.msra.mxu1 %v7714_v57  ;;  %v13659_v53 = vld [vmem:[#allocation54_spill] sm:$0xff]  ;;  %v13664_v50 = vld [vmem:[#allocation7_spill] sm:$0xff]  ;;  %v13667_v57 = vld [vmem:[#allocation61_spill] sm:$0xff] }
  0xb9   : > { %7717 = vmatprep.subr.bf16.mxu1 %v7716_v41  ;;  %v13661_v58 = vld [vmem:[#allocation58_spill] sm:$0xff]  ;;  %v13665_v13 = vand.u32 4294901760, %v13664_v50  ;;  %v13668_v41 = vld [vmem:[#allocation63_spill] sm:$0xff] }
  0xba   : > { %7527 = vmatpush1.bf16.msra.mxu0 %v7526_v22  ;;  %v13662_v45 = vld [vmem:[#allocation6_spill] sm:$0xff] }
  0xbb   : > { %7529 = vmatprep.subr.bf16.mxu0 %v7528_v0  ;;  %v13663_v28 = vand.u32 4294901760, %v13662_v45  ;;  %v13669_v22 = vld [vmem:[#allocation66_spill] sm:$0xff]  ;;  %v13670_v0 = vld [vmem:[#allocation71_spill] sm:$0xff] }
  0xbc   : > { %7719 = vmatpush1.bf16.msra.mxu1 %v7718_v4  ;;  %v195_v4 = vld [vmem:[#allocation2 + $0x10] sm:$0xff] }
  0xbd   : > { %7721 = vmatprep.subr.bf16.mxu1 %v7720_v11  ;;  %v7564_v61 = vpack.c.bf16 %v13665_v13, %v13663_v28  ;;  %v202_v11 = vld [vmem:[#allocation2 + $0x48] sm:$0xff] }
  0xbe   : > { %7531 = vmatpush1.bf16.msra.mxu0 %v7530_v19 }
  0xbf   : > { %7533 = vmatprep.subr.bf16.mxu0 %v13633_v29 }
  0xc0   : > { %7723 = vmatpush1.bf16.msra.mxu1 %v7722_v1 }
  0xc1   : > { %795 = vmatmul.mubr.f32.vlgmr.msra.gmra.mrb[0].mxu0 %v13634_v24  ;;  %7725 = vmatprep.subr.bf16.mxu1 %v13635_v46 }
  0xc2   : > { %7535 = vmatpush1.bf16.msra.mxu0 %v13636_v52  ;;  %897 = vmatprep.mubr.f32.mxu0 %v13539_v43 }
  0xc3   : > { %7537 = vmatprep.subr.bf16.mxu0 %v13637_v33  ;;  %1650 = vmatmul.mubr.f32.vlgmr.msra.gmra.mrb[0].mxu1 %v13634_v24  ;;  %v204_v24 = vld [vmem:[#allocation2 + $0x58] sm:$0xff] }
  0xc4   : > { %7727 = vmatpush1.bf16.msra.mxu1 %v13638_v27  ;;  %1752 = vmatprep.mubr.f32.mxu1 %v13539_v43 }
  0xc5   : > { %7729 = vmatprep.subr.bf16.mxu1 %v13639_v56 }
  0xc6   : > { %7539 = vmatpush1.bf16.msra.mxu0 %v13640_v34 }
  0xc7   : > { %7541 = vmatprep.subr.bf16.mxu0 %v13641_v21 }
  0xc8   : > { %7731 = vmatpush1.bf16.msra.mxu1 %v13642_v63 }
  0xc9   : > { %7733 = vmatprep.subr.bf16.mxu1 %v13643_v30 }
  0xca   : > { %7543 = vmatpush1.bf16.msra.mxu0 %v13644_v7 }
  0xcb   : > { %7545 = vmatprep.subr.bf16.mxu0 %v13645_v14 }
  0xcc   : > { %7735 = vmatpush1.bf16.msra.mxu1 %v13646_v35 }
  0xcd   : > { %7737 = vmatprep.subr.bf16.mxu1 %v13647_v36 }
  0xce   : > { %7547 = vmatpush1.bf16.msra.mxu0 %v13648_v26 }
  0xcf   : > { %7549 = vmatprep.subr.bf16.mxu0 %v13649_v47 }
  0xd0   : > { %7739 = vmatpush1.bf16.msra.mxu1 %v13650_v49 }
  0xd1   : > { %7741 = vmatprep.subr.bf16.mxu1 %v13651_v9 }
  0xd2   : > { %7551 = vmatpush1.bf16.msra.mxu0 %v13652_v15 }
  0xd3   : > { %7553 = vmatprep.subr.bf16.mxu0 %v13653_v60 }
  0xd4   : > { %7743 = vmatpush1.bf16.msra.mxu1 %v13654_v54 }
  0xd5   : > { %7745 = vmatprep.subr.bf16.mxu1 %v13655_v59 }
  0xd6   : > { %7555 = vmatpush1.bf16.msra.mxu0 %v13656_v42 }
  0xd7   : > { %7557 = vmatprep.subr.bf16.mxu0 %v13657_v25 }
  0xd8   : > { %7747 = vmatpush1.bf16.msra.mxu1 %v13658_v10 }
  0xd9   : > { %7749 = vmatprep.subr.bf16.mxu1 %v13659_v53 }
  0xda   : > { %7559 = vmatpush1.bf16.msra.mxu0 %v13660_v5  ;;  %v13677_v5 = vld [vmem:[#allocation46_spill] sm:$0xff] }
  0xdb   : > { %7561 = vmatprep.subr.bf16.mxu0 %v13661_v58  ;;  %v203_v58 = vld [vmem:[#allocation2 + $0x50] sm:$0xff] }
  0xdc   : > { %7751 = vmatpush1.bf16.msra.mxu1 %v13666_v16  ;;  %v2897_v16 = vand.u32 4294901760, %v204_v24 }
  0xdd   : > { %7753 = vmatprep.subr.bf16.mxu1 %v13667_v57 }
  0xde   : > { %7563 = vmatpush1.bf16.msra.mxu0 %v13668_v41  ;;  %v2042_v41 = vand.u32 4294901760, %v202_v11 }
  0xdf   : > { %7565 = vmatprep.subr.bf16.mxu0 %v7564_v61 }
  0xe0   : > { %7755 = vmatpush1.bf16.msra.mxu1 %v13669_v22  ;;  %v205_v22 = vld [vmem:[#allocation2 + $0x60] sm:$0xff] }
  0xe1   : > { %901 = vmatmul.mubr.f32.vlgmr.msra.gmra.mrb[0].mxu0 %v13670_v0  ;;  %7757 = vmatprep.subr.bf16.mxu1 %v9784_v18  ;;  %v194_v18 = vld [vmem:[#allocation2 + $0x8] sm:$0xff]  ;;  %v2048_v25 = vand.u32 4294901760, %v205_v22 }
  0xe2   : > { %7567 = vmatpush1.bf16.msra.mxu0 %v9791_v20  ;;  %1067 = vmatprep.mubr.f32.mxu0 %v13539_v43  ;;  %v198_v20 = vld [vmem:[#allocation2 + $0x28] sm:$0xff] }
  0xe3   : > { %7569 = vmatprep.subr.bf16.mxu0 %v9803_v3  ;;  %1756 = vmatmul.mubr.f32.vlgmr.msra.gmra.mrb[0].mxu1 %v13670_v0  ;;  %v196_v3 = vld [vmem:[#allocation2 + $0x18] sm:$0xff]  ;;  %v201_v0 = vld [vmem:[#allocation2 + $0x40] sm:$0xff] }
  0xe4   : > { %7759 = vmatpush1.bf16.msra.mxu1 %v9797_v38  ;;  %1922 = vmatprep.mubr.f32.mxu1 %v13539_v43  ;;  %v200_v38 = vld [vmem:[#allocation2 + $0x38] sm:$0xff]  ;;  %v2044_v10 = vand.u32 4294901760, %v201_v0 }
  0xe5   : > { %7761 = vmatprep.subr.bf16.mxu1 %v9809_v17  ;;  %v2034_v17 = vand.u32 4294901760, %v194_v18 }
  0xe6   : > { %7571 = vmatpush1.bf16.msra.mxu0 %v9815_v39  ;;  %v2038_v39 = vand.u32 4294901760, %v198_v20 }
  0xe7   : > { %7573 = vmatprep.subr.bf16.mxu0 %v9827_v51  ;;  %v193_v51 = vld [vmem:[#allocation2] sm:$0xff]  ;;  %v10063_v28 = vsub.f32 %v194_v18, %v2034_v17 }
  0xe8   : > { %7763 = vmatpush1.bf16.msra.mxu1 %v9821_v48  ;;  %v197_v48 = vld [vmem:[#allocation2 + $0x20] sm:$0xff]  ;;  %v2036_v19 = vand.u32 4294901760, %v193_v51  ;;  %v10061_v45 = vpack.c.bf16 %v2038_v39, %v2034_v17  ;;  %v10066_v50 = vsub.f32 %v198_v20, %v2038_v39 }
  0xe9   : > { %7765 = vmatprep.subr.bf16.mxu1 %v9833_v62  ;;  %v2889_v62 = vand.u32 4294901760, %v196_v3  ;;  %v2040_v1 = vand.u32 4294901760, %v197_v48  ;;  %13673 = vst [vmem:[#allocation29_spill] sm:$0xff] %v10063_v28 }
  0xea   : > { %7575 = vmatpush1.bf16.msra.mxu0 %v9839_v6  ;;  %v2893_v6 = vand.u32 4294901760, %v200_v38  ;;  %13672 = vst [vmem:[#allocation27_spill] sm:$0xff] %v10061_v45  ;;  %13675 = vst [vmem:[#allocation31_spill] sm:$0xff] %v10066_v50  ;;  %v10077_v39 = vsub.f32 %v193_v51, %v2036_v19  ;;  %v210_v50 = vld [vmem:[#allocation2 + $0x88] sm:$0xff]  ;;  %v2899_v51 = vand.u32 4294901760, %v203_v58 }
  0xeb   : > { %7577 = vmatprep.subr.bf16.mxu0 %v9851_v23  ;;  %v199_v23 = vld [vmem:[#allocation2 + $0x30] sm:$0xff]  ;;  %v10071_v18 = vsub.f32 %v196_v3, %v2889_v62  ;;  %v10075_v20 = vpack.c.bf16 %v2040_v1, %v2036_v19  ;;  %v10081_v45 = vsub.f32 %v197_v48, %v2040_v1  ;;  %v13686_v3 = vld [vmem:[#allocation60_spill] sm:$0xff]  ;;  %v10092_v48 = vsub.f32 %v202_v11, %v2042_v41 }
  0xec   : > { %7767 = vmatpush1.bf16.msra.mxu1 %v9845_v31  ;;  %v206_v31 = vld [vmem:[#allocation2 + $0x68] sm:$0xff]  ;;  %v10068_v13 = vpack.c.bf16 %v2893_v6, %v2889_v62  ;;  %v2895_v61 = vand.u32 4294901760, %v199_v23  ;;  %v10073_v17 = vsub.f32 %v200_v38, %v2893_v6  ;;  %13681 = vst [vmem:[#allocation39_spill] sm:$0xff] %v10077_v39  ;;  %v212_v19 = vld [vmem:[#allocation2 + $0x98] sm:$0xff]  ;;  %v10107_v11 = vsub.f32 %v201_v0, %v2044_v10 }
  0xed   : > { %7769 = vmatprep.subr.bf16.mxu1 %v9857_v55  ;;  %v208_v55 = vld [vmem:[#allocation2 + $0x78] sm:$0xff]  ;;  %v2046_v57 = vand.u32 4294901760, %v206_v31  ;;  %13678 = vst [vmem:[#allocation34_spill] sm:$0xff] %v10071_v18  ;;  %13680 = vst [vmem:[#allocation37_spill] sm:$0xff] %v10075_v20 }
  0xee   : > { %7579 = vmatpush1.bf16.msra.mxu0 %v9863_v32  ;;  %v13671_v32 = vld [vmem:[#allocation45_spill] sm:$0xff]  ;;  %13676 = vst [vmem:[#allocation33_spill] sm:$0xff] %v10068_v13  ;;  %13679 = vst [vmem:[#allocation36_spill] sm:$0xff] %v10073_v17  ;;  %v13683_v13 = vld [vmem:[#allocation51_spill] sm:$0xff]  ;;  %v10088_v62 = vsub.f32 %v199_v23, %v2895_v61 }
  0xef   : > { %7581 = vmatprep.subr.bf16.mxu0 %v9875_v2  ;;  %v13674_v2 = vld [vmem:[#allocation48_spill] sm:$0xff]  ;;  %13684 = vst [vmem:[#allocation40_spill] sm:$0xff] %v10081_v45  ;;  %v10090_v20 = vpack.c.bf16 %v2046_v57, %v2042_v41  ;;  %13690 = vst [vmem:[#allocation56_spill] sm:$0xff] %v10092_v48  ;;  %v13693_v45 = vld [vmem:[#allocation59_spill] sm:$0xff] }
  0xf0   : > { %7771 = vmatpush1.bf16.msra.mxu1 %v9869_v40  ;;  %v2891_v40 = vand.u32 4294901760, %v195_v4  ;;  %13688 = vst [vmem:[#allocation52_spill] sm:$0xff] %v10088_v62  ;;  %v215_v62 = vld [vmem:[#allocation2 + $0xb0] sm:$0xff]  ;;  %v13696_v39 = vld [vmem:[#allocation8_spill] sm:$0xff]  ;;  %v13697_v41 = vld [vmem:[#allocation10_spill] sm:$0xff] }
  0xf1   : > { %7773 = vmatprep.subr.bf16.mxu1 %v9881_v37  ;;  %v2901_v37 = vand.u32 4294901760, %v208_v55  ;;  %13689 = vst [vmem:[#allocation53_spill] sm:$0xff] %v10090_v20  ;;  %13699 = vst [vmem:[#allocation5_spill] sm:$0xff] %v10107_v11  ;;  %v218_v20 = vld [vmem:[#allocation2 + $0xc8] sm:$0xff]  ;;  %v2911_v0 = vand.u32 4294901760, %v215_v62 }
  0xf2   : > { %7583 = vmatpush1.bf16.msra.mxu0 %v13671_v32  ;;  %v207_v32 = vld [vmem:[#allocation2 + $0x70] sm:$0xff]  ;;  %v10083_v53 = vsub.f32 %v195_v4, %v2891_v40  ;;  %v10086_v38 = vpack.c.bf16 %v2895_v61, %v2891_v40  ;;  %v10094_v4 = vsub.f32 %v206_v31, %v2046_v57  ;;  %v10099_v40 = vsub.f32 %v204_v24, %v2897_v16 }
  0xf3   : > { %7585 = vmatprep.subr.bf16.mxu0 %v13674_v2  ;;  %v13682_v2 = vld [vmem:[#allocation49_spill] sm:$0xff]  ;;  %v2903_v6 = vand.u32 4294901760, %v207_v32  ;;  %v10096_v1 = vpack.c.bf16 %v2901_v37, %v2897_v16  ;;  %v10101_v23 = vsub.f32 %v208_v55, %v2901_v37  ;;  %v2050_v61 = vand.u32 4294901760, %v210_v50  ;;  %v13700_v16 = vld [vmem:[#allocation26_spill] sm:$0xff] }
  0xf4   : > { %7775 = vmatpush1.bf16.msra.mxu1 %v13677_v5  ;;  %13685 = vst [vmem:[#allocation41_spill] sm:$0xff] %v10083_v53  ;;  %v214_v5 = vld [vmem:[#allocation2 + $0xa8] sm:$0xff]  ;;  %13687 = vst [vmem:[#allocation43_spill] sm:$0xff] %v10086_v38  ;;  %v213_v53 = vld [vmem:[#allocation2 + $0xa0] sm:$0xff]  ;;  %v10105_v57 = vpack.c.bf16 %v2048_v25, %v2044_v10  ;;  %v2905_v31 = vand.u32 4294901760, %v212_v19  ;;  %v10110_v24 = vsub.f32 %v205_v22, %v2048_v25  ;;  %v2058_v25 = vand.u32 4294901760, %v218_v20 }
  0xf5   : > { %7777 = vmatprep.subr.bf16.mxu1 %v13682_v2  ;;  %v216_v2 = vld [vmem:[#allocation2 + $0xb8] sm:$0xff]  ;;  %13691 = vst [vmem:[#allocation62_spill] sm:$0xff] %v10094_v4  ;;  %13692 = vst [vmem:[#allocation64_spill] sm:$0xff] %v10096_v1  ;;  %v211_v38 = vld [vmem:[#allocation2 + $0x90] sm:$0xff]  ;;  %v10112_v55 = vpack.c.bf16 %v2903_v6, %v2899_v51  ;;  %v10114_v4 = vsub.f32 %v203_v58, %v2899_v51  ;;  %v10121_v48 = vsub.f32 %v210_v50, %v2050_v61 }
  0xf6   : > { %7587 = vmatpush1.bf16.msra.mxu0 %v13683_v13  ;;  %v209_v13 = vld [vmem:[#allocation2 + $0x80] sm:$0xff]  ;;  %13694 = vst [vmem:[#allocation65_spill] sm:$0xff] %v10099_v40  ;;  %13695 = vst [vmem:[#allocation67_spill] sm:$0xff] %v10101_v23  ;;  %v2909_v1 = vand.u32 4294901760, %v216_v2  ;;  %v2056_v23 = vand.u32 4294901760, %v213_v53  ;;  %v220_v40 = vld [vmem:[#allocation2 + $0xd8] sm:$0xff] }
  0xf7   : > { %7589 = vmatprep.subr.bf16.mxu0 %v13686_v3  ;;  %v2054_v3 = vand.u32 4294901760, %v214_v5  ;;  %13698 = vst [vmem:[#allocation68_spill] sm:$0xff] %v10105_v57  ;;  %13701 = vst [vmem:[#allocation70_spill] sm:$0xff] %v10110_v24  ;;  %v2052_v37 = vand.u32 4294901760, %v209_v13  ;;  %v2907_v10 = vand.u32 4294901760, %v211_v38  ;;  %v13705_v57 = vld [vmem:[#allocation12_spill] sm:$0xff] }
  0xf8   : > { %7779 = vmatpush1.bf16.msra.mxu1 %v13693_v45  ;;  %v222_v45 = vld [vmem:[#allocation2 + $0xe8] sm:$0xff]  ;;  %13702 = vst [vmem:[#allocation9_spill] sm:$0xff] %v10112_v55  ;;  %13703 = vst [vmem:[#allocation11_spill] sm:$0xff] %v10114_v4  ;;  %v221_v55 = vld [vmem:[#allocation2 + $0xe0] sm:$0xff]  ;;  %v2913_v51 = vand.u32 4294901760, %v220_v40  ;;  %v10132_v50 = vsub.f32 %v216_v2, %v2909_v1  ;;  %v10146_v2 = vsub.f32 %v215_v62, %v2911_v0 }
  0xf9   : > { %7781 = vmatprep.subr.bf16.mxu1 %v13696_v39  ;;  %v224_v39 = vld [vmem:[#allocation2 + $0xf8] sm:$0xff]  ;;  %v10119_v11 = vpack.c.bf16 %v2054_v3, %v2050_v61  ;;  %13707 = vst [vmem:[#allocation15_spill] sm:$0xff] %v10121_v48  ;;  %v2062_v22 = vand.u32 4294901760, %v222_v45  ;;  %v10125_v58 = vsub.f32 %v214_v5, %v2054_v3  ;;  %v10134_v61 = vpack.c.bf16 %v2056_v23, %v2052_v37  ;;  %v219_v48 = vld [vmem:[#allocation2 + $0xd0] sm:$0xff] }
  0xfa   : > { %7591 = vmatpush1.bf16.msra.mxu0 %v13697_v41  ;;  %v10116_v41 = vsub.f32 %v207_v32, %v2903_v6  ;;  %v10127_v32 = vpack.c.bf16 %v2909_v1, %v2905_v31  ;;  %v2917_v6 = vand.u32 4294901760, %v224_v39  ;;  %13711 = vst [vmem:[#allocation19_spill] sm:$0xff] %v10132_v50  ;;  %v2064_v3 = vand.u32 4294901760, %v221_v55  ;;  %13718 = vst [vmem:[#allocation28_spill] sm:$0xff] %v10146_v2 }
  0xfb   : > { %7593 = vmatprep.subr.bf16.mxu0 %v13700_v16  ;;  %13706 = vst [vmem:[#allocation13_spill] sm:$0xff] %v10119_v11  ;;  %v217_v16 = vld [vmem:[#allocation2 + $0xc0] sm:$0xff]  ;;  %13708 = vst [vmem:[#allocation16_spill] sm:$0xff] %v10125_v58  ;;  %v10136_v11 = vsub.f32 %v209_v13, %v2052_v37  ;;  %v226_v58 = vld [vmem:[#allocation2 + $0x108] sm:$0xff]  ;;  %v10148_v1 = vpack.c.bf16 %v2062_v22, %v2058_v25 }
  0xfc   : > { %13704 = vst [vmem:[#allocation14_spill] sm:$0xff] %v10116_v41  ;;  %7783 = vmatpush1.bf16.msra.mxu1 %v13705_v57  ;;  %13709 = vst [vmem:[#allocation18_spill] sm:$0xff] %v10127_v32  ;;  %v10130_v57 = vsub.f32 %v212_v19, %v2905_v31  ;;  %v2060_v5 = vand.u32 4294901760, %v217_v16  ;;  %v223_v32 = vld [vmem:[#allocation2 + $0xf0] sm:$0xff]  ;;  %v230_v41 = vld [vmem:[#allocation2 + $0x128] sm:$0xff]  ;;  %v10144_v19 = vsub.f32 %v211_v38, %v2907_v10  ;;  %v2915_v38 = vand.u32 4294901760, %v219_v48 }
  0xfd   : > { %7785 = vmatprep.subr.bf16.mxu1 %v9953_v8  ;;  %13712 = vst [vmem:[#allocation20_spill] sm:$0xff] %v10134_v61  ;;  %13713 = vst [vmem:[#allocation22_spill] sm:$0xff] %v10136_v11  ;;  %v10138_v8 = vsub.f32 %v213_v53, %v2056_v23  ;;  %v228_v13 = vld [vmem:[#allocation2 + $0x118] sm:$0xff]  ;;  %v10152_v53 = vsub.f32 %v218_v20, %v2058_v25  ;;  %v10154_v23 = vsub.f32 %v222_v45, %v2062_v22  ;;  %v225_v37 = vld [vmem:[#allocation2 + $0x100] sm:$0xff] }
  0xfe   : > { %7595 = vmatpush1.bf16.msra.mxu0 %v9959_v44  ;;  %13710 = vst [vmem:[#allocation17_spill] sm:$0xff] %v10130_v57  ;;  %v10140_v44 = vpack.c.bf16 %v2911_v0, %v2907_v10  ;;  %13717 = vst [vmem:[#allocation24_spill] sm:$0xff] %v10144_v19  ;;  %v10156_v31 = vpack.c.bf16 %v2917_v6, %v2913_v51  ;;  %v2919_v62 = vand.u32 4294901760, %v223_v32  ;;  %v2066_v10 = vand.u32 4294901760, %v226_v58  ;;  %v238_v61 = vld [vmem:[#allocation2 + $0x168] sm:$0xff] }
  0xff   : > { %7597 = vmatprep.subr.bf16.mxu0 %v13633_v29  ;;  %13714 = vst [vmem:[#allocation21_spill] sm:$0xff] %v10138_v8  ;;  %v13716_v29 = vld [vmem:[#allocation69_spill] sm:$0xff]  ;;  %13719 = vst [vmem:[#allocation25_spill] sm:$0xff] %v10148_v1  ;;  %v2070_v0 = vand.u32 4294901760, %v230_v41  ;;  %v231_v1 = vld [vmem:[#allocation2 + $0x130] sm:$0xff]  ;;  %v10163_v20 = vsub.f32 %v224_v39, %v2917_v6  ;;  %v10165_v45 = vpack.c.bf16 %v2064_v3, %v2060_v5  ;;  %v2921_v25 = vand.u32 4294901760, %v228_v13 }
 0x100   : > { %13715 = vst [vmem:[#allocation23_spill] sm:$0xff] %v10140_v44  ;;  %7787 = vmatpush1.bf16.msra.mxu1 %v9967_v12  ;;  %13720 = vst [vmem:[#allocation30_spill] sm:$0xff] %v10152_v53  ;;  %v232_v12 = vld [vmem:[#allocation2 + $0x138] sm:$0xff]  ;;  %v229_v44 = vld [vmem:[#allocation2 + $0x120] sm:$0xff]  ;;  %v10175_v39 = vsub.f32 %v219_v48, %v2915_v38  ;;  %v2927_v6 = vand.u32 4294901760, %v231_v1 }
 0x101   : > { %1069 = vmatmul.mubr.f32.vlgmr.msra.gmra.mrb[0].mxu0 %v13716_v29  ;;  %7789 = vmatprep.subr.bf16.mxu1 %v13635_v46  ;;  %13721 = vst [vmem:[#allocation32_spill] sm:$0xff] %v10154_v23  ;;  %13722 = vst [vmem:[#allocation38_spill] sm:$0xff] %v10156_v31  ;;  %v227_v46 = vld [vmem:[#allocation2 + $0x110] sm:$0xff]  ;;  %v2925_v22 = vand.u32 4294901760, %v232_v12  ;;  %v2068_v31 = vand.u32 4294901760, %v225_v37  ;;  %v2072_v23 = vand.u32 4294901760, %v229_v44 }
 0x102   : > { %7599 = vmatpush1.bf16.msra.mxu0 %v13636_v52  ;;  %1171 = vmatprep.mubr.f32.mxu0 %v13539_v43  ;;  %v10161_v52 = vsub.f32 %v220_v40, %v2913_v51  ;;  %13724 = vst [vmem:[#allocation42_spill] sm:$0xff] %v10163_v20  ;;  %13725 = vst [vmem:[#allocation44_spill] sm:$0xff] %v10165_v45  ;;  %v234_v53 = vld [vmem:[#allocation2 + $0x148] sm:$0xff]  ;;  %v10173_v40 = vsub.f32 %v221_v55, %v2064_v3  ;;  %v2923_v51 = vand.u32 4294901760, %v227_v46  ;;  %v236_v20 = vld [vmem:[#allocation2 + $0x158] sm:$0xff] }
 0x103   : > { %7601 = vmatprep.subr.bf16.mxu0 %v13637_v33  ;;  %1924 = vmatmul.mubr.f32.vlgmr.msra.gmra.mrb[0].mxu1 %v13716_v29  ;;  %v10169_v33 = vsub.f32 %v217_v16, %v2060_v5  ;;  %v10180_v16 = vsub.f32 %v223_v32, %v2919_v62  ;;  %v10182_v5 = vpack.c.bf16 %v2070_v0, %v2066_v10  ;;  %v2074_v48 = vand.u32 4294901760, %v234_v53  ;;  %v233_v3 = vld [vmem:[#allocation2 + $0x140] sm:$0xff] }
 0x104   : > { %13723 = vst [vmem:[#allocation35_spill] sm:$0xff] %v10161_v52  ;;  %7791 = vmatpush1.bf16.msra.mxu1 %v13638_v27  ;;  %2026 = vmatprep.mubr.f32.mxu1 %v13539_v43  ;;  %13727 = vst [vmem:[#allocation7_spill] sm:$0xff] %v10173_v40  ;;  %v10178_v27 = vpack.c.bf16 %v2919_v62, %v2915_v38  ;;  %v10186_v52 = vsub.f32 %v230_v41, %v2070_v0  ;;  %v2078_v55 = vand.u32 4294901760, %v238_v61  ;;  %v237_v40 = vld [vmem:[#allocation2 + $0x160] sm:$0xff]  ;;  %v235_v62 = vld [vmem:[#allocation2 + $0x150] sm:$0xff] }
 0x105   : > { %13726 = vst [vmem:[#allocation6_spill] sm:$0xff] %v10169_v33  ;;  %7793 = vmatprep.subr.bf16.mxu1 %v13639_v56  ;;  %13729 = vst [vmem:[#allocation45_spill] sm:$0xff] %v10182_v5  ;;  %v10184_v33 = vsub.f32 %v226_v58, %v2066_v10  ;;  %v240_v56 = vld [vmem:[#allocation2 + $0x178] sm:$0xff]  ;;  %v10193_v32 = vsub.f32 %v232_v12, %v2925_v22  ;;  %v10195_v38 = vpack.c.bf16 %v2072_v23, %v2068_v31  ;;  %v239_v10 = vld [vmem:[#allocation2 + $0x170] sm:$0xff] }
 0x106   : > { %7603 = vmatpush1.bf16.msra.mxu0 %v13640_v34  ;;  %13728 = vst [vmem:[#allocation71_spill] sm:$0xff] %v10178_v27  ;;  %13731 = vst [vmem:[#allocation46_spill] sm:$0xff] %v10186_v52  ;;  %v10188_v34 = vsub.f32 %v228_v13, %v2921_v25  ;;  %v10197_v58 = vsub.f32 %v225_v37, %v2068_v31  ;;  %v10201_v41 = vsub.f32 %v229_v44, %v2072_v23  ;;  %v246_v52 = vld [vmem:[#allocation2 + $0x1a8] sm:$0xff] }
 0x107   : > { %7605 = vmatprep.subr.bf16.mxu0 %v13641_v21  ;;  %13730 = vst [vmem:[#allocation48_spill] sm:$0xff] %v10184_v33  ;;  %v10191_v21 = vpack.c.bf16 %v2925_v22, %v2921_v25  ;;  %13733 = vst [vmem:[#allocation51_spill] sm:$0xff] %v10195_v38  ;;  %v10203_v13 = vpack.c.bf16 %v2927_v6, %v2923_v51  ;;  %v2929_v0 = vand.u32 4294901760, %v236_v20  ;;  %v242_v25 = vld [vmem:[#allocation2 + $0x188] sm:$0xff]  ;;  %v2076_v37 = vand.u32 4294901760, %v233_v3  ;;  %v244_v33 = vld [vmem:[#allocation2 + $0x198] sm:$0xff] }
 0x108   : > { %7795 = vmatpush1.bf16.msra.mxu1 %v13642_v63  ;;  %v2933_v63 = vand.u32 4294901760, %v240_v56  ;;  %v10206_v12 = vsub.f32 %v227_v46, %v2923_v51  ;;  %v10208_v31 = vsub.f32 %v231_v1, %v2927_v6  ;;  %v2080_v22 = vand.u32 4294901760, %v237_v40  ;;  %v243_v51 = vld [vmem:[#allocation2 + $0x190] sm:$0xff] }
 0x109   : > { %13732 = vst [vmem:[#allocation49_spill] sm:$0xff] %v10191_v21  ;;  %7797 = vmatprep.subr.bf16.mxu1 %v13643_v30  ;;  %13734 = vst [vmem:[#allocation60_spill] sm:$0xff] %v10203_v13  ;;  %v248_v30 = vld [vmem:[#allocation2 + $0x1b8] sm:$0xff]  ;;  %v10210_v38 = vpack.c.bf16 %v2078_v55, %v2074_v48  ;;  %v2931_v44 = vand.u32 4294901760, %v235_v62  ;;  %v2935_v23 = vand.u32 4294901760, %v239_v10  ;;  %v241_v13 = vld [vmem:[#allocation2 + $0x180] sm:$0xff]  ;;  %v10215_v27 = vsub.f32 %v238_v61, %v2078_v55 }
 0x10a   : > { %7607 = vmatpush1.bf16.msra.mxu0 %v13644_v7  ;;  %13735 = vst [vmem:[#allocation59_spill] sm:$0xff] %v10208_v31  ;;  %v10212_v7 = vsub.f32 %v234_v53, %v2074_v48  ;;  %v245_v21 = vld [vmem:[#allocation2 + $0x1a0] sm:$0xff]  ;;  %v2082_v1 = vand.u32 4294901760, %v242_v25  ;;  %v2086_v46 = vand.u32 4294901760, %v246_v52  ;;  %v247_v6 = vld [vmem:[#allocation2 + $0x1b0] sm:$0xff]  ;;  %v10221_v53 = vpack.c.bf16 %v2933_v63, %v2929_v0 }
 0x10b   : > { %7609 = vmatprep.subr.bf16.mxu0 %v13645_v14  ;;  %13736 = vst [vmem:[#allocation8_spill] sm:$0xff] %v10210_v38  ;;  %13738 = vst [vmem:[#allocation26_spill] sm:$0xff] %v10215_v27  ;;  %v10217_v14 = vsub.f32 %v236_v20, %v2929_v0  ;;  %v10223_v48 = vsub.f32 %v240_v56, %v2933_v63  ;;  %v2941_v38 = vand.u32 4294901760, %v248_v30  ;;  %v2084_v20 = vand.u32 4294901760, %v241_v13 }
 0x10c   : > { %13737 = vst [vmem:[#allocation10_spill] sm:$0xff] %v10212_v7  ;;  %7799 = vmatpush1.bf16.msra.mxu1 %v13646_v35  ;;  %13740 = vst [vmem:[#allocation69_spill] sm:$0xff] %v10221_v53  ;;  %v2937_v7 = vand.u32 4294901760, %v244_v33  ;;  %v10226_v35 = vpack.c.bf16 %v2080_v22, %v2076_v37  ;;  %v10228_v61 = vsub.f32 %v233_v3, %v2076_v37  ;;  %v2088_v55 = vand.u32 4294901760, %v245_v21  ;;  %v250_v3 = vld [vmem:[#allocation2 + $0x1c8] sm:$0xff] }
 0x10d   : > { %13739 = vst [vmem:[#allocation12_spill] sm:$0xff] %v10217_v14  ;;  %7801 = vmatprep.subr.bf16.mxu1 %v13647_v36  ;;  %13741 = vst [vmem:[#allocation72_spill] sm:$0xff] %v10223_v48  ;;  %v10230_v14 = vsub.f32 %v237_v40, %v2080_v22  ;;  %v10232_v36 = vpack.c.bf16 %v2935_v23, %v2931_v44  ;;  %v2943_v0 = vand.u32 4294901760, %v247_v6  ;;  %v254_v37 = vld [vmem:[#allocation2 + $0x1e8] sm:$0xff] }
 0x10e   : > { %7611 = vmatpush1.bf16.msra.mxu0 %v13648_v26  ;;  %13742 = vst [vmem:[#allocation73_spill] sm:$0xff] %v10226_v35  ;;  %13743 = vst [vmem:[#allocation74_spill] sm:$0xff] %v10228_v61  ;;  %v2939_v26 = vand.u32 4294901760, %v243_v51  ;;  %v10235_v56 = vsub.f32 %v235_v62, %v2931_v44  ;;  %v10237_v63 = vsub.f32 %v239_v10, %v2935_v23  ;;  %v192_v35 = vld [vmem:[%s9451_s6] sm:$0xf]  ;;  %v252_v62 = vld [vmem:[#allocation2 + $0x1d8] sm:$0xff] }
 0x10f   : > { %7613 = vmatprep.subr.bf16.mxu0 %v13649_v47  ;;  %13744 = vst [vmem:[#allocation75_spill] sm:$0xff] %v10230_v14  ;;  %13745 = vst [vmem:[#allocation76_spill] sm:$0xff] %v10232_v36  ;;  %v10239_v47 = vpack.c.bf16 %v2086_v46, %v2082_v1  ;;  %v10241_v53 = vsub.f32 %v242_v25, %v2082_v1  ;;  %v10246_v40 = vsub.f32 %v246_v52, %v2086_v46  ;;  %v256_v10 = vld [vmem:[#allocation2 + $0x1f8] sm:$0xff]  ;;  %v249_v46 = vld [vmem:[#allocation2 + $0x1c0] sm:$0xff] }
 0x110   : > { %7803 = vmatpush1.bf16.msra.mxu1 %v13650_v49  ;;  %13746 = vst [vmem:[#allocation77_spill] sm:$0xff] %v10235_v56  ;;  %13747 = vst [vmem:[#allocation78_spill] sm:$0xff] %v10237_v63  ;;  %v10248_v22 = vpack.c.bf16 %v2941_v38, %v2937_v7  ;;  %v10250_v49 = vsub.f32 %v244_v33, %v2937_v7  ;;  %v10253_v44 = vsub.f32 %v248_v30, %v2941_v38  ;;  %v253_v30 = vld [vmem:[#allocation2 + $0x1e0] sm:$0xff]  ;;  %v251_v7 = vld [vmem:[#allocation2 + $0x1d0] sm:$0xff] }
 0x111   : > { %13748 = vst [vmem:[#allocation79_spill] sm:$0xff] %v10239_v47  ;;  %7805 = vmatprep.subr.bf16.mxu1 %v13651_v9  ;;  %v10255_v25 = vpack.c.bf16 %v2088_v55, %v2084_v20  ;;  %v10257_v23 = vsub.f32 %v241_v13, %v2084_v20  ;;  %v10259_v1 = vsub.f32 %v245_v21, %v2088_v55  ;;  %v2094_v52 = vand.u32 4294901760, %v254_v37  ;;  %v13758_v20 = vld [vmem:[#allocation31_spill] sm:$0xff]  ;;  %v13769_v13 = vld [vmem:[#allocation41_spill] sm:$0xff] }
 0x112   : > { %7615 = vmatpush1.bf16.msra.mxu0 %v13652_v15  ;;  %13749 = vst [vmem:[#allocation80_spill] sm:$0xff] %v10248_v22  ;;  %13750 = vst [vmem:[#allocation81_spill] sm:$0xff] %v10253_v44  ;;  %v10261_v9 = vpack.c.bf16 %v2943_v0, %v2939_v26  ;;  %v2090_v15 = vand.u32 4294901760, %v250_v3  ;;  %v10263_v22 = vand.u32 4294901760, %v192_v35  ;;  %v10266_v33 = vsub.f32 %v243_v51, %v2939_v26  ;;  %v13759_v51 = vld [vmem:[#allocation50_spill] sm:$0xff]  ;;  %v255_v36 = vld [vmem:[#allocation2 + $0x1f0] sm:$0xff] }
 0x113   : > { %7617 = vmatprep.subr.bf16.mxu0 %v13653_v60  ;;  %13751 = vst [vmem:[#allocation82_spill] sm:$0xff] %v10255_v25  ;;  %13752 = vst [vmem:[#allocation83_spill] sm:$0xff] %v10257_v23  ;;  %v2945_v60 = vand.u32 4294901760, %v252_v62  ;;  %v2949_v38 = vand.u32 4294901760, %v256_v10  ;;  %v10271_v21 = vsub.f32 %v247_v6, %v2943_v0  ;;  %v2092_v25 = vand.u32 4294901760, %v249_v46 }
 0x114   : > { %13753 = vst [vmem:[#allocation84_spill] sm:$0xff] %v10259_v1  ;;  %13754 = vst [vmem:[#allocation85_spill] sm:$0xff] %v10261_v9  ;;  %7807 = vmatpush1.bf16.msra.mxu1 %v13654_v54  ;;  %v10277_v26 = vsub.f32 %v250_v3, %v2090_v15  ;;  %v13762_v1 = vld [vmem:[#allocation40_spill] sm:$0xff]  ;;  %v10281_v23 = vpack.c.bf16 %v2094_v52, %v2090_v15  ;;  %v2947_v6 = vand.u32 4294901760, %v251_v7  ;;  %v13765_v9 = vld [vmem:[#allocation47_spill] sm:$0xff]  ;;  %v13768_v3 = vand.u32 4294901760, %v10063_v28 }
 0x115   : > { %13755 = vst [vmem:[#allocation86_spill] sm:$0xff] %v10263_v22  ;;  %13756 = vst [vmem:[#allocation87_spill] sm:$0xff] %v10266_v33  ;;  %7809 = vmatprep.subr.bf16.mxu1 %v13655_v59  ;;  %v13761_v33 = vld [vmem:[#allocation39_spill] sm:$0xff]  ;;  %v10284_v0 = vsub.f32 %v192_v35, %v10263_v22  ;;  %v10287_v54 = vsub.f32 %v254_v37, %v2094_v52  ;;  %v13770_v59 = vld [vmem:[#allocation54_spill] sm:$0xff]  ;;  %v13772_v35 = vand.u32 4294901760, %v13758_v20  ;;  %v13773_v37 = vand.u32 4294901760, %v10071_v18 }
 0x116   : > { %7619 = vmatpush1.bf16.msra.mxu0 %v13656_v42  ;;  %13757 = vst [vmem:[#allocation88_spill] sm:$0xff] %v10271_v21  ;;  %13760 = vst [vmem:[#allocation50_spill] sm:$0xff] %v10277_v26  ;;  %v2096_v42 = vand.u32 4294901760, %v253_v30  ;;  %v2145_v55 = vsub.f32 %v10063_v28, %v13768_v3  ;;  %v13771_v15 = vld [vmem:[#allocation55_spill] sm:$0xff]  ;;  %v13774_v52 = vand.u32 4294901760, %v10073_v17  ;;  %v13775_v3 = vld [vmem:[#allocation58_spill] sm:$0xff]  ;;  %v10307_v26 = vsub.f32 %v252_v62, %v2945_v60 }
 0x117   : > { %7621 = vmatprep.subr.bf16.mxu0 %v13759_v51  ;;  %13763 = vst [vmem:[#allocation89_spill] sm:$0xff] %v10281_v23  ;;  %13764 = vst [vmem:[#allocation90_spill] sm:$0xff] %v10284_v0  ;;  %v10289_v51 = vpack.c.bf16 %v2949_v38, %v2945_v60  ;;  %v2951_v23 = vand.u32 4294901760, %v255_v36  ;;  %v2157_v22 = vsub.f32 %v13758_v20, %v13772_v35  ;;  %v13777_v28 = vand.u32 4294901760, %v13762_v1  ;;  %v13778_v20 = vld [vmem:[#allocation52_spill] sm:$0xff]  ;;  %v13782_v62 = vld [vmem:[#allocation57_spill] sm:$0xff] }
 0x118   : > { %7811 = vmatpush1.bf16.msra.mxu1 %v13765_v9  ;;  %13766 = vst [vmem:[#allocation47_spill] sm:$0xff] %v10287_v54  ;;  %v3000_v9 = vsub.f32 %v10071_v18, %v13773_v37  ;;  %v10316_v21 = vsub.f32 %v256_v10, %v2949_v38  ;;  %v10318_v37 = vpack.c.bf16 %v2096_v42, %v2092_v25  ;;  %v13785_v10 = vld [vmem:[#allocation61_spill] sm:$0xff]  ;;  %v13786_v38 = vld [vmem:[#allocation63_spill] sm:$0xff] }
 0x119   : > { %13767 = vst [vmem:[#allocation91_spill] sm:$0xff] %v10289_v51  ;;  %7813 = vmatprep.subr.bf16.mxu1 %v13770_v59  ;;  %v3012_v51 = vsub.f32 %v10073_v17, %v13774_v52  ;;  %v13776_v59 = vand.u32 4294901760, %v13761_v33  ;;  %v2163_v35 = vsub.f32 %v13762_v1, %v13777_v28  ;;  %v10320_v18 = vsub.f32 %v249_v46, %v2092_v25  ;;  %v13784_v1 = vld [vmem:[#allocation56_spill] sm:$0xff]  ;;  %v13787_v17 = vld [vmem:[#allocation62_spill] sm:$0xff] }
 0x11a   : > { %7623 = vmatpush1.bf16.msra.mxu0 %v13771_v15  ;;  %13779 = vst [vmem:[#allocation54_spill] sm:$0xff] %v10318_v37  ;;  %v10323_v52 = vand.u32 4294901760, %v10284_v0  ;;  %v10326_v60 = vsub.f32 %v253_v30, %v2096_v42  ;;  %v2158_v25 = vand.u32 4294901760, %v2157_v22  ;;  %v3001_v46 = vand.u32 4294901760, %v3000_v9 }
 0x11b   : > { %7625 = vmatprep.subr.bf16.mxu0 %v13775_v3  ;;  %v2151_v15 = vsub.f32 %v13761_v33, %v13776_v59  ;;  %13780 = vst [vmem:[#allocation55_spill] sm:$0xff] %v10320_v18  ;;  %v2146_v3 = vand.u32 4294901760, %v2145_v55  ;;  %v13783_v59 = vand.u32 4294901760, %v13769_v13  ;;  %v3013_v33 = vand.u32 4294901760, %v3012_v51  ;;  %v13788_v18 = vld [vmem:[#allocation27_spill] sm:$0xff]  ;;  %v13791_v51 = vld [vmem:[#allocation65_spill] sm:$0xff] }
 0x11c   : > { %13781 = vst [vmem:[#allocation58_spill] sm:$0xff] %v10323_v52  ;;  %7815 = vmatpush1.bf16.msra.mxu1 %v13782_v62  ;;  %v10336_v30 = vpack.c.bf16 %v2951_v23, %v2947_v6  ;;  %v2164_v42 = vand.u32 4294901760, %v2163_v35  ;;  %v13790_v62 = vand.u32 4294901760, %v13778_v20  ;;  %v10341_v54 = vsub.f32 %v251_v7, %v2947_v6  ;;  %v13795_v7 = vld [vmem:[#allocation5_spill] sm:$0xff] }
 0x11d   : > { %v3006_v28 = vsub.f32 %v13769_v13, %v13783_v59  ;;  %7817 = vmatprep.subr.bf16.mxu1 %v13785_v10  ;;  %v2152_v55 = vand.u32 4294901760, %v2151_v15  ;;  %v10343_v10 = vsub.f32 %v255_v36, %v2951_v23  ;;  %v2134_v22 = vsub.f32 %v10284_v0, %v10323_v52  ;;  %v13796_v36 = vld [vmem:[#allocation33_spill] sm:$0xff]  ;;  %v13807_v0 = vld [vmem:[#allocation64_spill] sm:$0xff] }
 0x11e   : > { %7627 = vmatpush1.bf16.msra.mxu0 %v13786_v38  ;;  %13789 = vst [vmem:[#allocation57_spill] sm:$0xff] %v10336_v30  ;;  %v3018_v59 = vsub.f32 %v13778_v20, %v13790_v62  ;;  %v13792_v38 = vld [vmem:[#allocation66_spill] sm:$0xff]  ;;  %v13793_v15 = vand.u32 4294901760, %v13784_v1  ;;  %v13797_v23 = vld [vmem:[#allocation37_spill] sm:$0xff]  ;;  %v10357_v52 = vpack.c.bf16 %v2158_v25, %v2146_v3  ;;  %v10359_v9 = vpack.c.bf16 %v3013_v33, %v3001_v46 }
 0x11f   : > { %7821 = vmatprep.subr.bf16.mxu0 %v13788_v18  ;;  %v3007_v37 = vand.u32 4294901760, %v3006_v28  ;;  %v13794_v18 = vld [vmem:[#allocation67_spill] sm:$0xff]  ;;  %v13799_v20 = vld [vmem:[#allocation53_spill] sm:$0xff]  ;;  %v10372_v33 = vand.u32 4294901760, %v2134_v22  ;;  %v13801_v25 = vand.u32 4294901760, %v13791_v51  ;;  %v13806_v22 = vand.u32 4294901760, %v13795_v7 }
 0x120   : > { %7819 = vmatpush1.bf16.msra.mxu1 %v13792_v38  ;;  %v2169_v35 = vsub.f32 %v13784_v1, %v13793_v15  ;;  %v13798_v38 = vand.u32 4294901760, %v13787_v17  ;;  %v10367_v15 = vpack.c.bf16 %v2164_v42, %v2152_v55  ;;  %v3019_v6 = vand.u32 4294901760, %v3018_v59  ;;  %v13804_v55 = vld [vmem:[#allocation43_spill] sm:$0xff] }
 0x121   : > { %1173 = vmatmul.mubr.f32.vlgmr.msra.gmra.mrb[0].mxu0 %v13716_v29  ;;  %8013 = vmatprep.subr.bf16.mxu1 %v13796_v36  ;;  %v10377_v46 = vsub.f32 %v13791_v51, %v13801_v25  ;;  %v13805_v59 = vand.u32 4294901760, %v13794_v18  ;;  %v10391_v3 = vsub.f32 %v13795_v7, %v13806_v22  ;;  %v13808_v36 = vld [vmem:[#allocation68_spill] sm:$0xff]  ;;  %v13810_v51 = vld [vmem:[#allocation13_spill] sm:$0xff]  ;;  %v13811_v22 = vand.u32 4294901760, %v10114_v4 }
 0x122   : > { %7823 = vmatpush1.bf16.msra.mxu0 %v13797_v23  ;;  %v2181_v28 = vsub.f32 %v13787_v17, %v13798_v38  ;;  %2130 = vmatprep.mubr.f32.mxu0 %v13539_v43  ;;  %v13800_v23 = vld [vmem:[#allocation14_spill] sm:$0xff]  ;;  %v13802_v38 = vld [vmem:[#allocation15_spill] sm:$0xff]  ;;  %v2170_v42 = vand.u32 4294901760, %v2169_v35  ;;  %v13832_v7 = vand.u32 4294901760, %v10180_v16  ;;  %v13076_v17 = vand.u32 4294901760, %v10223_v48 }
 0x123   : > { %7825 = vmatprep.subr.bf16.mxu0 %v13799_v20  ;;  %2028 = vmatmul.mubr.f32.vlgmr.msra.gmra.mrb[0].mxu1 %v13716_v29  ;;  %v13803_v20 = vld [vmem:[#allocation16_spill] sm:$0xff]  ;;  %v10386_v29 = vsub.f32 %v13794_v18, %v13805_v59  ;;  %v10407_v25 = vsub.f32 %v10114_v4, %v13811_v22  ;;  %v13814_v59 = vand.u32 4294901760, %v13802_v38 }
 0x124   : > { %8015 = vmatpush1.bf16.msra.mxu1 %v13804_v55  ;;  %2985 = vmatprep.mubr.f32.mxu1 %v13539_v43  ;;  %v2182_v62 = vand.u32 4294901760, %v2181_v28  ;;  %v13809_v55 = vand.u32 4294901760, %v10110_v24  ;;  %v13815_v22 = vand.u32 4294901760, %v13803_v20 }
 0x125   : > { %8017 = vmatprep.subr.bf16.mxu1 %v13807_v0  ;;  %v13812_v0 = vand.u32 4294901760, %v13800_v23 }
 0x126   : > { %7827 = vmatpush1.bf16.msra.mxu0 %v13808_v36  ;;  %v10399_v35 = vsub.f32 %v10110_v24, %v13809_v55  ;;  %v10416_v24 = vpack.c.bf16 %v3019_v6, %v3007_v37  ;;  %v10427_v4 = vsub.f32 %v13803_v20, %v13815_v22  ;;  %v13817_v37 = vand.u32 4294901760, %v10130_v57 }
 0x127   : > { %7829 = vmatprep.subr.bf16.mxu0 %v13810_v51  ;;  %v10412_v28 = vsub.f32 %v13800_v23, %v13812_v0  ;;  %v10422_v51 = vsub.f32 %v13802_v38, %v13814_v59  ;;  %v13816_v0 = vld [vmem:[#allocation9_spill] sm:$0xff]  ;;  %v13818_v59 = vld [vmem:[#allocation18_spill] sm:$0xff]  ;;  %v13819_v23 = vld [vmem:[#allocation20_spill] sm:$0xff]  ;;  %v10440_v38 = vpack.c.bf16 %v2182_v62, %v2170_v42  ;;  %v13821_v55 = vand.u32 4294901760, %v10136_v11 }
 0x128   : > { %13813 = vst [vmem:[#allocation61_spill] sm:$0xff] %v10416_v24  ;;  %8019 = vmatpush1.bf16.msra.mxu1 %v13816_v0  ;;  %v10435_v6 = vsub.f32 %v10130_v57, %v13817_v37  ;;  %v13820_v0 = vand.u32 4294901760, %v10132_v50  ;;  %v13822_v57 = vld [vmem:[#allocation25_spill] sm:$0xff]  ;;  %v13823_v62 = vand.u32 4294901760, %v10138_v8  ;;  %v13824_v22 = vand.u32 4294901760, %v10144_v19 }
 0x129   : > { %8021 = vmatprep.subr.bf16.mxu1 %v13818_v59  ;;  %v10451_v37 = vsub.f32 %v10136_v11, %v13821_v55  ;;  %v13825_v11 = vld [vmem:[#allocation23_spill] sm:$0xff]  ;;  %v13829_v59 = vld [vmem:[#allocation38_spill] sm:$0xff] }
 0x12a   : > { %7831 = vmatpush1.bf16.msra.mxu0 %v13819_v23  ;;  %v10446_v36 = vsub.f32 %v10132_v50, %v13820_v0  ;;  %v10459_v42 = vsub.f32 %v10138_v8, %v13823_v62  ;;  %v10464_v0 = vsub.f32 %v10144_v19, %v13824_v22  ;;  %v13826_v62 = vand.u32 4294901760, %v10146_v2  ;;  %v13827_v50 = vld [vmem:[#allocation30_spill] sm:$0xff]  ;;  %v13828_v19 = vld [vmem:[#allocation32_spill] sm:$0xff] }
 0x12b   : > { %7833 = vmatprep.subr.bf16.mxu0 %v13822_v57  ;;  %v13830_v57 = vld [vmem:[#allocation35_spill] sm:$0xff]  ;;  %v13831_v23 = vand.u32 4294901760, %v10175_v39  ;;  %v13835_v20 = vand.u32 4294901760, %v13827_v50 }
 0x12c   : > { %8023 = vmatpush1.bf16.msra.mxu1 %v13825_v11  ;;  %v10475_v8 = vsub.f32 %v10146_v2, %v13826_v62  ;;  %v13837_v11 = vand.u32 4294901760, %v10188_v34  ;;  %v13840_v2 = vld [vmem:[#allocation49_spill] sm:$0xff] }
 0x12d   : > { %8025 = vmatprep.subr.bf16.mxu1 %v13829_v59  ;;  %v10488_v62 = vpack.c.bf16 %v13832_v7, %v13831_v23  ;;  %v13834_v7 = vld [vmem:[#allocation71_spill] sm:$0xff]  ;;  %v10504_v22 = vsub.f32 %v13827_v50, %v13835_v20  ;;  %v13838_v59 = vand.u32 4294901760, %v10193_v32  ;;  %v13842_v23 = vand.u32 4294901760, %v13830_v57 }
 0x12e   : > { %7835 = vmatpush1.bf16.msra.mxu0 %v10165_v45  ;;  %v13836_v45 = vand.u32 4294901760, %v13828_v19 }
 0x12f   : > { %13833 = vst [vmem:[#allocation63_spill] sm:$0xff] %v10488_v62  ;;  %7837 = vmatprep.subr.bf16.mxu0 %v10182_v5  ;;  %v10515_v18 = vpack.c.bf16 %v13838_v59, %v13837_v11  ;;  %v13841_v62 = vld [vmem:[#allocation51_spill] sm:$0xff]  ;;  %v10522_v20 = vsub.f32 %v13830_v57, %v13842_v23  ;;  %v13847_v11 = vand.u32 4294901760, %v10206_v12  ;;  %v13848_v59 = vand.u32 4294901760, %v10208_v31  ;;  %v13852_v57 = vld [vmem:[#allocation12_spill] sm:$0xff] }
 0x130   : > { %8027 = vmatpush1.bf16.msra.mxu1 %v13834_v7  ;;  %v10509_v55 = vsub.f32 %v13828_v19, %v13836_v45  ;;  %v13843_v7 = vld [vmem:[#allocation42_spill] sm:$0xff]  ;;  %v13844_v45 = vand.u32 4294901760, %v10197_v58  ;;  %v13845_v19 = vand.u32 4294901760, %v10201_v41  ;;  %v13857_v5 = vand.u32 4294901760, %v10215_v27 }
 0x131   : > { %13839 = vst [vmem:[#allocation66_spill] sm:$0xff] %v10515_v18  ;;  %8029 = vmatprep.subr.bf16.mxu1 %v13840_v2  ;;  %v10535_v18 = vpack.c.bf16 %v13848_v59, %v13847_v11  ;;  %v13851_v2 = vld [vmem:[#allocation10_spill] sm:$0xff]  ;;  %v13853_v11 = vld [vmem:[#allocation60_spill] sm:$0xff]  ;;  %v13859_v1 = vand.u32 4294901760, %v13852_v57  ;;  %v13864_v27 = vand.u32 4294901760, %v10230_v14 }
 0x132   : > { %7839 = vmatpush1.bf16.msra.mxu0 %v13841_v62  ;;  %v10529_v50 = vpack.c.bf16 %v13845_v19, %v13844_v45  ;;  %v13850_v62 = vld [vmem:[#allocation8_spill] sm:$0xff]  ;;  %v13854_v59 = vld [vmem:[#allocation6_spill] sm:$0xff]  ;;  %v13856_v23 = vand.u32 4294901760, %v13851_v2  ;;  %v13861_v45 = vld [vmem:[#allocation69_spill] sm:$0xff]  ;;  %v2230_v13 = vand.u32 4294901760, %v10509_v55 }
 0x133   : > { %13849 = vst [vmem:[#allocation93_spill] sm:$0xff] %v10535_v18  ;;  %7841 = vmatprep.subr.bf16.mxu0 %v13850_v62  ;;  %v13855_v62 = vld [vmem:[#allocation7_spill] sm:$0xff]  ;;  %v10559_v19 = vpack.c.bf16 %v13076_v17, %v13859_v1  ;;  %v2218_v18 = vand.u32 4294901760, %v10504_v22  ;;  %v13872_v14 = vld [vmem:[#allocation88_spill] sm:$0xff]  ;;  %v13875_v22 = vand.u32 4294901760, %v13854_v59 }
 0x134   : > { %13846 = vst [vmem:[#allocation92_spill] sm:$0xff] %v10529_v50  ;;  %8031 = vmatpush1.bf16.msra.mxu1 %v13853_v11  ;;  %v10553_v24 = vpack.c.bf16 %v13857_v5, %v13856_v23  ;;  %v13862_v50 = vld [vmem:[#allocation73_spill] sm:$0xff]  ;;  %v13863_v11 = vand.u32 4294901760, %v10228_v61  ;;  %v13866_v23 = vand.u32 4294901760, %v10235_v56  ;;  %v13879_v56 = vand.u32 4294901760, %v10250_v49 }
 0x135   : > { %13860 = vst [vmem:[#allocation94_spill] sm:$0xff] %v10559_v19  ;;  %8033 = vmatprep.subr.bf16.mxu1 %v13861_v45  ;;  %v2223_v55 = vsub.f32 %v13854_v59, %v13875_v22  ;;  %v13876_v19 = vand.u32 4294901760, %v10241_v53  ;;  %v13877_v45 = vand.u32 4294901760, %v10246_v40  ;;  %v13884_v22 = vand.u32 4294901760, %v13855_v62 }
 0x136   : > { %13858 = vst [vmem:[#allocation10_spill] sm:$0xff] %v10553_v24  ;;  %7843 = vmatpush1.bf16.msra.mxu0 %v13862_v50  ;;  %v10569_v5 = vpack.c.bf16 %v13864_v27, %v13863_v11  ;;  %v13867_v24 = vand.u32 4294901760, %v10237_v63  ;;  %v13869_v50 = vld [vmem:[#allocation83_spill] sm:$0xff]  ;;  %v13870_v27 = vld [vmem:[#allocation84_spill] sm:$0xff]  ;;  %v13880_v63 = vand.u32 4294901760, %v10253_v44 }
 0x137   : > { %7845 = vmatprep.subr.bf16.mxu0 %v10239_v47  ;;  %v13883_v47 = vld [vmem:[#allocation82_spill] sm:$0xff]  ;;  %v2235_v59 = vsub.f32 %v13855_v62, %v13884_v22  ;;  %v13898_v62 = vand.u32 4294901760, %v10307_v26 }
 0x138   : > { %13865 = vst [vmem:[#allocation95_spill] sm:$0xff] %v10569_v5  ;;  %v10575_v1 = vpack.c.bf16 %v13867_v24, %v13866_v23  ;;  %v13871_v5 = vld [vmem:[#allocation87_spill] sm:$0xff]  ;;  %v13873_v24 = vld [vmem:[#allocation76_spill] sm:$0xff]  ;;  %v13874_v23 = vand.u32 4294901760, %v13843_v7  ;;  %v10603_v11 = vpack.c.bf16 %v13880_v63, %v13879_v56  ;;  %v13889_v56 = vand.u32 4294901760, %v13872_v14 }
 0x139   : > { %8035 = vmatpush1.bf16.msra.mxu1 %v13873_v24  ;;  %v13882_v24 = vld [vmem:[#allocation80_spill] sm:$0xff]  ;;  %v13904_v14 = vand.u32 4294901760, %v10326_v60 }
 0x13a   : > { %13868 = vst [vmem:[#allocation96_spill] sm:$0xff] %v10575_v1  ;;  %v3084_v17 = vsub.f32 %v13843_v7, %v13874_v23  ;;  %v10597_v1 = vpack.c.bf16 %v13877_v45, %v13876_v19  ;;  %13881 = vst [vmem:[#allocation98_spill] sm:$0xff] %v10603_v11  ;;  %8037 = vmatprep.subr.bf16.mxu1 %v13882_v24  ;;  %7847 = vmatpush1.bf16.msra.mxu0 %v13883_v47  ;;  %v3073_v23 = vand.u32 4294901760, %v10522_v20  ;;  %v13891_v11 = vld [vmem:[#allocation89_spill] sm:$0xff]  ;;  %v13892_v47 = vld [vmem:[#allocation50_spill] sm:$0xff] }
 0x13b   : > { %v13885_v7 = vand.u32 4294901760, %v13869_v50  ;;  %v13886_v19 = vand.u32 4294901760, %v13870_v27  ;;  %7849 = vmatprep.subr.bf16.mxu0 %v13891_v11  ;;  %v13095_v20 = vand.u32 4294901760, %v13892_v47  ;;  %v13893_v24 = vld [vmem:[#allocation47_spill] sm:$0xff]  ;;  %v13899_v27 = vand.u32 4294901760, %v10316_v21 }
 0x13c   : > { %13878 = vst [vmem:[#allocation97_spill] sm:$0xff] %v10597_v1  ;;  %v13888_v1 = vand.u32 4294901760, %v13871_v5  ;;  %v13094_v44 = vand.u32 4294901760, %v13893_v24  ;;  %v13894_v50 = vld [vmem:[#allocation55_spill] sm:$0xff] }
 0x13d   : > { %v10615_v45 = vpack.c.bf16 %v13886_v19, %v13885_v7  ;;  %v10644_v7 = vpack.c.bf16 %v13899_v27, %v13898_v62  ;;  %v13901_v19 = vld [vmem:[#allocation91_spill] sm:$0xff]  ;;  %v13903_v11 = vand.u32 4294901760, %v13894_v50  ;;  %v13909_v62 = vand.u32 4294901760, %v10377_v46 }
 0x13e   : > { %v10621_v63 = vpack.c.bf16 %v13889_v56, %v13888_v1  ;;  %v13895_v1 = vld [vmem:[#allocation85_spill] sm:$0xff]  ;;  %v3085_v56 = vand.u32 4294901760, %v3084_v17  ;;  %v10638_v22 = vpack.c.bf16 %v13094_v44, %v13095_v20  ;;  %v2236_v17 = vand.u32 4294901760, %v2235_v59 }
 0x13f   : > { %13887 = vst [vmem:[#allocation99_spill] sm:$0xff] %v10615_v45  ;;  %8039 = vmatpush1.bf16.msra.mxu1 %v13895_v1  ;;  %13900 = vst [vmem:[#allocation47_spill] sm:$0xff] %v10644_v7  ;;  %v13902_v45 = vld [vmem:[#allocation54_spill] sm:$0xff]  ;;  %v2224_v1 = vand.u32 4294901760, %v2223_v55  ;;  %v10652_v5 = vpack.c.bf16 %v13904_v14, %v13903_v11  ;;  %v13906_v44 = vand.u32 4294901760, %v10341_v54  ;;  %v13907_v20 = vand.u32 4294901760, %v10343_v10 }
 0x140   : > { %13890 = vst [vmem:[#allocation100_spill] sm:$0xff] %v10621_v63  ;;  %v13896_v63 = vld [vmem:[#allocation48_spill] sm:$0xff]  ;;  %13897 = vst [vmem:[#allocation50_spill] sm:$0xff] %v10638_v22  ;;  %8041 = vmatprep.subr.bf16.mxu1 %v13901_v19  ;;  %7851 = vmatpush1.bf16.msra.mxu0 %v13902_v45  ;;  %v13910_v27 = vand.u32 4294901760, %v10386_v29  ;;  %v13911_v59 = vand.u32 4294901760, %v10391_v3  ;;  %v13912_v7 = vand.u32 4294901760, %v10399_v35 }
 0x141   : > { %13905 = vst [vmem:[#allocation55_spill] sm:$0xff] %v10652_v5  ;;  %v10658_v22 = vpack.c.bf16 %v13907_v20, %v13906_v44  ;;  %7853 = vmatprep.subr.bf16.mxu0 %v10357_v52  ;;  %v13913_v14 = vand.u32 4294901760, %v10407_v25  ;;  %v13914_v11 = vand.u32 4294901760, %v10412_v28  ;;  %v13915_v19 = vld [vmem:[#allocation46_spill] sm:$0xff]  ;;  %v13916_v20 = vand.u32 4294901760, %v10422_v51 }
 0x142   : > { %v8048_v55 = vpack.c.bf16 %v13910_v27, %v13909_v62  ;;  %v7858_v45 = vpack.c.bf16 %v13912_v7, %v13911_v59  ;;  %v13096_v44 = vand.u32 4294901760, %v13915_v19  ;;  %v13917_v52 = vand.u32 4294901760, %v10427_v4 }
 0x143   : > { %13908 = vst [vmem:[#allocation48_spill] sm:$0xff] %v10658_v22  ;;  %v8050_v5 = vpack.c.bf16 %v13914_v11, %v13913_v14  ;;  %v13918_v29 = vand.u32 4294901760, %v10435_v6  ;;  %v13919_v62 = vand.u32 4294901760, %v10446_v36  ;;  %v13920_v35 = vand.u32 4294901760, %v10451_v37  ;;  %8043 = vmatpush1.bf16.msra.mxu1 %v10336_v30  ;;  %2136 = vmatmul.mubr.f32.vlgmr.msra.gmra.mrb[0].mxu0 %v10372_v33 }
 0x144   : > { %v7860_v46 = vpack.c.bf16 %v13917_v52, %v13916_v20  ;;  %v13921_v7 = vand.u32 4294901760, %v10459_v42  ;;  %v13922_v28 = vand.u32 4294901760, %v10464_v0  ;;  %v13923_v27 = vand.u32 4294901760, %v10475_v8  ;;  %8045 = vmatprep.subr.bf16.mxu1 %v10359_v9  ;;  %7855 = vmatpush1.bf16.msra.mxu0 %v10367_v15 }
 0x145   : > { %v8052_v3 = vpack.c.bf16 %v13919_v62, %v13918_v29  ;;  %v7864_v4 = vpack.c.bf16 %v2230_v13, %v2218_v18  ;;  %v8056_v51 = vpack.c.bf16 %v3085_v56, %v3073_v23  ;;  %v13924_v6 = vand.u32 4294901760, %v10175_v39  ;;  %7857 = vmatprep.subr.bf16.mxu0 %v10440_v38  ;;  %2366 = vmatprep.mubr.f32.mxu0 %v13539_v43  ;;  %v13933_v62 = vld [vmem:[#allocation61_spill] sm:$0xff] }
 0x146   : > { %v7862_v25 = vpack.c.bf16 %v13921_v7, %v13920_v35  ;;  %v8054_v59 = vpack.c.bf16 %v13923_v27, %v13922_v28  ;;  %v7866_v37 = vpack.c.bf16 %v2236_v17, %v2224_v1  ;;  %v13925_v42 = vand.u32 4294901760, %v10180_v16  ;;  %2991 = vmatmul.mubr.f32.vlgmr.msra.gmra.mrb[0].mxu1 %v10372_v33  ;;  %v13935_v7 = vld [vmem:[#allocation26_spill] sm:$0xff] }
 0x147   : > { %v3078_v36 = vsub.f32 %v10175_v39, %v13924_v6  ;;  %v13926_v0 = vand.u32 4294901760, %v13896_v63  ;;  %v2253_v18 = vsub.f32 %v13915_v19, %v13096_v44  ;;  %v13927_v13 = vand.u32 4294901760, %v10188_v34  ;;  %8047 = vmatpush1.bf16.msra.mxu1 %v13933_v62  ;;  %3221 = vmatprep.mubr.f32.mxu1 %v13539_v43 }
 0x148   : > { %v3090_v8 = vsub.f32 %v10180_v16, %v13925_v42  ;;  %v13928_v15 = vand.u32 4294901760, %v10193_v32  ;;  %v13929_v1 = vand.u32 4294901760, %v10197_v58  ;;  %v13930_v56 = vand.u32 4294901760, %v10201_v41  ;;  %8049 = vmatprep.subr.bf16.mxu1 %v8048_v55  ;;  %7859 = vmatpush1.bf16.msra.mxu0 %v7858_v45 }
 0x149   : > { %v2241_v14 = vsub.f32 %v13896_v63, %v13926_v0  ;;  %v3096_v9 = vsub.f32 %v10188_v34, %v13927_v13  ;;  %v13931_v11 = vand.u32 4294901760, %v10206_v12  ;;  %v13932_v52 = vand.u32 4294901760, %v10208_v31  ;;  %7861 = vmatprep.subr.bf16.mxu0 %v7860_v46 }
 0x14a   : > { %v3108_v23 = vsub.f32 %v10193_v32, %v13928_v15  ;;  %v2247_v38 = vsub.f32 %v10197_v58, %v13929_v1  ;;  %v2259_v17 = vsub.f32 %v10201_v41, %v13930_v56  ;;  %v13934_v33 = vand.u32 4294901760, %v13851_v2 }
 0x14b   : > { %v3102_v20 = vsub.f32 %v10206_v12, %v13931_v11  ;;  %v3114_v29 = vsub.f32 %v10208_v31, %v13932_v52  ;;  %v13936_v28 = vand.u32 4294901760, %v13935_v7  ;;  %v13937_v6 = vand.u32 4294901760, %v13852_v57  ;;  %v13940_v11 = vld [vmem:[#allocation75_spill] sm:$0xff]  ;;  %8051 = vmatpush1.bf16.msra.mxu1 %v8050_v5 }
 0x14c   : > { %v2265_v35 = vsub.f32 %v13851_v2, %v13934_v33  ;;  %v3079_v0 = vand.u32 4294901760, %v3078_v36  ;;  %v13938_v13 = vand.u32 4294901760, %v10223_v48  ;;  %v13939_v1 = vand.u32 4294901760, %v10228_v61  ;;  %8053 = vmatprep.subr.bf16.mxu1 %v8052_v3  ;;  %7863 = vmatpush1.bf16.msra.mxu0 %v7862_v25  ;;  %v13946_v25 = vld [vmem:[#allocation78_spill] sm:$0xff] }
 0x14d   : > { %v2277_v27 = vsub.f32 %v13935_v7, %v13936_v28  ;;  %v3120_v42 = vsub.f32 %v13852_v57, %v13937_v6  ;;  %v13941_v52 = vand.u32 4294901760, %v13940_v11  ;;  %v3091_v33 = vand.u32 4294901760, %v3090_v8  ;;  %7865 = vmatprep.subr.bf16.mxu0 %v7864_v4  ;;  %v13949_v4 = vld [vmem:[#allocation81_spill] sm:$0xff] }
 0x14e   : > { %v3132_v15 = vsub.f32 %v10223_v48, %v13938_v13  ;;  %v2271_v56 = vsub.f32 %v10228_v61, %v13939_v1  ;;  %v2242_v28 = vand.u32 4294901760, %v2241_v14  ;;  %v2254_v6 = vand.u32 4294901760, %v2253_v18 }
 0x14f   : > { %v2283_v62 = vsub.f32 %v13940_v11, %v13941_v52  ;;  %v3097_v44 = vand.u32 4294901760, %v3096_v9  ;;  %v3109_v55 = vand.u32 4294901760, %v3108_v23  ;;  %v2248_v45 = vand.u32 4294901760, %v2247_v38  ;;  %v13942_v52 = vld [vmem:[#allocation77_spill] sm:$0xff]  ;;  %8055 = vmatpush1.bf16.msra.mxu1 %v8054_v59 }
 0x150   : > { %v2260_v36 = vand.u32 4294901760, %v2259_v17  ;;  %v3103_v22 = vand.u32 4294901760, %v3102_v20  ;;  %v3115_v30 = vand.u32 4294901760, %v3114_v29  ;;  %v2266_v13 = vand.u32 4294901760, %v2265_v35  ;;  %8057 = vmatprep.subr.bf16.mxu1 %v8056_v51  ;;  %7867 = vmatpush1.bf16.msra.mxu0 %v7866_v37  ;;  %v13957_v51 = vld [vmem:[#allocation87_spill] sm:$0xff] }
 0x151   : > { %v2278_v48 = vand.u32 4294901760, %v2277_v27  ;;  %v3121_v57 = vand.u32 4294901760, %v3120_v42  ;;  %v3133_v1 = vand.u32 4294901760, %v3132_v15  ;;  %v2272_v61 = vand.u32 4294901760, %v2271_v56  ;;  %v13951_v56 = vld [vmem:[#allocation83_spill] sm:$0xff] }
 0x152   : > { %v2284_v31 = vand.u32 4294901760, %v2283_v62  ;;  %v13943_v46 = vand.u32 4294901760, %v13942_v52  ;;  %v8058_v14 = vpack.c.bf16 %v3091_v33, %v3079_v0  ;;  %v7868_v18 = vpack.c.bf16 %v2254_v6, %v2242_v28 }
 0x153   : > { %v13944_v9 = vand.u32 4294901760, %v10241_v53  ;;  %v13945_v23 = vand.u32 4294901760, %v10246_v40  ;;  %v8060_v3 = vpack.c.bf16 %v3109_v55, %v3097_v44  ;;  %v13947_v17 = vand.u32 4294901760, %v13946_v25  ;;  %v13953_v44 = vld [vmem:[#allocation84_spill] sm:$0xff] }
 0x154   : > { %v3126_v8 = vsub.f32 %v13942_v52, %v13943_v46  ;;  %v13948_v29 = vand.u32 4294901760, %v10250_v49  ;;  %v13950_v27 = vand.u32 4294901760, %v13949_v4  ;;  %v7870_v0 = vpack.c.bf16 %v2260_v36, %v2248_v45  ;;  %7869 = vmatprep.subr.bf16.mxu0 %v7868_v18  ;;  %8059 = vmatpush1.bf16.msra.mxu1 %v8058_v14 }
 0x155   : > { %v2289_v5 = vsub.f32 %v10241_v53, %v13944_v9  ;;  %v2301_v38 = vsub.f32 %v10246_v40, %v13945_v23  ;;  %v3138_v20 = vsub.f32 %v13946_v25, %v13947_v17  ;;  %v8062_v15 = vpack.c.bf16 %v3115_v30, %v3103_v22  ;;  %8061 = vmatprep.subr.bf16.mxu1 %v8060_v3 }
 0x156   : > { %v3144_v35 = vsub.f32 %v10250_v49, %v13948_v29  ;;  %v3156_v42 = vsub.f32 %v13949_v4, %v13950_v27  ;;  %v13952_v62 = vand.u32 4294901760, %v13951_v56  ;;  %v13954_v28 = vand.u32 4294901760, %v13953_v44  ;;  %7871 = vmatpush1.bf16.msra.mxu0 %v7870_v0 }
 0x157   : > { %v7872_v55 = vpack.c.bf16 %v2278_v48, %v2266_v13  ;;  %v8064_v46 = vpack.c.bf16 %v3133_v1, %v3121_v57  ;;  %v7874_v9 = vpack.c.bf16 %v2284_v31, %v2272_v61  ;;  %v3127_v23 = vand.u32 4294901760, %v3126_v8  ;;  %v13959_v61 = vld [vmem:[#allocation88_spill] sm:$0xff] }
 0x158   : > { %v2295_v33 = vsub.f32 %v13951_v56, %v13952_v62  ;;  %v2307_v6 = vsub.f32 %v13953_v44, %v13954_v28  ;;  %v2290_v17 = vand.u32 4294901760, %v2289_v5  ;;  %v2302_v29 = vand.u32 4294901760, %v2301_v38  ;;  %8063 = vmatpush1.bf16.msra.mxu1 %v8062_v15 }
 0x159   : > { %v13955_v59 = vand.u32 4294901760, %v13892_v47  ;;  %v13956_v22 = vand.u32 4294901760, %v13893_v24  ;;  %v3139_v36 = vand.u32 4294901760, %v3138_v20  ;;  %v3145_v27 = vand.u32 4294901760, %v3144_v35  ;;  %7873 = vmatprep.subr.bf16.mxu0 %v7872_v55  ;;  %8065 = vmatprep.subr.bf16.mxu1 %v8064_v46 }
 0x15a   : > { %v3157_v62 = vand.u32 4294901760, %v3156_v42  ;;  %v13958_v37 = vand.u32 4294901760, %v13957_v51  ;;  %v2296_v31 = vand.u32 4294901760, %v2295_v33  ;;  %v2308_v48 = vand.u32 4294901760, %v2307_v6  ;;  %7875 = vmatpush1.bf16.msra.mxu0 %v7874_v9  ;;  %v13969_v9 = vld [vmem:[#allocation34_spill] sm:$0xff] }
 0x15b   : > { %v2313_v30 = vsub.f32 %v13892_v47, %v13955_v59  ;;  %v2325_v45 = vsub.f32 %v13893_v24, %v13956_v22  ;;  %v13960_v13 = vand.u32 4294901760, %v13959_v61  ;;  %v13961_v8 = vand.u32 4294901760, %v10307_v26 }
 0x15c   : > { %v3150_v57 = vsub.f32 %v13957_v51, %v13958_v37  ;;  %v13962_v5 = vand.u32 4294901760, %v10316_v21  ;;  %v13963_v20 = vand.u32 4294901760, %v13894_v50  ;;  %v13964_v35 = vand.u32 4294901760, %v10326_v60 }
 0x15d   : > { %v3162_v1 = vsub.f32 %v13959_v61, %v13960_v13  ;;  %v3168_v18 = vsub.f32 %v10307_v26, %v13961_v8  ;;  %v7876_v33 = vpack.c.bf16 %v2302_v29, %v2290_v17  ;;  %v2314_v28 = vand.u32 4294901760, %v2313_v30 }
 0x15e   : > { %v3180_v38 = vsub.f32 %v10316_v21, %v13962_v5  ;;  %v2319_v14 = vsub.f32 %v13894_v50, %v13963_v20  ;;  %v2331_v42 = vsub.f32 %v10326_v60, %v13964_v35  ;;  %v2326_v6 = vand.u32 4294901760, %v2325_v45 }
 0x15f   : > { %v8066_v59 = vpack.c.bf16 %v3139_v36, %v3127_v23  ;;  %v8068_v22 = vpack.c.bf16 %v3157_v62, %v3145_v27  ;;  %v3151_v3 = vand.u32 4294901760, %v3150_v57  ;;  %v7878_v0 = vpack.c.bf16 %v2308_v48, %v2296_v31  ;;  %7877 = vmatprep.subr.bf16.mxu0 %v7876_v33  ;;  %v13967_v57 = vld [vmem:[#allocation29_spill] sm:$0xff]  ;;  %v13968_v31 = vld [vmem:[#allocation31_spill] sm:$0xff]  ;;  %v13974_v33 = vld [vmem:[#allocation62_spill] sm:$0xff] }
 0x160   : > { %v3163_v37 = vand.u32 4294901760, %v3162_v1  ;;  %v13965_v13 = vand.u32 4294901760, %v10341_v54  ;;  %v13966_v5 = vand.u32 4294901760, %v10343_v10  ;;  %v3169_v55 = vand.u32 4294901760, %v3168_v18  ;;  %v13970_v1 = vld [vmem:[#allocation36_spill] sm:$0xff] }
 0x161   : > { %v3181_v17 = vand.u32 4294901760, %v3180_v38  ;;  %v2320_v29 = vand.u32 4294901760, %v2319_v14  ;;  %v2332_v30 = vand.u32 4294901760, %v2331_v42  ;;  %v7880_v23 = vpack.c.bf16 %v2326_v6, %v2314_v28  ;;  %8067 = vmatpush1.bf16.msra.mxu1 %v8066_v59  ;;  %7879 = vmatpush1.bf16.msra.mxu0 %v7878_v0  ;;  %v13971_v38 = vld [vmem:[#allocation39_spill] sm:$0xff]  ;;  %v13972_v14 = vld [vmem:[#allocation40_spill] sm:$0xff]  ;;  %v13975_v6 = vld [vmem:[#allocation86_spill] sm:$0xff] }
 0x162   : > { %v3174_v8 = vsub.f32 %v10341_v54, %v13965_v13  ;;  %v3186_v20 = vsub.f32 %v10343_v10, %v13966_v5  ;;  %v8070_v15 = vpack.c.bf16 %v3163_v37, %v3151_v3  ;;  %8069 = vmatprep.subr.bf16.mxu1 %v8068_v22  ;;  %v7884_v48 = vpack.c.bf16 %v13968_v31, %v13967_v57  ;;  %v13973_v42 = vld [vmem:[#allocation56_spill] sm:$0xff]  ;;  %v13976_v59 = vld [vmem:[#allocation41_spill] sm:$0xff]  ;;  %v13979_v37 = vld [vmem:[#allocation67_spill] sm:$0xff] }
 0x163   : > { %v8072_v27 = vpack.c.bf16 %v3181_v17, %v3169_v55  ;;  %v7882_v62 = vpack.c.bf16 %v2332_v30, %v2320_v29  ;;  %7881 = vmatprep.subr.bf16.mxu0 %v7880_v23  ;;  %v8076_v18 = vpack.c.bf16 %v13970_v1, %v13969_v9  ;;  %v7886_v35 = vpack.c.bf16 %v13972_v14, %v13971_v38  ;;  %v13977_v22 = vld [vmem:[#allocation52_spill] sm:$0xff]  ;;  %v13978_v0 = vld [vmem:[#allocation65_spill] sm:$0xff]  ;;  %v13981_v5 = vld [vmem:[#allocation70_spill] sm:$0xff] }
 0x164   : > { %v3175_v45 = vand.u32 4294901760, %v3174_v8  ;;  %v3187_v36 = vand.u32 4294901760, %v3186_v20  ;;  %v7888_v28 = vpack.c.bf16 %v13974_v33, %v13973_v42  ;;  %v8078_v3 = vpack.c.bf16 %v13977_v22, %v13976_v59  ;;  %v13980_v8 = vld [vmem:[#allocation5_spill] sm:$0xff]  ;;  %v13982_v55 = vld [vmem:[#allocation15_spill] sm:$0xff]  ;;  %v13983_v17 = vld [vmem:[#allocation16_spill] sm:$0xff] }
 0x165   : > { %8071 = vmatpush1.bf16.msra.mxu1 %v8070_v15  ;;  %7883 = vmatpush1.bf16.msra.mxu0 %v7882_v62  ;;  %v8080_v13 = vpack.c.bf16 %v13979_v37, %v13978_v0  ;;  %v7890_v20 = vpack.c.bf16 %v13981_v5, %v13980_v8  ;;  %v7892_v29 = vpack.c.bf16 %v13983_v17, %v13982_v55  ;;  %v13984_v30 = vld [vmem:[#allocation11_spill] sm:$0xff]  ;;  %v13985_v23 = vld [vmem:[#allocation14_spill] sm:$0xff] }
 0x166   : > { %v8074_v46 = vpack.c.bf16 %v3187_v36, %v3175_v45  ;;  %8073 = vmatprep.subr.bf16.mxu1 %v8072_v27  ;;  %7885 = vmatprep.subr.bf16.mxu0 %v7884_v48  ;;  %v8082_v15 = vpack.c.bf16 %v13985_v23, %v13984_v30  ;;  %v13986_v45 = vld [vmem:[#allocation17_spill] sm:$0xff]  ;;  %v13987_v36 = vld [vmem:[#allocation19_spill] sm:$0xff]  ;;  %v13988_v62 = vld [vmem:[#allocation22_spill] sm:$0xff] }
 0x167   : > { %v8084_v27 = vpack.c.bf16 %v13987_v36, %v13986_v45  ;;  %v13989_v48 = vld [vmem:[#allocation21_spill] sm:$0xff]  ;;  %v13994_v23 = vld [vmem:[#allocation35_spill] sm:$0xff]  ;;  %v13995_v30 = vld [vmem:[#allocation42_spill] sm:$0xff] }
 0x168   : > { %2368 = vmatmul.mubr.f32.vlgmr.msra.gmra.mrb[0].mxu0 %v13975_v6  ;;  %v13997_v55 = vld [vmem:[#allocation7_spill] sm:$0xff] }
 0x169   : > { %8075 = vmatpush1.bf16.msra.mxu1 %v8074_v46  ;;  %7887 = vmatpush1.bf16.msra.mxu0 %v7886_v35  ;;  %v7894_v46 = vpack.c.bf16 %v13989_v48, %v13988_v62  ;;  %v13991_v35 = vld [vmem:[#allocation32_spill] sm:$0xff]  ;;  %v7900_v48 = vpack.c.bf16 %v13915_v19, %v13896_v63 }
 0x16a   : > { %8077 = vmatprep.subr.bf16.mxu1 %v8076_v18  ;;  %7889 = vmatprep.subr.bf16.mxu0 %v7888_v28  ;;  %v13990_v18 = vld [vmem:[#allocation30_spill] sm:$0xff] }
 0x16b   : > { %2502 = vmatprep.mubr.f32.mxu0 %v13539_v43  ;;  %v7896_v28 = vpack.c.bf16 %v13991_v35, %v13990_v18 }
 0x16c   : > { %3223 = vmatmul.mubr.f32.vlgmr.msra.gmra.mrb[0].mxu1 %v13975_v6  ;;  %v13992_v6 = vld [vmem:[#allocation24_spill] sm:$0xff] }
 0x16d   : > { %8079 = vmatpush1.bf16.msra.mxu1 %v8078_v3  ;;  %3357 = vmatprep.mubr.f32.mxu1 %v13539_v43  ;;  %v13993_v3 = vld [vmem:[#allocation28_spill] sm:$0xff] }
 0x16e   : > { %8081 = vmatprep.subr.bf16.mxu1 %v8080_v13  ;;  %7891 = vmatpush1.bf16.msra.mxu0 %v7890_v20  ;;  %v8086_v17 = vpack.c.bf16 %v13993_v3, %v13992_v6  ;;  %v8088_v13 = vpack.c.bf16 %v13995_v30, %v13994_v23  ;;  %v13996_v20 = vld [vmem:[#allocation6_spill] sm:$0xff] }
 0x16f   : > { %7893 = vmatprep.subr.bf16.mxu0 %v7892_v29  ;;  %v7898_v5 = vpack.c.bf16 %v13997_v55, %v13996_v20  ;;  %v8090_v29 = vpack.c.bf16 %v10180_v16, %v10175_v39  ;;  %v14000_v39 = vld [vmem:[#allocation72_spill] sm:$0xff] }
 0x171   : > { %8083 = vmatpush1.bf16.msra.mxu1 %v8082_v15  ;;  %v8092_v15 = vpack.c.bf16 %v10193_v32, %v10188_v34  ;;  %v7908_v34 = vpack.c.bf16 %v10246_v40, %v10241_v53  ;;  %v8100_v32 = vpack.c.bf16 %v13949_v4, %v10250_v49  ;;  %v8104_v53 = vpack.c.bf16 %v10316_v21, %v10307_v26  ;;  %v14006_v21 = vld [vmem:[#allocation53_spill] sm:$0xff]  ;;  %v14009_v26 = vld [vmem:[#allocation68_spill] sm:$0xff]  ;;  %v14015_v4 = vld [vmem:[#allocation23_spill] sm:$0xff] }
 0x172   : > { %8085 = vmatprep.subr.bf16.mxu1 %v8084_v27  ;;  %7895 = vmatpush1.bf16.msra.mxu0 %v7894_v46  ;;  %v7902_v27 = vpack.c.bf16 %v10201_v41, %v10197_v58  ;;  %v7904_v46 = vpack.c.bf16 %v13935_v7, %v13851_v2  ;;  %v8098_v2 = vpack.c.bf16 %v13946_v25, %v13942_v52  ;;  %v14005_v7 = vld [vmem:[#allocation37_spill] sm:$0xff]  ;;  %v14013_v52 = vld [vmem:[#allocation20_spill] sm:$0xff] }
 0x173   : > { %7897 = vmatprep.subr.bf16.mxu0 %v7896_v28  ;;  %v13998_v28 = vld [vmem:[#allocation59_spill] sm:$0xff]  ;;  %v7910_v58 = vpack.c.bf16 %v13953_v44, %v13951_v56  ;;  %v7912_v41 = vpack.c.bf16 %v13893_v24, %v13892_v47  ;;  %v7914_v40 = vpack.c.bf16 %v10326_v60, %v13894_v50  ;;  %v8106_v49 = vpack.c.bf16 %v10343_v10, %v10341_v54  ;;  %v14003_v24 = vld [vmem:[#allocation90_spill] sm:$0xff]  ;;  %v14008_v54 = vld [vmem:[#allocation64_spill] sm:$0xff] }
 0x174   : > { %v8094_v19 = vpack.c.bf16 %v13998_v28, %v10206_v12  ;;  %v8102_v12 = vpack.c.bf16 %v13959_v61, %v13957_v51  ;;  %v14002_v47 = vld [vmem:[#allocation27_spill] sm:$0xff]  ;;  %v14010_v60 = vld [vmem:[#allocation13_spill] sm:$0xff]  ;;  %v14016_v56 = vld [vmem:[#allocation38_spill] sm:$0xff] }
 0x175   : > { %8087 = vmatpush1.bf16.msra.mxu1 %v8086_v17  ;;  %v13999_v17 = vld [vmem:[#allocation12_spill] sm:$0xff]  ;;  %v14007_v50 = vld [vmem:[#allocation43_spill] sm:$0xff]  ;;  %v14011_v10 = vld [vmem:[#allocation9_spill] sm:$0xff] }
 0x176   : > { %8089 = vmatprep.subr.bf16.mxu1 %v8088_v13  ;;  %7899 = vmatpush1.bf16.msra.mxu0 %v7898_v5  ;;  %v8096_v16 = vpack.c.bf16 %v14000_v39, %v13999_v17  ;;  %v14001_v5 = vld [vmem:[#allocation74_spill] sm:$0xff]  ;;  %v14014_v25 = vld [vmem:[#allocation25_spill] sm:$0xff]  ;;  %v14017_v44 = vld [vmem:[#allocation44_spill] sm:$0xff] }
 0x177   : > { %7901 = vmatprep.subr.bf16.mxu0 %v7900_v48  ;;  %v7906_v13 = vpack.c.bf16 %v13940_v11, %v14001_v5  ;;  %v14012_v11 = vld [vmem:[#allocation18_spill] sm:$0xff]  ;;  %v14018_v51 = vld [vmem:[#allocation45_spill] sm:$0xff]  ;;  %v14019_v61 = vld [vmem:[#allocation71_spill] sm:$0xff] }
 0x178   : > { %v14020_v48 = vld [vmem:[#allocation49_spill] sm:$0xff]  ;;  %v14026_v17 = vld [vmem:[#allocation79_spill] sm:$0xff]  ;;  %v14027_v39 = vld [vmem:[#allocation76_spill] sm:$0xff] }
 0x179   : > { %8091 = vmatpush1.bf16.msra.mxu1 %v8090_v29  ;;  %v14021_v29 = vld [vmem:[#allocation51_spill] sm:$0xff]  ;;  %v14025_v28 = vld [vmem:[#allocation73_spill] sm:$0xff]  ;;  %v14029_v5 = vld [vmem:[#allocation82_spill] sm:$0xff] }
 0x17a   : > { %8093 = vmatprep.subr.bf16.mxu1 %v8092_v15  ;;  %7903 = vmatpush1.bf16.msra.mxu0 %v7902_v27  ;;  %v14022_v15 = vld [vmem:[#allocation8_spill] sm:$0xff] }
 0x17b   : > { %7905 = vmatprep.subr.bf16.mxu0 %v7904_v46  ;;  %v14023_v27 = vld [vmem:[#allocation60_spill] sm:$0xff]  ;;  %v14024_v46 = vld [vmem:[#allocation69_spill] sm:$0xff] }
 0x17d   : > { %8095 = vmatpush1.bf16.msra.mxu1 %v8094_v19  ;;  %v14004_v19 = vld [vmem:[#allocation33_spill] sm:$0xff] }
 0x17e   : > { %8097 = vmatprep.subr.bf16.mxu1 %v8096_v16  ;;  %7907 = vmatpush1.bf16.msra.mxu0 %v7906_v13  ;;  %v14028_v16 = vld [vmem:[#allocation80_spill] sm:$0xff]  ;;  %v14030_v13 = vld [vmem:[#allocation89_spill] sm:$0xff] }
 0x17f   : > { %7909 = vmatprep.subr.bf16.mxu0 %v7908_v34  ;;  %v14031_v34 = vand.u32 4294901760, %v13967_v57  ;;  %v14040_v57 = vand.u32 4294901760, %v13973_v42  ;;  %v14048_v42 = vand.u32 4294901760, %v13980_v8  ;;  %v14059_v8 = vand.u32 4294901760, %v13986_v45 }
 0x181   : > { %8099 = vmatpush1.bf16.msra.mxu1 %v8098_v2  ;;  %v14032_v2 = vand.u32 4294901760, %v13968_v31  ;;  %v14041_v31 = vand.u32 4294901760, %v13974_v33  ;;  %v14049_v33 = vld [vmem:[#allocation70_spill] sm:$0xff] }
 0x182   : > { %8101 = vmatprep.subr.bf16.mxu1 %v8100_v32  ;;  %7911 = vmatpush1.bf16.msra.mxu0 %v7910_v58  ;;  %v14033_v58 = vld [vmem:[#allocation85_spill] sm:$0xff] }
 0x183   : > { %7913 = vmatprep.subr.bf16.mxu0 %v7912_v41  ;;  %v7948_v32 = vpack.c.bf16 %v14032_v2, %v14031_v34  ;;  %v14034_v41 = vld [vmem:[#allocation91_spill] sm:$0xff]  ;;  %v7952_v34 = vpack.c.bf16 %v14041_v31, %v14040_v57  ;;  %v14042_v2 = vld [vmem:[#allocation57_spill] sm:$0xff]  ;;  %v14053_v31 = vld [vmem:[#allocation16_spill] sm:$0xff] }
 0x185   : > { %8103 = vmatpush1.bf16.msra.mxu1 %v8102_v12  ;;  %v14035_v12 = vld [vmem:[#allocation54_spill] sm:$0xff] }
 0x186   : > { %8105 = vmatprep.subr.bf16.mxu1 %v8104_v53  ;;  %7915 = vmatpush1.bf16.msra.mxu0 %v7914_v40  ;;  %v14036_v53 = vand.u32 4294901760, %v13969_v9  ;;  %v14037_v40 = vand.u32 4294901760, %v13970_v1  ;;  %v14044_v9 = vand.u32 4294901760, %v13976_v59  ;;  %v14045_v1 = vand.u32 4294901760, %v13977_v22  ;;  %v14055_v22 = vld [vmem:[#allocation11_spill] sm:$0xff] }
 0x187   : > { %7917 = vmatprep.subr.bf16.mxu0 %v14002_v47  ;;  %v14054_v59 = vand.u32 4294901760, %v14053_v31 }
 0x189   : > { %8107 = vmatpush1.bf16.msra.mxu1 %v8106_v49  ;;  %2505 = vmatmul.mubr.f32.vlgmr.msra.gmra.mrb[0].mxu0 %v14003_v24  ;;  %v8140_v49 = vpack.c.bf16 %v14037_v40, %v14036_v53  ;;  %v8142_v53 = vpack.c.bf16 %v14045_v1, %v14044_v9  ;;  %v14061_v1 = vand.u32 4294901760, %v13988_v62  ;;  %v14069_v62 = vand.u32 4294901760, %v13995_v30  ;;  %v14076_v30 = vld [vmem:[#allocation66_spill] sm:$0xff] }
 0x18a   : > { %8109 = vmatprep.subr.bf16.mxu1 %v14004_v19  ;;  %7919 = vmatpush1.bf16.msra.mxu0 %v14005_v7 }
 0x18b   : > { %7921 = vmatprep.subr.bf16.mxu0 %v14006_v21  ;;  %2607 = vmatprep.mubr.f32.mxu0 %v13539_v43 }
 0x18c   : > { %3360 = vmatmul.mubr.f32.vlgmr.msra.gmra.mrb[0].mxu1 %v14003_v24  ;;  %v14038_v24 = vand.u32 4294901760, %v13971_v38  ;;  %v14046_v38 = vand.u32 4294901760, %v13978_v0  ;;  %v14056_v0 = vand.u32 4294901760, %v14055_v22  ;;  %v3754_v22 = vld [vmem:[#allocation2 + $0x438] sm:$0xff] }
 0x18d   : > { %8111 = vmatpush1.bf16.msra.mxu1 %v14007_v50  ;;  %3462 = vmatprep.mubr.f32.mxu1 %v13539_v43 }
 0x18e   : > { %8113 = vmatprep.subr.bf16.mxu1 %v14008_v54  ;;  %7923 = vmatpush1.bf16.msra.mxu0 %v14009_v26 }
 0x18f   : > { %7925 = vmatprep.subr.bf16.mxu0 %v14010_v60 }
 0x191   : > { %8115 = vmatpush1.bf16.msra.mxu1 %v14011_v10 }
 0x192   : > { %8117 = vmatprep.subr.bf16.mxu1 %v14012_v11  ;;  %7927 = vmatpush1.bf16.msra.mxu0 %v14013_v52 }
 0x193   : > { %7929 = vmatprep.subr.bf16.mxu0 %v14014_v25 }
 0x195   : > { %8119 = vmatpush1.bf16.msra.mxu1 %v14015_v4 }
 0x196   : > { %8121 = vmatprep.subr.bf16.mxu1 %v14016_v56  ;;  %7931 = vmatpush1.bf16.msra.mxu0 %v14017_v44 }
 0x197   : > { %7933 = vmatprep.subr.bf16.mxu0 %v14018_v51 }
 0x199   : > { %8123 = vmatpush1.bf16.msra.mxu1 %v14019_v61 }
 0x19a   : > { %8125 = vmatprep.subr.bf16.mxu1 %v14020_v48  ;;  %7935 = vmatpush1.bf16.msra.mxu0 %v14021_v29 }
 0x19b   : > { %7937 = vmatprep.subr.bf16.mxu0 %v14022_v15 }
 0x19d   : > { %8127 = vmatpush1.bf16.msra.mxu1 %v14023_v27 }
 0x19e   : > { %8129 = vmatprep.subr.bf16.mxu1 %v14024_v46  ;;  %7939 = vmatpush1.bf16.msra.mxu0 %v14025_v28 }
 0x19f   : > { %7941 = vmatprep.subr.bf16.mxu0 %v14026_v17 }
 0x1a1   : > { %8131 = vmatpush1.bf16.msra.mxu1 %v14027_v39 }
 0x1a2   : > { %8133 = vmatprep.subr.bf16.mxu1 %v14028_v16  ;;  %7943 = vmatpush1.bf16.msra.mxu0 %v14029_v5 }
 0x1a3   : > { %7945 = vmatprep.subr.bf16.mxu0 %v14030_v13  ;;  %v14039_v13 = vand.u32 4294901760, %v13972_v14  ;;  %v14047_v14 = vand.u32 4294901760, %v13979_v37  ;;  %v14057_v37 = vld [vmem:[#allocation14_spill] sm:$0xff] }
 0x1a5   : > { %8135 = vmatpush1.bf16.msra.mxu1 %v14033_v58  ;;  %v7950_v5 = vpack.c.bf16 %v14039_v13, %v14038_v24  ;;  %v8144_v13 = vpack.c.bf16 %v14047_v14, %v14046_v38  ;;  %v14051_v24 = vld [vmem:[#allocation15_spill] sm:$0xff]  ;;  %v14062_v38 = vld [vmem:[#allocation21_spill] sm:$0xff] }
 0x1a6   : > { %8137 = vmatprep.subr.bf16.mxu1 %v14034_v41  ;;  %7947 = vmatpush1.bf16.msra.mxu0 %v14035_v12  ;;  %v14043_v41 = vld [vmem:[#allocation58_spill] sm:$0xff]  ;;  %v14052_v57 = vand.u32 4294901760, %v14051_v24  ;;  %v14063_v14 = vand.u32 4294901760, %v14062_v38  ;;  %v4670_v38 = vand.u32 4294901760, %v3754_v22 }
 0x1a7   : > { %7949 = vmatprep.subr.bf16.mxu0 %v7948_v32  ;;  %v14050_v32 = vand.u32 4294901760, %v14049_v33  ;;  %v3764_v12 = vld [vmem:[#allocation2 + $0x488] sm:$0xff] }
 0x1a9   : > { %8139 = vmatpush1.bf16.msra.mxu1 %v14042_v2  ;;  %2611 = vmatmul.mubr.f32.vlgmr.msra.gmra.mrb[0].mxu0 %v14043_v41  ;;  %v7954_v40 = vpack.c.bf16 %v14050_v32, %v14048_v42  ;;  %v7956_v2 = vpack.c.bf16 %v14054_v59, %v14052_v57  ;;  %v14065_v42 = vand.u32 4294901760, %v13991_v35  ;;  %v14067_v32 = vand.u32 4294901760, %v13993_v3  ;;  %v14073_v57 = vld [vmem:[#allocation46_spill] sm:$0xff]  ;;  %v14075_v59 = vld [vmem:[#allocation63_spill] sm:$0xff] }
 0x1aa   : > { %8141 = vmatprep.subr.bf16.mxu1 %v8140_v49  ;;  %7951 = vmatpush1.bf16.msra.mxu0 %v7950_v5  ;;  %v14058_v5 = vand.u32 4294901760, %v14057_v37  ;;  %v14072_v35 = vand.u32 4294901760, %v13896_v63  ;;  %v3748_v3 = vld [vmem:[#allocation2 + $0x408] sm:$0xff] }
 0x1ab   : > { %7953 = vmatprep.subr.bf16.mxu0 %v7952_v34  ;;  %2777 = vmatprep.mubr.f32.mxu0 %v13539_v43  ;;  %v14060_v34 = vand.u32 4294901760, %v13987_v36  ;;  %v14068_v36 = vand.u32 4294901760, %v13994_v23  ;;  %v3752_v23 = vld [vmem:[#allocation2 + $0x428] sm:$0xff]  ;;  %v3811_v63 = vand.u32 4294901760, %v3748_v3 }
 0x1ac   : > { %3466 = vmatmul.mubr.f32.vlgmr.msra.gmra.mrb[0].mxu1 %v14043_v41  ;;  %v8146_v49 = vpack.c.bf16 %v14058_v5, %v14056_v0  ;;  %v7958_v41 = vpack.c.bf16 %v14063_v14, %v14061_v1  ;;  %v14078_v0 = vld [vmem:[#allocation10_spill] sm:$0xff]  ;;  %v3815_v37 = vand.u32 4294901760, %v3752_v23  ;;  %v3747_v5 = vld [vmem:[#allocation2 + $0x400] sm:$0xff] }
 0x1ad   : > { %8143 = vmatpush1.bf16.msra.mxu1 %v8142_v53  ;;  %3632 = vmatprep.mubr.f32.mxu1 %v13539_v43  ;;  %v8148_v9 = vpack.c.bf16 %v14060_v34, %v14059_v8  ;;  %v14064_v53 = vand.u32 4294901760, %v13990_v18  ;;  %v14071_v18 = vand.u32 4294901760, %v13997_v55  ;;  %v3750_v55 = vld [vmem:[#allocation2 + $0x418] sm:$0xff]  ;;  %v3749_v8 = vld [vmem:[#allocation2 + $0x410] sm:$0xff]  ;;  %v3756_v14 = vld [vmem:[#allocation2 + $0x448] sm:$0xff] }
 0x1ae   : > { %8145 = vmatprep.subr.bf16.mxu1 %v8144_v13  ;;  %7955 = vmatpush1.bf16.msra.mxu0 %v7954_v40  ;;  %v14066_v13 = vand.u32 4294901760, %v13992_v6  ;;  %v8152_v40 = vpack.c.bf16 %v14069_v62, %v14068_v36  ;;  %v14074_v6 = vand.u32 4294901760, %v14073_v57  ;;  %v3753_v34 = vld [vmem:[#allocation2 + $0x430] sm:$0xff]  ;;  %v4666_v1 = vand.u32 4294901760, %v3750_v55  ;;  %v14082_v36 = vld [vmem:[#allocation97_spill] sm:$0xff] }
 0x1af   : > { %7957 = vmatprep.subr.bf16.mxu0 %v7956_v2  ;;  %v7960_v33 = vpack.c.bf16 %v14065_v42, %v14064_v53  ;;  %v14070_v2 = vand.u32 4294901760, %v13996_v20  ;;  %v14077_v20 = vld [vmem:[#allocation92_spill] sm:$0xff]  ;;  %v14080_v53 = vld [vmem:[#allocation94_spill] sm:$0xff]  ;;  %v14081_v42 = vld [vmem:[#allocation95_spill] sm:$0xff]  ;;  %v10981_v62 = vpack.c.bf16 %v3815_v37, %v3811_v63 }
 0x1b0   : > { %v8150_v45 = vpack.c.bf16 %v14067_v32, %v14066_v13  ;;  %v7964_v31 = vpack.c.bf16 %v14074_v6, %v14072_v35  ;;  %v3758_v32 = vld [vmem:[#allocation2 + $0x458] sm:$0xff]  ;;  %v3819_v35 = vand.u32 4294901760, %v3756_v14  ;;  %v3755_v6 = vld [vmem:[#allocation2 + $0x440] sm:$0xff] }
 0x1b1   : > { %8147 = vmatpush1.bf16.msra.mxu1 %v8146_v49  ;;  %v7962_v24 = vpack.c.bf16 %v14071_v18, %v14070_v2  ;;  %v3751_v49 = vld [vmem:[#allocation2 + $0x420] sm:$0xff]  ;;  %14083 = vst [vmem:[#allocation61_spill] sm:$0xff] %v10981_v62  ;;  %v4672_v2 = vand.u32 4294901760, %v3753_v34  ;;  %v10983_v18 = vsub.f32 %v3748_v3, %v3811_v63  ;;  %v10994_v3 = vsub.f32 %v3754_v22, %v4670_v38  ;;  %v14094_v62 = vld [vmem:[#allocation50_spill] sm:$0xff] }
 0x1b2   : > { %8149 = vmatprep.subr.bf16.mxu1 %v8148_v9  ;;  %7959 = vmatpush1.bf16.msra.mxu0 %v7958_v41  ;;  %v14079_v9 = vld [vmem:[#allocation93_spill] sm:$0xff]  ;;  %v3760_v41 = vld [vmem:[#allocation2 + $0x468] sm:$0xff]  ;;  %v3817_v13 = vand.u32 4294901760, %v3751_v49 }
 0x1b3   : > { %7961 = vmatprep.subr.bf16.mxu0 %v7960_v33  ;;  %v3813_v33 = vand.u32 4294901760, %v3747_v5  ;;  %14084 = vst [vmem:[#allocation26_spill] sm:$0xff] %v10983_v18  ;;  %v3823_v57 = vand.u32 4294901760, %v3760_v41  ;;  %14091 = vst [vmem:[#allocation81_spill] sm:$0xff] %v10994_v3  ;;  %v11007_v22 = vsub.f32 %v3753_v34, %v4672_v2  ;;  %v14105_v34 = vld [vmem:[#allocation55_spill] sm:$0xff] }
 0x1b5   : > { %8151 = vmatpush1.bf16.msra.mxu1 %v8150_v45  ;;  %v3762_v45 = vld [vmem:[#allocation2 + $0x478] sm:$0xff]  ;;  %v10998_v63 = vsub.f32 %v3747_v5, %v3813_v33  ;;  %14098 = vst [vmem:[#allocation31_spill] sm:$0xff] %v11007_v22  ;;  %v11011_v5 = vsub.f32 %v3756_v14, %v3819_v35  ;;  %v14113_v22 = vld [vmem:[#allocation86_spill] sm:$0xff] }
 0x1b6   : > { %8153 = vmatprep.subr.bf16.mxu1 %v8152_v40  ;;  %7963 = vmatpush1.bf16.msra.mxu0 %v7962_v24  ;;  %v4668_v40 = vand.u32 4294901760, %v3749_v8  ;;  %v10985_v24 = vsub.f32 %v3752_v23, %v3815_v37  ;;  %v10996_v23 = vpack.c.bf16 %v3817_v13, %v3813_v33  ;;  %v3757_v37 = vld [vmem:[#allocation2 + $0x450] sm:$0xff]  ;;  %v3766_v33 = vld [vmem:[#allocation2 + $0x498] sm:$0xff] }
 0x1b7   : > { %7965 = vmatprep.subr.bf16.mxu0 %v7964_v31  ;;  %v3759_v31 = vld [vmem:[#allocation2 + $0x460] sm:$0xff]  ;;  %14093 = vst [vmem:[#allocation84_spill] sm:$0xff] %v10998_v63  ;;  %14100 = vst [vmem:[#allocation36_spill] sm:$0xff] %v11011_v5 }
 0x1b8   : > { %14085 = vst [vmem:[#allocation75_spill] sm:$0xff] %v10985_v24  ;;  %14092 = vst [vmem:[#allocation83_spill] sm:$0xff] %v10996_v23  ;;  %v11005_v58 = vsub.f32 %v3749_v8, %v4668_v40  ;;  %v3770_v23 = vld [vmem:[#allocation2 + $0x4b8] sm:$0xff]  ;;  %v3767_v63 = vld [vmem:[#allocation2 + $0x4a0] sm:$0xff] }
 0x1b9   : > { %8155 = vmatpush1.bf16.msra.mxu1 %v14075_v59  ;;  %v14086_v59 = vld [vmem:[#allocation96_spill] sm:$0xff]  ;;  %v14104_v8 = vld [vmem:[#allocation47_spill] sm:$0xff] }
 0x1ba   : > { %8157 = vmatprep.subr.bf16.mxu1 %v14076_v30  ;;  %7967 = vmatpush1.bf16.msra.mxu0 %v14077_v20  ;;  %v10988_v30 = vpack.c.bf16 %v4670_v38, %v4666_v1  ;;  %v10990_v20 = vsub.f32 %v3750_v55, %v4666_v1  ;;  %v11003_v55 = vpack.c.bf16 %v4672_v2, %v4668_v40  ;;  %v3821_v1 = vand.u32 4294901760, %v3755_v6 }
 0x1bb   : > { %7969 = vmatprep.subr.bf16.mxu0 %v14078_v0  ;;  %v4674_v0 = vand.u32 4294901760, %v3758_v32  ;;  %14097 = vst [vmem:[#allocation29_spill] sm:$0xff] %v11005_v58  ;;  %v11009_v38 = vpack.c.bf16 %v3823_v57, %v3819_v35  ;;  %v3827_v2 = vand.u32 4294901760, %v3764_v12 }
 0x1bc   : > { %14087 = vst [vmem:[#allocation77_spill] sm:$0xff] %v10988_v30  ;;  %14088 = vst [vmem:[#allocation78_spill] sm:$0xff] %v10990_v20  ;;  %v3825_v30 = vand.u32 4294901760, %v3759_v31 }
 0x1bd   : > { %8159 = vmatpush1.bf16.msra.mxu1 %v14079_v9  ;;  %v4678_v9 = vand.u32 4294901760, %v3762_v45  ;;  %14096 = vst [vmem:[#allocation88_spill] sm:$0xff] %v11003_v55  ;;  %14099 = vst [vmem:[#allocation34_spill] sm:$0xff] %v11009_v38  ;;  %v11020_v40 = vsub.f32 %v3758_v32, %v4674_v0  ;;  %v4686_v32 = vand.u32 4294901760, %v3770_v23 }
 0x1be   : > { %8161 = vmatprep.subr.bf16.mxu1 %v14080_v53  ;;  %7971 = vmatpush1.bf16.msra.mxu0 %v14081_v42  ;;  %v14089_v53 = vld [vmem:[#allocation98_spill] sm:$0xff]  ;;  %v14090_v42 = vld [vmem:[#allocation99_spill] sm:$0xff]  ;;  %v11029_v38 = vsub.f32 %v3759_v31, %v3825_v30 }
 0x1bf   : > { %7973 = vmatprep.subr.bf16.mxu0 %v14082_v36  ;;  %v3761_v36 = vld [vmem:[#allocation2 + $0x470] sm:$0xff]  ;;  %14106 = vst [vmem:[#allocation56_spill] sm:$0xff] %v11020_v40  ;;  %v11022_v14 = vsub.f32 %v3762_v45, %v4678_v9  ;;  %v3833_v45 = vand.u32 4294901760, %v3767_v63  ;;  %v14112_v40 = vld [vmem:[#allocation48_spill] sm:$0xff] }
 0x1c0   : > { %v4680_v55 = vand.u32 4294901760, %v3761_v36  ;;  %14110 = vst [vmem:[#allocation65_spill] sm:$0xff] %v11029_v38  ;;  %v3771_v38 = vld [vmem:[#allocation2 + $0x4c0] sm:$0xff] }
 0x1c1   : > { %8163 = vmatpush1.bf16.msra.mxu1 %v14086_v59  ;;  %v11001_v59 = vsub.f32 %v3751_v49, %v3817_v13  ;;  %v11016_v49 = vpack.c.bf16 %v4678_v9, %v4674_v0  ;;  %v4676_v13 = vand.u32 4294901760, %v3757_v37  ;;  %14107 = vst [vmem:[#allocation62_spill] sm:$0xff] %v11022_v14  ;;  %v3776_v9 = vld [vmem:[#allocation2 + $0x4e8] sm:$0xff]  ;;  %v3778_v14 = vld [vmem:[#allocation2 + $0x4f8] sm:$0xff] }
 0x1c2   : > { %8165 = vmatprep.subr.bf16.mxu1 %v14089_v53  ;;  %7975 = vmatpush1.bf16.msra.mxu0 %v14090_v42  ;;  %v3768_v53 = vld [vmem:[#allocation2 + $0x4a8] sm:$0xff]  ;;  %v14101_v42 = vld [vmem:[#allocation100_spill] sm:$0xff] }
 0x1c3   : > { %7977 = vmatprep.subr.bf16.mxu0 %v14094_v62  ;;  %14095 = vst [vmem:[#allocation87_spill] sm:$0xff] %v11001_v59  ;;  %v11014_v62 = vsub.f32 %v3760_v41, %v3823_v57  ;;  %14103 = vst [vmem:[#allocation40_spill] sm:$0xff] %v11016_v49  ;;  %v3763_v59 = vld [vmem:[#allocation2 + $0x480] sm:$0xff]  ;;  %v3831_v35 = vand.u32 4294901760, %v3768_v53  ;;  %v3769_v41 = vld [vmem:[#allocation2 + $0x4b0] sm:$0xff]  ;;  %v11025_v57 = vpack.c.bf16 %v3825_v30, %v3821_v1 }
 0x1c4   : > { %v11027_v49 = vsub.f32 %v3755_v6, %v3821_v1  ;;  %v11031_v5 = vsub.f32 %v3757_v37, %v4676_v13  ;;  %v3829_v0 = vand.u32 4294901760, %v3763_v59  ;;  %v11037_v6 = vsub.f32 %v3761_v36, %v4680_v55 }
 0x1c5   : > { %8167 = vmatpush1.bf16.msra.mxu1 %v14101_v42  ;;  %14102 = vst [vmem:[#allocation39_spill] sm:$0xff] %v11014_v62  ;;  %v3765_v42 = vld [vmem:[#allocation2 + $0x490] sm:$0xff]  ;;  %14108 = vst [vmem:[#allocation41_spill] sm:$0xff] %v11025_v57  ;;  %v4682_v62 = vand.u32 4294901760, %v3766_v33  ;;  %v4688_v30 = vand.u32 4294901760, %v3769_v41  ;;  %v11041_v37 = vpack.c.bf16 %v3831_v35, %v3827_v2  ;;  %v11043_v1 = vsub.f32 %v3764_v12, %v3827_v2 }
 0x1c6   : > { %8169 = vmatprep.subr.bf16.mxu1 %v14104_v8  ;;  %7979 = vmatpush1.bf16.msra.mxu0 %v14105_v34  ;;  %14109 = vst [vmem:[#allocation52_spill] sm:$0xff] %v11027_v49  ;;  %v3772_v8 = vld [vmem:[#allocation2 + $0x4c8] sm:$0xff]  ;;  %14111 = vst [vmem:[#allocation67_spill] sm:$0xff] %v11031_v5  ;;  %v3774_v34 = vld [vmem:[#allocation2 + $0x4d8] sm:$0xff]  ;;  %v4684_v31 = vand.u32 4294901760, %v3765_v42  ;;  %v11045_v5 = vsub.f32 %v3768_v53, %v3831_v35  ;;  %v3839_v36 = vand.u32 4294901760, %v3776_v9 }
 0x1c7   : > { %7981 = vmatprep.subr.bf16.mxu0 %v14002_v47  ;;  %v11035_v47 = vpack.c.bf16 %v4680_v55, %v4676_v13  ;;  %14115 = vst [vmem:[#allocation17_spill] sm:$0xff] %v11037_v6  ;;  %14116 = vst [vmem:[#allocation19_spill] sm:$0xff] %v11041_v37  ;;  %v3835_v13 = vand.u32 4294901760, %v3772_v8  ;;  %v4690_v55 = vand.u32 4294901760, %v3774_v34  ;;  %v3775_v6 = vld [vmem:[#allocation2 + $0x4e0] sm:$0xff]  ;;  %v11054_v12 = vsub.f32 %v3770_v23, %v4686_v32  ;;  %v3773_v2 = vld [vmem:[#allocation2 + $0x4d0] sm:$0xff] }
 0x1c8   : > { %14117 = vst [vmem:[#allocation22_spill] sm:$0xff] %v11043_v1  ;;  %14118 = vst [vmem:[#allocation30_spill] sm:$0xff] %v11045_v5  ;;  %v11056_v53 = vpack.c.bf16 %v3833_v45, %v3829_v0  ;;  %v11062_v35 = vsub.f32 %v3767_v63, %v3833_v45  ;;  %v11064_v5 = vpack.c.bf16 %v4688_v30, %v4684_v31  ;;  %v3837_v1 = vand.u32 4294901760, %v3771_v38  ;;  %v3786_v63 = vld [vmem:[#allocation2 + $0x538] sm:$0xff] }
 0x1c9   : > { %8171 = vmatpush1.bf16.msra.mxu1 %v14112_v40  ;;  %2779 = vmatmul.mubr.f32.vlgmr.msra.gmra.mrb[0].mxu0 %v14113_v22  ;;  %14114 = vst [vmem:[#allocation5_spill] sm:$0xff] %v11035_v47  ;;  %v4694_v40 = vand.u32 4294901760, %v3778_v14  ;;  %14121 = vst [vmem:[#allocation28_spill] sm:$0xff] %v11054_v12  ;;  %v3777_v47 = vld [vmem:[#allocation2 + $0x4f0] sm:$0xff]  ;;  %v11068_v23 = vsub.f32 %v3765_v42, %v4684_v31  ;;  %v11077_v45 = vsub.f32 %v3776_v9, %v3839_v36  ;;  %v3783_v42 = vld [vmem:[#allocation2 + $0x520] sm:$0xff] }
 0x1ca   : > { %8173 = vmatprep.subr.bf16.mxu1 %v14004_v19  ;;  %7983 = vmatpush1.bf16.msra.mxu0 %v14005_v7  ;;  %v11050_v19 = vpack.c.bf16 %v4686_v32, %v4682_v62  ;;  %v11052_v7 = vsub.f32 %v3766_v33, %v4682_v62  ;;  %14122 = vst [vmem:[#allocation35_spill] sm:$0xff] %v11056_v53  ;;  %14124 = vst [vmem:[#allocation6_spill] sm:$0xff] %v11062_v35  ;;  %v3784_v33 = vld [vmem:[#allocation2 + $0x528] sm:$0xff]  ;;  %v3782_v32 = vld [vmem:[#allocation2 + $0x518] sm:$0xff]  ;;  %v4692_v31 = vand.u32 4294901760, %v3773_v2 }
 0x1cb   : > { %7985 = vmatprep.subr.bf16.mxu0 %v14006_v21  ;;  %2881 = vmatprep.mubr.f32.mxu0 %v13539_v43  ;;  %v11060_v21 = vsub.f32 %v3763_v59, %v3829_v0  ;;  %14125 = vst [vmem:[#allocation7_spill] sm:$0xff] %v11064_v5  ;;  %14126 = vst [vmem:[#allocation59_spill] sm:$0xff] %v11068_v23  ;;  %v11070_v62 = vsub.f32 %v3769_v41, %v4688_v30  ;;  %v3841_v59 = vand.u32 4294901760, %v3775_v6 }
 0x1cc   : > { %3634 = vmatmul.mubr.f32.vlgmr.msra.gmra.mrb[0].mxu1 %v14113_v22  ;;  %14119 = vst [vmem:[#allocation32_spill] sm:$0xff] %v11050_v19  ;;  %14120 = vst [vmem:[#allocation24_spill] sm:$0xff] %v11052_v7  ;;  %v3780_v19 = vld [vmem:[#allocation2 + $0x508] sm:$0xff]  ;;  %v11075_v0 = vpack.c.bf16 %v3839_v36, %v3835_v13  ;;  %v11079_v5 = vpack.c.bf16 %v4694_v40, %v4690_v55  ;;  %v4696_v41 = vand.u32 4294901760, %v3777_v47  ;;  %v4698_v9 = vand.u32 4294901760, %v3782_v32 }
 0x1cd   : > { %8175 = vmatpush1.bf16.msra.mxu1 %v14007_v50  ;;  %3736 = vmatprep.mubr.f32.mxu1 %v13539_v43  ;;  %14123 = vst [vmem:[#allocation42_spill] sm:$0xff] %v11060_v21  ;;  %14127 = vst [vmem:[#allocation12_spill] sm:$0xff] %v11070_v62  ;;  %v11072_v50 = vsub.f32 %v3772_v8, %v3835_v13  ;;  %v3843_v30 = vand.u32 4294901760, %v3780_v19  ;;  %v3847_v8 = vand.u32 4294901760, %v3784_v33  ;;  %v3785_v62 = vld [vmem:[#allocation2 + $0x530] sm:$0xff]  ;;  %v4702_v13 = vand.u32 4294901760, %v3786_v63 }
 0x1ce   : > { %8177 = vmatprep.subr.bf16.mxu1 %v14008_v54  ;;  %7987 = vmatpush1.bf16.msra.mxu0 %v14009_v26  ;;  %14129 = vst [vmem:[#allocation74_spill] sm:$0xff] %v11075_v0  ;;  %14130 = vst [vmem:[#allocation27_spill] sm:$0xff] %v11077_v45  ;;  %v11081_v54 = vsub.f32 %v3774_v34, %v4690_v55  ;;  %v3779_v26 = vld [vmem:[#allocation2 + $0x500] sm:$0xff]  ;;  %v11084_v23 = vsub.f32 %v3778_v14, %v4694_v40  ;;  %v3849_v14 = vand.u32 4294901760, %v3783_v42 }
 0x1cf   : > { %14128 = vst [vmem:[#allocation72_spill] sm:$0xff] %v11072_v50  ;;  %7989 = vmatprep.subr.bf16.mxu0 %v14010_v60  ;;  %14131 = vst [vmem:[#allocation90_spill] sm:$0xff] %v11079_v5  ;;  %v3781_v50 = vld [vmem:[#allocation2 + $0x510] sm:$0xff]  ;;  %v11086_v60 = vsub.f32 %v3771_v38, %v3837_v1  ;;  %v11090_v34 = vpack.c.bf16 %v3841_v59, %v3837_v1  ;;  %v11092_v36 = vsub.f32 %v3775_v6, %v3841_v59  ;;  %v3792_v5 = vld [vmem:[#allocation2 + $0x568] sm:$0xff] }
 0x1d0   : > { %14132 = vst [vmem:[#allocation33_spill] sm:$0xff] %v11081_v54  ;;  %14133 = vst [vmem:[#allocation37_spill] sm:$0xff] %v11084_v23  ;;  %v11094_v55 = vsub.f32 %v3773_v2, %v4692_v31  ;;  %v3788_v54 = vld [vmem:[#allocation2 + $0x548] sm:$0xff]  ;;  %v4700_v38 = vand.u32 4294901760, %v3781_v50  ;;  %v4704_v40 = vand.u32 4294901760, %v3785_v62  ;;  %v11097_v23 = vpack.c.bf16 %v4696_v41, %v4692_v31  ;;  %v3794_v6 = vld [vmem:[#allocation2 + $0x578] sm:$0xff] }
 0x1d1   : > { %8179 = vmatpush1.bf16.msra.mxu1 %v14011_v10  ;;  %14134 = vst [vmem:[#allocation53_spill] sm:$0xff] %v11086_v60  ;;  %14135 = vst [vmem:[#allocation43_spill] sm:$0xff] %v11090_v34  ;;  %v3845_v10 = vand.u32 4294901760, %v3779_v26  ;;  %v3790_v60 = vld [vmem:[#allocation2 + $0x558] sm:$0xff]  ;;  %v11103_v1 = vsub.f32 %v3780_v19, %v3843_v30  ;;  %v11106_v2 = vsub.f32 %v3784_v33, %v3847_v8  ;;  %v3791_v34 = vld [vmem:[#allocation2 + $0x560] sm:$0xff] }
 0x1d2   : > { %8181 = vmatprep.subr.bf16.mxu1 %v14012_v11  ;;  %7991 = vmatpush1.bf16.msra.mxu0 %v14013_v52  ;;  %14136 = vst [vmem:[#allocation64_spill] sm:$0xff] %v11092_v36  ;;  %14137 = vst [vmem:[#allocation68_spill] sm:$0xff] %v11094_v55  ;;  %v11099_v11 = vsub.f32 %v3777_v47, %v4696_v41  ;;  %v11101_v52 = vpack.c.bf16 %v3847_v8, %v3843_v30  ;;  %v3855_v55 = vand.u32 4294901760, %v3792_v5  ;;  %v3787_v36 = vld [vmem:[#allocation2 + $0x540] sm:$0xff]  ;;  %v3793_v33 = vld [vmem:[#allocation2 + $0x570] sm:$0xff] }
 0x1d3   : > { %7993 = vmatprep.subr.bf16.mxu0 %v14014_v25  ;;  %14138 = vst [vmem:[#allocation13_spill] sm:$0xff] %v11097_v23  ;;  %14140 = vst [vmem:[#allocation18_spill] sm:$0xff] %v11103_v1  ;;  %v11108_v59 = vpack.c.bf16 %v4702_v13, %v4698_v9  ;;  %v3851_v25 = vand.u32 4294901760, %v3788_v54  ;;  %v11112_v47 = vsub.f32 %v3782_v32, %v4698_v9  ;;  %v4706_v41 = vand.u32 4294901760, %v3790_v60  ;;  %v3796_v1 = vld [vmem:[#allocation2 + $0x588] sm:$0xff] }
 0x1d4   : > { %14139 = vst [vmem:[#allocation9_spill] sm:$0xff] %v11101_v52  ;;  %14141 = vst [vmem:[#allocation20_spill] sm:$0xff] %v11106_v2  ;;  %v11114_v31 = vsub.f32 %v3786_v63, %v4702_v13  ;;  %v11116_v19 = vsub.f32 %v3779_v26, %v3845_v10  ;;  %v11119_v30 = vpack.c.bf16 %v3849_v14, %v3845_v10  ;;  %v3853_v26 = vand.u32 4294901760, %v3787_v36  ;;  %v3798_v13 = vld [vmem:[#allocation2 + $0x598] sm:$0xff] }
 0x1d5   : > { %8183 = vmatpush1.bf16.msra.mxu1 %v14015_v4  ;;  %14142 = vst [vmem:[#allocation25_spill] sm:$0xff] %v11108_v59  ;;  %v3789_v4 = vld [vmem:[#allocation2 + $0x550] sm:$0xff]  ;;  %v11121_v8 = vsub.f32 %v3783_v42, %v3849_v14  ;;  %v11123_v2 = vpack.c.bf16 %v4704_v40, %v4700_v38  ;;  %v11125_v32 = vsub.f32 %v3781_v50, %v4700_v38  ;;  %v3857_v9 = vand.u32 4294901760, %v3791_v34 }
 0x1d6   : > { %8185 = vmatprep.subr.bf16.mxu1 %v14016_v56  ;;  %7995 = vmatpush1.bf16.msra.mxu0 %v14017_v44  ;;  %14143 = vst [vmem:[#allocation23_spill] sm:$0xff] %v11114_v31  ;;  %14144 = vst [vmem:[#allocation38_spill] sm:$0xff] %v11116_v19  ;;  %v4710_v56 = vand.u32 4294901760, %v3794_v6  ;;  %v3800_v44 = vld [vmem:[#allocation2 + $0x5a8] sm:$0xff]  ;;  %v11127_v63 = vsub.f32 %v3785_v62, %v4704_v40  ;;  %v3802_v19 = vld [vmem:[#allocation2 + $0x5b8] sm:$0xff]  ;;  %v11132_v10 = vsub.f32 %v3788_v54, %v3851_v25 }
 0x1d7   : > { %7997 = vmatprep.subr.bf16.mxu0 %v14018_v51  ;;  %14145 = vst [vmem:[#allocation44_spill] sm:$0xff] %v11119_v30  ;;  %14146 = vst [vmem:[#allocation45_spill] sm:$0xff] %v11121_v8  ;;  %v11130_v51 = vpack.c.bf16 %v3855_v55, %v3851_v25  ;;  %v4708_v42 = vand.u32 4294901760, %v3789_v4  ;;  %v4712_v14 = vand.u32 4294901760, %v3793_v33  ;;  %v3795_v8 = vld [vmem:[#allocation2 + $0x580] sm:$0xff]  ;;  %v11136_v62 = vsub.f32 %v3792_v5, %v3855_v55 }
 0x1d8   : > { %14147 = vst [vmem:[#allocation71_spill] sm:$0xff] %v11123_v2  ;;  %14148 = vst [vmem:[#allocation49_spill] sm:$0xff] %v11125_v32  ;;  %v3799_v31 = vld [vmem:[#allocation2 + $0x5a0] sm:$0xff]  ;;  %v11138_v50 = vsub.f32 %v3790_v60, %v4706_v41  ;;  %v3859_v38 = vand.u32 4294901760, %v3796_v1  ;;  %v3863_v40 = vand.u32 4294901760, %v3800_v44  ;;  %v11143_v54 = vsub.f32 %v3794_v6, %v4710_v56  ;;  %v3801_v32 = vld [vmem:[#allocation2 + $0x5b0] sm:$0xff] }
 0x1d9   : > { %14149 = vst [vmem:[#allocation51_spill] sm:$0xff] %v11127_v63  ;;  %8187 = vmatpush1.bf16.msra.mxu1 %v14019_v61  ;;  %14150 = vst [vmem:[#allocation8_spill] sm:$0xff] %v11130_v51  ;;  %v11141_v61 = vpack.c.bf16 %v4710_v56, %v4706_v41  ;;  %v4714_v25 = vand.u32 4294901760, %v3798_v13  ;;  %v3797_v63 = vld [vmem:[#allocation2 + $0x590] sm:$0xff]  ;;  %v3861_v5 = vand.u32 4294901760, %v3795_v8  ;;  %v3865_v60 = vand.u32 4294901760, %v3799_v31 }
 0x1da   : > { %14151 = vst [vmem:[#allocation60_spill] sm:$0xff] %v11132_v10  ;;  %8189 = vmatprep.subr.bf16.mxu1 %v14020_v48  ;;  %7999 = vmatpush1.bf16.msra.mxu0 %v14021_v29  ;;  %14152 = vst [vmem:[#allocation69_spill] sm:$0xff] %v11136_v62  ;;  %v4718_v10 = vand.u32 4294901760, %v3802_v19  ;;  %v11145_v48 = vpack.c.bf16 %v3857_v9, %v3853_v26  ;;  %v11147_v29 = vsub.f32 %v3787_v36, %v3853_v26  ;;  %v3804_v56 = vld [vmem:[#allocation2 + $0x5c8] sm:$0xff] }
 0x1db   : > { %14153 = vst [vmem:[#allocation73_spill] sm:$0xff] %v11138_v50  ;;  %8001 = vmatprep.subr.bf16.mxu0 %v14022_v15  ;;  %14154 = vst [vmem:[#allocation79_spill] sm:$0xff] %v11141_v61  ;;  %v11150_v55 = vsub.f32 %v3791_v34, %v3857_v9  ;;  %v11152_v15 = vpack.c.bf16 %v4712_v14, %v4708_v42  ;;  %v11154_v41 = vsub.f32 %v3789_v4, %v4708_v42  ;;  %v3808_v34 = vld [vmem:[#allocation2 + $0x5e8] sm:$0xff]  ;;  %v3806_v9 = vld [vmem:[#allocation2 + $0x5d8] sm:$0xff] }
 0x1dc   : > { %14155 = vst [vmem:[#allocation76_spill] sm:$0xff] %v11143_v54  ;;  %14156 = vst [vmem:[#allocation80_spill] sm:$0xff] %v11145_v48  ;;  %v11156_v6 = vsub.f32 %v3793_v33, %v4712_v14  ;;  %v7430_v54 = vld [vmem:[%s9451_s6 + $0x8] sm:$0xf]  ;;  %v11161_v36 = vpack.c.bf16 %v3863_v40, %v3859_v38  ;;  %v11163_v26 = vsub.f32 %v3796_v1, %v3859_v38 }
 0x1dd   : > { %14157 = vst [vmem:[#allocation58_spill] sm:$0xff] %v11147_v29  ;;  %8191 = vmatpush1.bf16.msra.mxu1 %v14023_v27  ;;  %14158 = vst [vmem:[#allocation70_spill] sm:$0xff] %v11150_v55  ;;  %v4716_v29 = vand.u32 4294901760, %v3797_v63  ;;  %v4720_v27 = vand.u32 4294901760, %v3801_v32  ;;  %v3810_v55 = vld [vmem:[#allocation2 + $0x5f8] sm:$0xff]  ;;  %v11166_v4 = vsub.f32 %v3800_v44, %v3863_v40  ;;  %v11168_v33 = vpack.c.bf16 %v4718_v10, %v4714_v25 }
 0x1de   : > { %14159 = vst [vmem:[#allocation15_spill] sm:$0xff] %v11152_v15  ;;  %14160 = vst [vmem:[#allocation16_spill] sm:$0xff] %v11154_v41  ;;  %8193 = vmatprep.subr.bf16.mxu1 %v14024_v46  ;;  %8003 = vmatpush1.bf16.msra.mxu0 %v14025_v28  ;;  %v11170_v42 = vsub.f32 %v3798_v13, %v4714_v25  ;;  %v11172_v46 = vsub.f32 %v3802_v19, %v4718_v10  ;;  %v11180_v38 = vand.u32 4294901760, %v7430_v54  ;;  %v14172_v13 = vld [vmem:[#allocation82_spill] sm:$0xff] }
 0x1df   : > { %14161 = vst [vmem:[#allocation11_spill] sm:$0xff] %v11156_v6  ;;  %14162 = vst [vmem:[#allocation14_spill] sm:$0xff] %v11161_v36  ;;  %8005 = vmatprep.subr.bf16.mxu0 %v14026_v17  ;;  %v11174_v28 = vpack.c.bf16 %v3865_v60, %v3861_v5  ;;  %v11176_v14 = vsub.f32 %v3795_v8, %v3861_v5  ;;  %v11178_v1 = vsub.f32 %v3799_v31, %v3865_v60  ;;  %v3807_v31 = vld [vmem:[#allocation2 + $0x5e0] sm:$0xff]  ;;  %v11195_v60 = vld [vmem:[#allocation2 + $0x5d0] sm:$0xff] }
 0x1e0   : > { %14163 = vst [vmem:[#allocation21_spill] sm:$0xff] %v11163_v26  ;;  %14164 = vst [vmem:[#allocation46_spill] sm:$0xff] %v11166_v4  ;;  %v3867_v6 = vand.u32 4294901760, %v3804_v56  ;;  %v3871_v17 = vand.u32 4294901760, %v3808_v34  ;;  %v4722_v44 = vand.u32 4294901760, %v3806_v9  ;;  %v4726_v40 = vand.u32 4294901760, %v3810_v55 }
 0x1e1   : > { %14165 = vst [vmem:[#allocation63_spill] sm:$0xff] %v11168_v33  ;;  %14166 = vst [vmem:[#allocation66_spill] sm:$0xff] %v11170_v42  ;;  %8195 = vmatpush1.bf16.msra.mxu1 %v14027_v39  ;;  %v3803_v4 = vld [vmem:[#allocation2 + $0x5c0] sm:$0xff]  ;;  %v11185_v19 = vpack.c.bf16 %v4720_v27, %v4716_v29  ;;  %v11187_v10 = vsub.f32 %v3797_v63, %v4716_v29  ;;  %v11189_v8 = vsub.f32 %v3801_v32, %v4720_v27  ;;  %v14179_v32 = vld [vmem:[#allocation84_spill] sm:$0xff] }
 0x1e2   : > { %14167 = vst [vmem:[#allocation92_spill] sm:$0xff] %v11172_v46  ;;  %14168 = vst [vmem:[#allocation10_spill] sm:$0xff] %v11174_v28  ;;  %8197 = vmatprep.subr.bf16.mxu1 %v14028_v16  ;;  %8007 = vmatpush1.bf16.msra.mxu0 %v14172_v13  ;;  %v14176_v5 = vld [vmem:[#allocation89_spill] sm:$0xff]  ;;  %v11193_v39 = vsub.f32 %v3804_v56, %v3867_v6  ;;  %v11201_v63 = vsub.f32 %v7430_v54, %v11180_v38  ;;  %v14180_v27 = vld [vmem:[#allocation87_spill] sm:$0xff]  ;;  %v4724_v25 = vand.u32 4294901760, %v11195_v60 }
 0x1e3   : > { %14169 = vst [vmem:[#allocation93_spill] sm:$0xff] %v11176_v14  ;;  %14170 = vst [vmem:[#allocation94_spill] sm:$0xff] %v11178_v1  ;;  %8009 = vmatprep.subr.bf16.mxu0 %v14176_v5  ;;  %v3869_v14 = vand.u32 4294901760, %v3803_v4  ;;  %v11206_v56 = vpack.c.bf16 %v3871_v17, %v3867_v6  ;;  %v11208_v5 = vsub.f32 %v3808_v34, %v3871_v17  ;;  %v3873_v1 = vand.u32 4294901760, %v3807_v31  ;;  %v14185_v16 = vld [vmem:[#allocation91_spill] sm:$0xff]  ;;  %v14186_v13 = vld [vmem:[#allocation54_spill] sm:$0xff] }
 0x1e4   : > { %14171 = vst [vmem:[#allocation95_spill] sm:$0xff] %v11180_v38  ;;  %14173 = vst [vmem:[#allocation97_spill] sm:$0xff] %v11185_v19  ;;  %v11216_v54 = vsub.f32 %v3810_v55, %v4726_v40  ;;  %v3809_v29 = vld [vmem:[#allocation2 + $0x5f0] sm:$0xff]  ;;  %v14190_v34 = vld [vmem:[#allocation61_spill] sm:$0xff]  ;;  %v14191_v17 = vand.u32 4294901760, %v10985_v24  ;;  %v14193_v55 = vand.u32 4294901760, %v10994_v3 }
 0x1e5   : > { %14174 = vst [vmem:[#allocation96_spill] sm:$0xff] %v11187_v10  ;;  %14175 = vst [vmem:[#allocation98_spill] sm:$0xff] %v11189_v8  ;;  %v14181_v8 = vld [vmem:[#allocation85_spill] sm:$0xff]  ;;  %v11210_v10 = vpack.c.bf16 %v4726_v40, %v4722_v44  ;;  %v4728_v40 = vand.u32 4294901760, %v3809_v29  ;;  %v14206_v42 = vld [vmem:[#allocation62_spill] sm:$0xff] }
 0x1e6   : > { %14177 = vst [vmem:[#allocation99_spill] sm:$0xff] %v11193_v39  ;;  %14178 = vst [vmem:[#allocation50_spill] sm:$0xff] %v11201_v63  ;;  %8199 = vmatpush1.bf16.msra.mxu1 %v14181_v8  ;;  %8011 = vmatpush1.bf16.msra.mxu0 %v14186_v13  ;;  %v11214_v39 = vsub.f32 %v3806_v9, %v4722_v44  ;;  %v14189_v8 = vand.u32 4294901760, %v10983_v18  ;;  %v3934_v38 = vsub.f32 %v10985_v24, %v14191_v17  ;;  %v14197_v24 = vld [vmem:[#allocation31_spill] sm:$0xff]  ;;  %v14202_v46 = vld [vmem:[#allocation77_spill] sm:$0xff] }
 0x1e7   : > { %14182 = vst [vmem:[#allocation100_spill] sm:$0xff] %v11206_v56  ;;  %14183 = vst [vmem:[#allocation47_spill] sm:$0xff] %v11208_v5  ;;  %8201 = vmatprep.subr.bf16.mxu1 %v14185_v16  ;;  %8205 = vmatprep.subr.bf16.mxu0 %v14190_v34  ;;  %v14192_v16 = vand.u32 4294901760, %v10990_v20  ;;  %v4789_v44 = vsub.f32 %v10994_v3, %v14193_v55  ;;  %v11234_v13 = vand.u32 4294901760, %v11201_v63  ;;  %v14200_v3 = vld [vmem:[#allocation36_spill] sm:$0xff]  ;;  %v14207_v26 = vld [vmem:[#allocation34_spill] sm:$0xff] }
 0x1e8   : > { %14184 = vst [vmem:[#allocation55_spill] sm:$0xff] %v11210_v10  ;;  %14187 = vst [vmem:[#allocation48_spill] sm:$0xff] %v11214_v39  ;;  %v3922_v6 = vsub.f32 %v10983_v18, %v14189_v8  ;;  %v14195_v8 = vand.u32 4294901760, %v14179_v32  ;;  %v14196_v18 = vand.u32 4294901760, %v14180_v27  ;;  %v11245_v55 = vpack.c.bf16 %v3873_v1, %v3869_v14  ;;  %v14201_v39 = vld [vmem:[#allocation39_spill] sm:$0xff] }
 0x1e9   : > { %14188 = vst [vmem:[#allocation86_spill] sm:$0xff] %v11216_v54  ;;  %v4777_v9 = vsub.f32 %v10990_v20, %v14192_v16  ;;  %14194 = vst [vmem:[#allocation82_spill] sm:$0xff] %v11234_v13  ;;  %v14198_v16 = vld [vmem:[#allocation57_spill] sm:$0xff]  ;;  %2883 = vmatmul.mubr.f32.vlgmr.msra.gmra.mrb[0].mxu0 %v14113_v22  ;;  %v3935_v41 = vand.u32 4294901760, %v3934_v38  ;;  %v4790_v20 = vand.u32 4294901760, %v4789_v44  ;;  %v14208_v5 = vand.u32 4294901760, %v11005_v58 }
 0x1ea   : > { %v3928_v34 = vsub.f32 %v14179_v32, %v14195_v8  ;;  %v3940_v17 = vsub.f32 %v14180_v27, %v14196_v18  ;;  %8203 = vmatpush1.bf16.msra.mxu1 %v14198_v16  ;;  %14199 = vst [vmem:[#allocation89_spill] sm:$0xff] %v11245_v55  ;;  %v14203_v8 = vld [vmem:[#allocation83_spill] sm:$0xff]  ;;  %v11251_v32 = vsub.f32 %v3803_v4, %v3869_v14  ;;  %v3923_v18 = vand.u32 4294901760, %v3922_v6  ;;  %v14205_v27 = vld [vmem:[#allocation56_spill] sm:$0xff] }
 0x1eb   : > { %8397 = vmatprep.subr.bf16.mxu1 %v14202_v46  ;;  %8207 = vmatpush1.bf16.msra.mxu0 %v14203_v8  ;;  %v4778_v50 = vand.u32 4294901760, %v4777_v9  ;;  %v11260_v46 = vsub.f32 %v11005_v58, %v14208_v5  ;;  %v3911_v4 = vsub.f32 %v11201_v63, %v11234_v13  ;;  %v14209_v16 = vand.u32 4294901760, %v14197_v24  ;;  %v14210_v38 = vld [vmem:[#allocation88_spill] sm:$0xff] }
 0x1ec   : > { %14204 = vst [vmem:[#allocation85_spill] sm:$0xff] %v11251_v32  ;;  %8209 = vmatprep.subr.bf16.mxu0 %v14207_v26  ;;  %3907 = vmatprep.mubr.f32.mxu0 %v13539_v43  ;;  %v3929_v14 = vand.u32 4294901760, %v3928_v34  ;;  %v3941_v6 = vand.u32 4294901760, %v3940_v17  ;;  %v11271_v9 = vsub.f32 %v3807_v31, %v3873_v1  ;;  %v14211_v5 = vand.u32 4294901760, %v14200_v3 }
 0x1ed   : > { %3738 = vmatmul.mubr.f32.vlgmr.msra.gmra.mrb[0].mxu1 %v14113_v22  ;;  %v11268_v54 = vsub.f32 %v14197_v24, %v14209_v16  ;;  %v14212_v44 = vand.u32 4294901760, %v14201_v39  ;;  %v14213_v16 = vld [vmem:[#allocation40_spill] sm:$0xff]  ;;  %v11288_v1 = vsub.f32 %v11195_v60, %v4724_v25  ;;  %v14214_v31 = vand.u32 4294901760, %v14205_v27  ;;  %v14235_v24 = vld [vmem:[#allocation37_spill] sm:$0xff] }
 0x1ee   : > { %8399 = vmatpush1.bf16.msra.mxu1 %v14210_v38  ;;  %4762 = vmatprep.mubr.f32.mxu1 %v13539_v43  ;;  %v11277_v22 = vsub.f32 %v14200_v3, %v14211_v5  ;;  %v14215_v5 = vand.u32 4294901760, %v14206_v42  ;;  %v11302_v17 = vpack.c.bf16 %v4728_v40, %v4724_v25  ;;  %v11306_v60 = vpack.c.bf16 %v3935_v41, %v3923_v18  ;;  %v14223_v25 = vld [vmem:[#allocation17_spill] sm:$0xff]  ;;  %v14232_v18 = vld [vmem:[#allocation43_spill] sm:$0xff] }
 0x1ef   : > { %v11282_v34 = vsub.f32 %v14201_v39, %v14212_v44  ;;  %8401 = vmatprep.subr.bf16.mxu1 %v14213_v16  ;;  %8211 = vmatpush1.bf16.msra.mxu0 %v11025_v57  ;;  %v11293_v13 = vsub.f32 %v14205_v27, %v14214_v31  ;;  %v14216_v44 = vld [vmem:[#allocation65_spill] sm:$0xff]  ;;  %v11304_v57 = vsub.f32 %v3809_v29, %v4728_v40  ;;  %v11311_v31 = vand.u32 4294901760, %v3911_v4  ;;  %v14220_v40 = vld [vmem:[#allocation67_spill] sm:$0xff]  ;;  %v14225_v16 = vld [vmem:[#allocation30_spill] sm:$0xff] }
 0x1f0   : > { %v11298_v38 = vsub.f32 %v14206_v42, %v14215_v5  ;;  %8213 = vmatprep.subr.bf16.mxu0 %v11041_v37  ;;  %14217 = vst [vmem:[#allocation91_spill] sm:$0xff] %v11302_v17  ;;  %v11309_v8 = vpack.c.bf16 %v4790_v20, %v4778_v50  ;;  %v11313_v63 = vpack.c.bf16 %v3941_v6, %v3929_v14  ;;  %v14218_v42 = vld [vmem:[#allocation5_spill] sm:$0xff]  ;;  %v14219_v29 = vand.u32 4294901760, %v11027_v49  ;;  %v14221_v50 = vld [vmem:[#allocation32_spill] sm:$0xff]  ;;  %v14231_v27 = vld [vmem:[#allocation90_spill] sm:$0xff] }
 0x1f1   : > { %v14222_v14 = vand.u32 4294901760, %v14216_v44  ;;  %v14229_v5 = vand.u32 4294901760, %v14220_v40  ;;  %v14240_v58 = vand.u32 4294901760, %v11060_v21 }
 0x1f2   : > { %8403 = vmatpush1.bf16.msra.mxu1 %v14218_v42  ;;  %v11322_v41 = vsub.f32 %v11027_v49, %v14219_v29  ;;  %v14224_v29 = vld [vmem:[#allocation22_spill] sm:$0xff]  ;;  %v14226_v42 = vld [vmem:[#allocation59_spill] sm:$0xff] }
 0x1f3   : > { %8405 = vmatprep.subr.bf16.mxu1 %v14221_v50  ;;  %8215 = vmatpush1.bf16.msra.mxu0 %v11056_v53  ;;  %v11332_v6 = vsub.f32 %v14216_v44, %v14222_v14  ;;  %v14227_v14 = vld [vmem:[#allocation12_spill] sm:$0xff]  ;;  %v14228_v49 = vld [vmem:[#allocation7_spill] sm:$0xff]  ;;  %v4807_v20 = vsub.f32 %v14220_v40, %v14229_v5  ;;  %v14233_v44 = vand.u32 4294901760, %v14223_v25  ;;  %v14236_v5 = vand.u32 4294901760, %v14224_v29 }
 0x1f4   : > { %8217 = vmatprep.subr.bf16.mxu0 %v11075_v0  ;;  %v3953_v26 = vand.u32 4294901760, %v11322_v41  ;;  %v14230_v0 = vld [vmem:[#allocation72_spill] sm:$0xff]  ;;  %v14237_v50 = vand.u32 4294901760, %v14225_v16  ;;  %v14242_v40 = vand.u32 4294901760, %v14226_v42 }
 0x1f5   : > { %v3965_v37 = vand.u32 4294901760, %v11332_v6  ;;  %v4819_v4 = vsub.f32 %v14223_v25, %v14233_v44  ;;  %v3970_v53 = vsub.f32 %v14224_v29, %v14236_v5  ;;  %v14238_v6 = vand.u32 4294901760, %v11052_v7 }
 0x1f6   : > { %8407 = vmatpush1.bf16.msra.mxu1 %v14228_v49  ;;  %v14234_v49 = vld [vmem:[#allocation33_spill] sm:$0xff]  ;;  %v14239_v44 = vand.u32 4294901760, %v11054_v12  ;;  %v14241_v25 = vand.u32 4294901760, %v11062_v35 }
 0x1f7   : > { %8409 = vmatprep.subr.bf16.mxu1 %v14231_v27  ;;  %8219 = vmatpush1.bf16.msra.mxu0 %v14232_v18  ;;  %v3982_v18 = vsub.f32 %v14225_v16, %v14237_v50  ;;  %v4825_v27 = vsub.f32 %v11052_v7, %v14238_v6  ;;  %v4831_v50 = vsub.f32 %v14226_v42, %v14242_v40  ;;  %v14243_v16 = vand.u32 4294901760, %v14227_v14 }
 0x1f8   : > { %8221 = vmatprep.subr.bf16.mxu0 %v11101_v52  ;;  %v4837_v41 = vsub.f32 %v11054_v12, %v14239_v44  ;;  %v3976_v52 = vsub.f32 %v11060_v21, %v14240_v58  ;;  %v3988_v5 = vsub.f32 %v11062_v35, %v14241_v25  ;;  %v4808_v7 = vand.u32 4294901760, %v4807_v20  ;;  %v14246_v25 = vld [vmem:[#allocation53_spill] sm:$0xff] }
 0x1f9   : > { %v4843_v6 = vsub.f32 %v14227_v14, %v14243_v16  ;;  %v14244_v44 = vand.u32 4294901760, %v14230_v0  ;;  %v14245_v58 = vand.u32 4294901760, %v11077_v45  ;;  %v4820_v40 = vand.u32 4294901760, %v4819_v4 }
 0x1fa   : > { %8411 = vmatpush1.bf16.msra.mxu1 %v11097_v23  ;;  %v14247_v16 = vand.u32 4294901760, %v14234_v49  ;;  %v14248_v20 = vand.u32 4294901760, %v14235_v24  ;;  %v4826_v35 = vand.u32 4294901760, %v4825_v27  ;;  %v3989_v29 = vand.u32 4294901760, %v3988_v5 }
 0x1fb   : > { %v3994_v12 = vsub.f32 %v14230_v0, %v14244_v44  ;;  %v4006_v21 = vsub.f32 %v11077_v45, %v14245_v58  ;;  %8413 = vmatprep.subr.bf16.mxu1 %v11108_v59  ;;  %8223 = vmatpush1.bf16.msra.mxu0 %v11119_v30  ;;  %v14249_v44 = vld [vmem:[#allocation64_spill] sm:$0xff]  ;;  %v3971_v58 = vand.u32 4294901760, %v3970_v53  ;;  %v3983_v45 = vand.u32 4294901760, %v3982_v18 }
 0x1fc   : > { %v4849_v23 = vsub.f32 %v14234_v49, %v14247_v16  ;;  %v4861_v14 = vsub.f32 %v14235_v24, %v14248_v20  ;;  %8225 = vmatprep.subr.bf16.mxu0 %v11130_v51  ;;  %v4838_v0 = vand.u32 4294901760, %v4837_v41  ;;  %v3977_v59 = vand.u32 4294901760, %v3976_v52  ;;  %v14251_v24 = vld [vmem:[#allocation68_spill] sm:$0xff] }
 0x1fd   : > { %v4832_v30 = vand.u32 4294901760, %v4831_v50  ;;  %v4844_v4 = vand.u32 4294901760, %v4843_v6  ;;  %v3995_v39 = vand.u32 4294901760, %v3994_v12  ;;  %v4007_v16 = vand.u32 4294901760, %v4006_v21 }
 0x1fe   : > { %8415 = vmatpush1.bf16.msra.mxu1 %v11123_v2  ;;  %v14250_v49 = vand.u32 4294901760, %v14246_v25  ;;  %v13223_v42 = vand.u32 4294901760, %v14251_v24  ;;  %v14252_v53 = vand.u32 4294901760, %v11260_v46  ;;  %v14253_v52 = vand.u32 4294901760, %v11268_v54 }
 0x1ff   : > { %8417 = vmatprep.subr.bf16.mxu1 %v11141_v61  ;;  %8227 = vmatpush1.bf16.msra.mxu0 %v11145_v48  ;;  %v4850_v18 = vand.u32 4294901760, %v4849_v23  ;;  %v4862_v41 = vand.u32 4294901760, %v4861_v14  ;;  %v14254_v12 = vand.u32 4294901760, %v14249_v44  ;;  %v14256_v5 = vand.u32 4294901760, %v11282_v34 }
 0x200   : > { %v4000_v20 = vsub.f32 %v14246_v25, %v14250_v49  ;;  %v11413_v27 = vpack.c.bf16 %v14253_v52, %v14252_v53  ;;  %8229 = vmatprep.subr.bf16.mxu0 %v11161_v36  ;;  %v14255_v49 = vand.u32 4294901760, %v11277_v22  ;;  %v14257_v6 = vand.u32 4294901760, %v11293_v13 }
 0x201   : > { %v4012_v21 = vsub.f32 %v14249_v44, %v14254_v12  ;;  %v14258_v46 = vand.u32 4294901760, %v11298_v38  ;;  %v11429_v53 = vpack.c.bf16 %v3965_v37, %v3953_v26  ;;  %v13222_v23 = vand.u32 4294901760, %v11099_v11 }
 0x202   : > { %v8240_v50 = vpack.c.bf16 %v14256_v5, %v14255_v49  ;;  %v11432_v14 = vpack.c.bf16 %v4820_v40, %v4808_v7  ;;  %v11434_v52 = vpack.c.bf16 %v3983_v45, %v3971_v58  ;;  %v11436_v12 = vpack.c.bf16 %v4838_v0, %v4826_v35  ;;  %8419 = vmatpush1.bf16.msra.mxu1 %v11152_v15  ;;  %v14259_v0 = vld [vmem:[#allocation18_spill] sm:$0xff]  ;;  %v14268_v40 = vld [vmem:[#allocation76_spill] sm:$0xff] }
 0x203   : > { %v11427_v54 = vpack.c.bf16 %v14258_v46, %v14257_v6  ;;  %v11438_v22 = vpack.c.bf16 %v3989_v29, %v3977_v59  ;;  %v11441_v34 = vpack.c.bf16 %v4844_v4, %v4832_v30  ;;  %v11443_v13 = vpack.c.bf16 %v4007_v16, %v3995_v39  ;;  %8421 = vmatprep.subr.bf16.mxu1 %v11168_v33  ;;  %v14260_v59 = vld [vmem:[#allocation20_spill] sm:$0xff]  ;;  %v14261_v29 = vld [vmem:[#allocation23_spill] sm:$0xff]  ;;  %v14262_v58 = vld [vmem:[#allocation38_spill] sm:$0xff] }
 0x204   : > { %v4001_v38 = vand.u32 4294901760, %v4000_v20  ;;  %v4855_v37 = vsub.f32 %v14251_v24, %v13223_v42  ;;  %8231 = vmatpush1.bf16.msra.mxu0 %v11174_v28  ;;  %v11450_v7 = vpack.c.bf16 %v4862_v41, %v4850_v18  ;;  %v4013_v35 = vand.u32 4294901760, %v4012_v21  ;;  %v14263_v16 = vld [vmem:[#allocation45_spill] sm:$0xff]  ;;  %v14265_v6 = vld [vmem:[#allocation51_spill] sm:$0xff]  ;;  %v14282_v33 = vld [vmem:[#allocation70_spill] sm:$0xff] }
 0x205   : > { %v13226_v45 = vand.u32 4294901760, %v14259_v0  ;;  %8233 = vmatprep.subr.bf16.mxu0 %v11206_v56  ;;  %v4867_v30 = vsub.f32 %v11099_v11, %v13222_v23  ;;  %v14264_v18 = vld [vmem:[#allocation49_spill] sm:$0xff]  ;;  %v13225_v21 = vand.u32 4294901760, %v11288_v1  ;;  %v13224_v49 = vand.u32 4294901760, %v11304_v57  ;;  %v14266_v23 = vld [vmem:[#allocation60_spill] sm:$0xff] }
 0x206   : > { %8423 = vmatpush1.bf16.msra.mxu1 %v11185_v19  ;;  %v4856_v5 = vand.u32 4294901760, %v4855_v37  ;;  %v11471_v20 = vpack.c.bf16 %v4013_v35, %v4001_v38  ;;  %v14267_v41 = vld [vmem:[#allocation73_spill] sm:$0xff]  ;;  %v14270_v42 = vand.u32 4294901760, %v14260_v59  ;;  %v14271_v35 = vand.u32 4294901760, %v11112_v47  ;;  %v14279_v19 = vld [vmem:[#allocation58_spill] sm:$0xff]  ;;  %v14283_v15 = vld [vmem:[#allocation16_spill] sm:$0xff] }
 0x207   : > { %8425 = vmatprep.subr.bf16.mxu1 %v11210_v10  ;;  %v11479_v37 = vpack.c.bf16 %v13224_v49, %v13225_v21  ;;  %v4018_v39 = vsub.f32 %v14259_v0, %v13226_v45  ;;  %v14272_v4 = vand.u32 4294901760, %v14261_v29  ;;  %v4868_v49 = vand.u32 4294901760, %v4867_v30 }
 0x208   : > { %8235 = vmatpush1.bf16.msra.mxu0 %v11245_v55  ;;  %v4030_v38 = vsub.f32 %v14260_v59, %v14270_v42  ;;  %v4873_v26 = vsub.f32 %v11112_v47, %v14271_v35  ;;  %v14273_v21 = vand.u32 4294901760, %v14262_v58  ;;  %v14275_v55 = vand.u32 4294901760, %v14264_v18 }
 0x209   : > { %14269 = vst [vmem:[#allocation54_spill] sm:$0xff] %v11479_v37  ;;  %8237 = vmatprep.subr.bf16.mxu0 %v11306_v60  ;;  %v4885_v46 = vsub.f32 %v14261_v29, %v14272_v4  ;;  %v14274_v37 = vand.u32 4294901760, %v14263_v16  ;;  %v14276_v35 = vand.u32 4294901760, %v14265_v6  ;;  %v14277_v4 = vand.u32 4294901760, %v14266_v23 }
 0x20a   : > { %v4024_v60 = vsub.f32 %v14262_v58, %v14273_v21  ;;  %v4879_v42 = vsub.f32 %v14264_v18, %v14275_v55  ;;  %8427 = vmatpush1.bf16.msra.mxu1 %v11302_v17  ;;  %v14278_v10 = vand.u32 4294901760, %v11136_v62  ;;  %v14280_v55 = vand.u32 4294901760, %v14267_v41 }
 0x20b   : > { %v4036_v45 = vsub.f32 %v14263_v16, %v14274_v37  ;;  %3913 = vmatmul.mubr.f32.vlgmr.msra.gmra.mrb[0].mxu0 %v11311_v31  ;;  %v4891_v30 = vsub.f32 %v14265_v6, %v14276_v35  ;;  %v4042_v21 = vsub.f32 %v14266_v23, %v14277_v4  ;;  %8429 = vmatprep.subr.bf16.mxu1 %v11309_v8  ;;  %v14281_v35 = vand.u32 4294901760, %v14268_v40 }
 0x20c   : > { %v4054_v37 = vsub.f32 %v11136_v62, %v14278_v10  ;;  %8239 = vmatpush1.bf16.msra.mxu0 %v11313_v63  ;;  %v4897_v17 = vsub.f32 %v14267_v41, %v14280_v55  ;;  %v13253_v36 = vand.u32 4294901760, %v14283_v15  ;;  %v4019_v10 = vand.u32 4294901760, %v4018_v39  ;;  %4143 = vmatprep.mubr.f32.mxu0 %v13539_v43 }
 0x20d   : > { %v4909_v28 = vsub.f32 %v14268_v40, %v14281_v35  ;;  %8241 = vmatprep.subr.bf16.mxu0 %v8240_v50  ;;  %v4031_v48 = vand.u32 4294901760, %v4030_v38  ;;  %v4874_v56 = vand.u32 4294901760, %v4873_v26  ;;  %v4886_v61 = vand.u32 4294901760, %v4885_v46  ;;  %4768 = vmatmul.mubr.f32.vlgmr.msra.gmra.mrb[0].mxu1 %v11311_v31  ;;  %v14286_v38 = vld [vmem:[#allocation21_spill] sm:$0xff] }
 0x20e   : > { %v11527_v63 = vpack.c.bf16 %v4868_v49, %v4856_v5  ;;  %v4025_v8 = vand.u32 4294901760, %v4024_v60  ;;  %v4037_v55 = vand.u32 4294901760, %v4036_v45  ;;  %v4880_v2 = vand.u32 4294901760, %v4879_v42  ;;  %8431 = vmatpush1.bf16.msra.mxu1 %v11413_v27  ;;  %4998 = vmatprep.mubr.f32.mxu1 %v13539_v43 }
 0x20f   : > { %v4892_v35 = vand.u32 4294901760, %v4891_v30  ;;  %v4043_v4 = vand.u32 4294901760, %v4042_v21  ;;  %v4055_v51 = vand.u32 4294901760, %v4054_v37  ;;  %v14284_v50 = vand.u32 4294901760, %v14279_v19  ;;  %8433 = vmatprep.subr.bf16.mxu1 %v11427_v54  ;;  %v14287_v54 = vld [vmem:[#allocation46_spill] sm:$0xff]  ;;  %v14290_v37 = vld [vmem:[#allocation92_spill] sm:$0xff] }
 0x210   : > { %8243 = vmatpush1.bf16.msra.mxu0 %v11429_v53  ;;  %v4898_v31 = vand.u32 4294901760, %v4897_v17  ;;  %v4910_v26 = vand.u32 4294901760, %v4909_v28  ;;  %v14285_v45 = vand.u32 4294901760, %v14282_v33  ;;  %v11542_v27 = vsub.f32 %v14283_v15, %v13253_v36  ;;  %v14288_v17 = vld [vmem:[#allocation11_spill] sm:$0xff]  ;;  %v14289_v30 = vld [vmem:[#allocation66_spill] sm:$0xff]  ;;  %v14291_v15 = vld [vmem:[#allocation93_spill] sm:$0xff] }
 0x211   : > { %v4048_v39 = vsub.f32 %v14279_v19, %v14284_v50  ;;  %8245 = vmatprep.subr.bf16.mxu0 %v11434_v52  ;;  %v8252_v5 = vpack.c.bf16 %v4031_v48, %v4019_v10  ;;  %v8444_v46 = vpack.c.bf16 %v4886_v61, %v4874_v56  ;;  %v13260_v60 = vand.u32 4294901760, %v14286_v38  ;;  %v14292_v52 = vld [vmem:[#allocation94_spill] sm:$0xff] }
 0x212   : > { %v4060_v49 = vsub.f32 %v14282_v33, %v14285_v45  ;;  %v13257_v42 = vand.u32 4294901760, %v14287_v54  ;;  %v8254_v53 = vpack.c.bf16 %v4037_v55, %v4025_v8  ;;  %v13256_v28 = vand.u32 4294901760, %v14288_v17  ;;  %8435 = vmatpush1.bf16.msra.mxu1 %v11432_v14  ;;  %v14293_v14 = vld [vmem:[#allocation99_spill] sm:$0xff] }
 0x213   : > { %v13258_v21 = vand.u32 4294901760, %v14289_v30  ;;  %v13259_v50 = vand.u32 4294901760, %v14290_v37  ;;  %v8446_v45 = vpack.c.bf16 %v4892_v35, %v4880_v2  ;;  %v8256_v36 = vpack.c.bf16 %v4055_v51, %v4043_v4  ;;  %8437 = vmatprep.subr.bf16.mxu1 %v11436_v12  ;;  %v14294_v12 = vld [vmem:[#allocation47_spill] sm:$0xff] }
 0x214   : > { %v13261_v33 = vand.u32 4294901760, %v14291_v15  ;;  %v13262_v48 = vand.u32 4294901760, %v14292_v52  ;;  %8247 = vmatpush1.bf16.msra.mxu0 %v11438_v22  ;;  %v8448_v61 = vpack.c.bf16 %v4910_v26, %v4898_v31  ;;  %v4049_v56 = vand.u32 4294901760, %v4048_v39  ;;  %v14295_v39 = vld [vmem:[#allocation96_spill] sm:$0xff] }
 0x215   : > { %v4061_v10 = vand.u32 4294901760, %v4060_v49  ;;  %v4904_v8 = vand.u32 4294901760, %v11542_v27  ;;  %8249 = vmatprep.subr.bf16.mxu0 %v11443_v13  ;;  %v4066_v2 = vsub.f32 %v14286_v38, %v13260_v60  ;;  %v4078_v51 = vsub.f32 %v14287_v54, %v13257_v42  ;;  %v14296_v27 = vld [vmem:[#allocation98_spill] sm:$0xff]  ;;  %v14297_v42 = vld [vmem:[#allocation48_spill] sm:$0xff] }
 0x216   : > { %v4915_v22 = vsub.f32 %v14288_v17, %v13256_v28  ;;  %v4921_v13 = vsub.f32 %v14289_v30, %v13258_v21  ;;  %v4933_v35 = vsub.f32 %v14290_v37, %v13259_v50  ;;  %8439 = vmatpush1.bf16.msra.mxu1 %v11441_v34  ;;  %v4072_v26 = vsub.f32 %v14291_v15, %v13261_v33  ;;  %v14298_v60 = vld [vmem:[#allocation86_spill] sm:$0xff] }
 0x217   : > { %v4084_v49 = vsub.f32 %v14292_v52, %v13262_v48  ;;  %8441 = vmatprep.subr.bf16.mxu1 %v11450_v7  ;;  %v8258_v50 = vpack.c.bf16 %v4061_v10, %v4049_v56  ;;  %v4067_v33 = vand.u32 4294901760, %v4066_v2  ;;  %v4079_v4 = vand.u32 4294901760, %v4078_v51 }
 0x218   : > { %8251 = vmatpush1.bf16.msra.mxu0 %v11471_v20  ;;  %v14299_v48 = vand.u32 4294901760, %v14293_v14  ;;  %v14300_v21 = vand.u32 4294901760, %v14294_v12  ;;  %v4916_v52 = vand.u32 4294901760, %v4915_v22  ;;  %v4922_v20 = vand.u32 4294901760, %v4921_v13 }
 0x219   : > { %8253 = vmatprep.subr.bf16.mxu0 %v8252_v5  ;;  %v4934_v56 = vand.u32 4294901760, %v4933_v35  ;;  %v14301_v10 = vand.u32 4294901760, %v14295_v39  ;;  %v4073_v5 = vand.u32 4294901760, %v4072_v26  ;;  %v4085_v2 = vand.u32 4294901760, %v4084_v49 }
 0x21a   : > { %v4090_v28 = vsub.f32 %v14293_v14, %v14299_v48  ;;  %v4102_v7 = vsub.f32 %v14294_v12, %v14300_v21  ;;  %8443 = vmatpush1.bf16.msra.mxu1 %v11527_v63  ;;  %v14302_v51 = vand.u32 4294901760, %v14296_v27  ;;  %v14303_v48 = vand.u32 4294901760, %v14297_v42 }
 0x21b   : > { %v4927_v34 = vsub.f32 %v14295_v39, %v14301_v10  ;;  %8445 = vmatprep.subr.bf16.mxu1 %v8444_v46  ;;  %v14304_v21 = vand.u32 4294901760, %v14298_v60  ;;  %v14305_v13 = vand.u32 4294901760, %v11251_v32  ;;  %v14306_v35 = vand.u32 4294901760, %v11271_v9 }
 0x21c   : > { %v4939_v55 = vsub.f32 %v14296_v27, %v14302_v51  ;;  %v4945_v31 = vsub.f32 %v14297_v42, %v14303_v48  ;;  %8255 = vmatpush1.bf16.msra.mxu0 %v8254_v53  ;;  %v8260_v49 = vpack.c.bf16 %v4079_v4, %v4067_v33  ;;  %v4091_v10 = vand.u32 4294901760, %v4090_v28 }
 0x21d   : > { %v4957_v22 = vsub.f32 %v14298_v60, %v14304_v21  ;;  %v4096_v63 = vsub.f32 %v11251_v32, %v14305_v13  ;;  %v4108_v26 = vsub.f32 %v11271_v9, %v14306_v35  ;;  %8257 = vmatprep.subr.bf16.mxu0 %v8256_v36  ;;  %v4103_v51 = vand.u32 4294901760, %v4102_v7  ;;  %v14317_v35 = vld [vmem:[#allocation29_spill] sm:$0xff] }
 0x21e   : > { %v8450_v27 = vpack.c.bf16 %v4916_v52, %v4904_v8  ;;  %v8452_v48 = vpack.c.bf16 %v4934_v56, %v4922_v20  ;;  %v4928_v46 = vand.u32 4294901760, %v4927_v34  ;;  %8447 = vmatpush1.bf16.msra.mxu1 %v8446_v45  ;;  %v8262_v53 = vpack.c.bf16 %v4085_v2, %v4073_v5  ;;  %v14309_v20 = vld [vmem:[#allocation26_spill] sm:$0xff]  ;;  %v14310_v56 = vld [vmem:[#allocation75_spill] sm:$0xff] }
 0x21f   : > { %v4940_v42 = vand.u32 4294901760, %v4939_v55  ;;  %v14307_v21 = vand.u32 4294901760, %v11288_v1  ;;  %v14308_v13 = vand.u32 4294901760, %v11304_v57  ;;  %8449 = vmatprep.subr.bf16.mxu1 %v8448_v61  ;;  %v4946_v36 = vand.u32 4294901760, %v4945_v31  ;;  %v14311_v61 = vld [vmem:[#allocation78_spill] sm:$0xff]  ;;  %v14312_v31 = vld [vmem:[#allocation81_spill] sm:$0xff] }
 0x220   : > { %8259 = vmatpush1.bf16.msra.mxu0 %v8258_v50  ;;  %v4958_v33 = vand.u32 4294901760, %v4957_v22  ;;  %v4097_v28 = vand.u32 4294901760, %v4096_v63  ;;  %v4109_v4 = vand.u32 4294901760, %v4108_v26  ;;  %v8264_v52 = vpack.c.bf16 %v4103_v51, %v4091_v10  ;;  %v14313_v22 = vld [vmem:[#allocation84_spill] sm:$0xff]  ;;  %v14316_v63 = vld [vmem:[#allocation95_spill] sm:$0xff]  ;;  %v14320_v51 = vld [vmem:[#allocation62_spill] sm:$0xff] }
 0x221   : > { %v4951_v60 = vsub.f32 %v11288_v1, %v14307_v21  ;;  %v4963_v32 = vsub.f32 %v11304_v57, %v14308_v13  ;;  %8261 = vmatprep.subr.bf16.mxu0 %v8260_v49  ;;  %v8454_v45 = vpack.c.bf16 %v4940_v42, %v4928_v46  ;;  %v8268_v5 = vpack.c.bf16 %v14310_v56, %v14309_v20  ;;  %v14318_v26 = vld [vmem:[#allocation31_spill] sm:$0xff]  ;;  %v14319_v10 = vld [vmem:[#allocation56_spill] sm:$0xff]  ;;  %v14323_v13 = vld [vmem:[#allocation22_spill] sm:$0xff] }
 0x222   : > { %8451 = vmatpush1.bf16.msra.mxu1 %v8450_v27  ;;  %v8456_v34 = vpack.c.bf16 %v4958_v33, %v4946_v36  ;;  %v8266_v7 = vpack.c.bf16 %v4109_v4, %v4097_v28  ;;  %v8460_v2 = vpack.c.bf16 %v14312_v31, %v14311_v61  ;;  %v14314_v27 = vld [vmem:[#allocation87_spill] sm:$0xff]  ;;  %v8462_v49 = vpack.c.bf16 %v14318_v26, %v14317_v35  ;;  %v14321_v46 = vld [vmem:[#allocation52_spill] sm:$0xff]  ;;  %v14324_v36 = vld [vmem:[#allocation30_spill] sm:$0xff] }
 0x223   : > { %v4952_v8 = vand.u32 4294901760, %v4951_v60  ;;  %v4964_v55 = vand.u32 4294901760, %v4963_v32  ;;  %8453 = vmatprep.subr.bf16.mxu1 %v8452_v48  ;;  %v8270_v42 = vpack.c.bf16 %v14314_v27, %v14313_v22  ;;  %v14315_v32 = vld [vmem:[#allocation39_spill] sm:$0xff]  ;;  %v8464_v48 = vpack.c.bf16 %v14320_v51, %v14319_v10  ;;  %v14326_v4 = vld [vmem:[#allocation17_spill] sm:$0xff] }
 0x224   : > { %8263 = vmatpush1.bf16.msra.mxu0 %v8262_v53  ;;  %v8272_v60 = vpack.c.bf16 %v14315_v32, %v14200_v3  ;;  %v14322_v53 = vld [vmem:[#allocation65_spill] sm:$0xff]  ;;  %v8276_v33 = vpack.c.bf16 %v14324_v36, %v14323_v13  ;;  %v14325_v28 = vld [vmem:[#allocation67_spill] sm:$0xff] }
 0x225   : > { %8265 = vmatprep.subr.bf16.mxu0 %v8264_v52  ;;  %v8458_v50 = vpack.c.bf16 %v4964_v55, %v4952_v8  ;;  %v8274_v21 = vpack.c.bf16 %v14322_v53, %v14321_v46  ;;  %v8466_v52 = vpack.c.bf16 %v14326_v4, %v14325_v28  ;;  %v14328_v8 = vld [vmem:[#allocation28_spill] sm:$0xff]  ;;  %v14335_v4 = vld [vmem:[#allocation33_spill] sm:$0xff] }
 0x226   : > { %8455 = vmatpush1.bf16.msra.mxu1 %v8454_v45  ;;  %v14327_v45 = vld [vmem:[#allocation24_spill] sm:$0xff]  ;;  %v14336_v28 = vld [vmem:[#allocation37_spill] sm:$0xff] }
 0x227   : > { %8457 = vmatprep.subr.bf16.mxu1 %v8456_v34  ;;  %v8468_v55 = vpack.c.bf16 %v14328_v8, %v14327_v45  ;;  %v14329_v34 = vld [vmem:[#allocation42_spill] sm:$0xff] }
 0x228   : > { %8267 = vmatpush1.bf16.msra.mxu0 %v8266_v7  ;;  %v14330_v7 = vld [vmem:[#allocation6_spill] sm:$0xff] }
 0x229   : > { %8269 = vmatprep.subr.bf16.mxu0 %v8268_v5  ;;  %v8278_v5 = vpack.c.bf16 %v14330_v7, %v14329_v34  ;;  %v8284_v7 = vpack.c.bf16 %v14260_v59, %v14259_v0 }
 0x22a   : > { %8459 = vmatpush1.bf16.msra.mxu1 %v8458_v50  ;;  %v14331_v50 = vld [vmem:[#allocation72_spill] sm:$0xff] }
 0x22b   : > { %4145 = vmatmul.mubr.f32.vlgmr.msra.gmra.mrb[0].mxu0 %v14316_v63  ;;  %8461 = vmatprep.subr.bf16.mxu1 %v8460_v2  ;;  %v14332_v2 = vld [vmem:[#allocation27_spill] sm:$0xff] }
 0x22c   : > { %8271 = vmatpush1.bf16.msra.mxu0 %v8270_v42  ;;  %4279 = vmatprep.mubr.f32.mxu0 %v13539_v43  ;;  %v8280_v42 = vpack.c.bf16 %v14332_v2, %v14331_v50 }
 0x22d   : > { %8273 = vmatprep.subr.bf16.mxu0 %v8272_v60  ;;  %5000 = vmatmul.mubr.f32.vlgmr.msra.gmra.mrb[0].mxu1 %v14316_v63  ;;  %v14333_v60 = vld [vmem:[#allocation59_spill] sm:$0xff] }
 0x22e   : > { %8463 = vmatpush1.bf16.msra.mxu1 %v8462_v49  ;;  %5134 = vmatprep.mubr.f32.mxu1 %v13539_v43  ;;  %v14334_v49 = vld [vmem:[#allocation12_spill] sm:$0xff] }
 0x22f   : > { %8465 = vmatprep.subr.bf16.mxu1 %v8464_v48  ;;  %v8470_v63 = vpack.c.bf16 %v14334_v49, %v14333_v60  ;;  %v8472_v48 = vpack.c.bf16 %v14336_v28, %v14335_v4 }
 0x230   : > { %8275 = vmatpush1.bf16.msra.mxu0 %v8274_v21  ;;  %v8282_v21 = vpack.c.bf16 %v14249_v44, %v14246_v25 }
 0x231   : > { %8277 = vmatprep.subr.bf16.mxu0 %v8276_v33  ;;  %v8474_v33 = vpack.c.bf16 %v11099_v11, %v14251_v24 }
 0x232   : > { %8467 = vmatpush1.bf16.msra.mxu1 %v8466_v52  ;;  %v8476_v52 = vpack.c.bf16 %v14261_v29, %v11112_v47 }
 0x233   : > { %8469 = vmatprep.subr.bf16.mxu1 %v8468_v55  ;;  %v8286_v55 = vpack.c.bf16 %v14263_v16, %v14262_v58  ;;  %v8292_v16 = vpack.c.bf16 %v14287_v54, %v14286_v38 }
 0x234   : > { %8279 = vmatpush1.bf16.msra.mxu0 %v8278_v5  ;;  %v8288_v5 = vpack.c.bf16 %v11136_v62, %v14266_v23 }
 0x235   : > { %8281 = vmatprep.subr.bf16.mxu0 %v8280_v42  ;;  %v8478_v42 = vpack.c.bf16 %v14265_v6, %v14264_v18 }
 0x236   : > { %8471 = vmatpush1.bf16.msra.mxu1 %v8470_v63  ;;  %v8480_v63 = vpack.c.bf16 %v14268_v40, %v14267_v41 }
 0x237   : > { %8473 = vmatprep.subr.bf16.mxu1 %v8472_v48  ;;  %v14337_v48 = vld [vmem:[#allocation70_spill] sm:$0xff] }
 0x238   : > { %8283 = vmatpush1.bf16.msra.mxu0 %v8282_v21  ;;  %v8290_v21 = vpack.c.bf16 %v14337_v48, %v14279_v19  ;;  %v8296_v48 = vpack.c.bf16 %v14294_v12, %v14293_v14  ;;  %v14344_v12 = vld [vmem:[#allocation61_spill] sm:$0xff] }
 0x239   : > { %8285 = vmatprep.subr.bf16.mxu0 %v8284_v7  ;;  %v14338_v7 = vld [vmem:[#allocation16_spill] sm:$0xff] }
 0x23a   : > { %8475 = vmatpush1.bf16.msra.mxu1 %v8474_v33  ;;  %v8482_v62 = vpack.c.bf16 %v14288_v17, %v14338_v7  ;;  %v8484_v33 = vpack.c.bf16 %v14290_v37, %v14289_v30  ;;  %v14342_v17 = vld [vmem:[#allocation86_spill] sm:$0xff] }
 0x23b   : > { %8477 = vmatprep.subr.bf16.mxu1 %v8476_v52  ;;  %v14339_v52 = vld [vmem:[#allocation94_spill] sm:$0xff] }
 0x23c   : > { %8287 = vmatpush1.bf16.msra.mxu0 %v8286_v55  ;;  %v8294_v55 = vpack.c.bf16 %v14339_v52, %v14291_v15 }
 0x23d   : > { %8289 = vmatprep.subr.bf16.mxu0 %v8288_v5  ;;  %v14340_v5 = vld [vmem:[#allocation98_spill] sm:$0xff] }
 0x23e   : > { %8479 = vmatpush1.bf16.msra.mxu1 %v8478_v42  ;;  %v8486_v54 = vpack.c.bf16 %v14340_v5, %v14295_v39  ;;  %v14341_v42 = vld [vmem:[#allocation48_spill] sm:$0xff] }
 0x23f   : > { %8481 = vmatprep.subr.bf16.mxu1 %v8480_v63  ;;  %v8488_v63 = vpack.c.bf16 %v14342_v17, %v14341_v42  ;;  %v14348_v17 = vld [vmem:[#allocation34_spill] sm:$0xff] }
 0x240   : > { %8291 = vmatpush1.bf16.msra.mxu0 %v8290_v21  ;;  %v14343_v21 = vld [vmem:[#allocation85_spill] sm:$0xff] }
 0x241   : > { %8293 = vmatprep.subr.bf16.mxu0 %v8292_v16  ;;  %v8298_v7 = vpack.c.bf16 %v11271_v9, %v14343_v21  ;;  %v8490_v16 = vpack.c.bf16 %v11304_v57, %v11288_v1  ;;  %v14350_v57 = vld [vmem:[#allocation40_spill] sm:$0xff]  ;;  %v14351_v1 = vld [vmem:[#allocation41_spill] sm:$0xff] }
 0x242   : > { %8483 = vmatpush1.bf16.msra.mxu1 %v8482_v62  ;;  %v14345_v62 = vld [vmem:[#allocation50_spill] sm:$0xff] }
 0x243   : > { %8485 = vmatprep.subr.bf16.mxu1 %v8484_v33  ;;  %v14346_v33 = vld [vmem:[#allocation77_spill] sm:$0xff] }
 0x244   : > { %8295 = vmatpush1.bf16.msra.mxu0 %v8294_v55  ;;  %v14347_v55 = vld [vmem:[#allocation83_spill] sm:$0xff] }
 0x245   : > { %8297 = vmatprep.subr.bf16.mxu0 %v8296_v48  ;;  %v14352_v48 = vld [vmem:[#allocation19_spill] sm:$0xff] }
 0x246   : > { %8487 = vmatpush1.bf16.msra.mxu1 %v8486_v54  ;;  %v14349_v54 = vld [vmem:[#allocation88_spill] sm:$0xff] }
 0x247   : > { %8489 = vmatprep.subr.bf16.mxu1 %v8488_v63  ;;  %v14354_v63 = vld [vmem:[#allocation32_spill] sm:$0xff] }
 0x248   : > { %8299 = vmatpush1.bf16.msra.mxu0 %v8298_v7  ;;  %v14353_v7 = vld [vmem:[#allocation5_spill] sm:$0xff] }
 0x249   : > { %8301 = vmatprep.subr.bf16.mxu0 %v14344_v12 }
 0x24a   : > { %8491 = vmatpush1.bf16.msra.mxu1 %v8490_v16  ;;  %v14355_v16 = vld [vmem:[#allocation35_spill] sm:$0xff] }
 0x24b   : > { %4282 = vmatmul.mubr.f32.vlgmr.msra.gmra.mrb[0].mxu0 %v14345_v62  ;;  %8493 = vmatprep.subr.bf16.mxu1 %v14346_v33  ;;  %v14360_v33 = vld [vmem:[#allocation9_spill] sm:$0xff] }
 0x24c   : > { %8303 = vmatpush1.bf16.msra.mxu0 %v14347_v55  ;;  %4384 = vmatprep.mubr.f32.mxu0 %v13539_v43  ;;  %v14357_v55 = vld [vmem:[#allocation7_spill] sm:$0xff] }
 0x24d   : > { %8305 = vmatprep.subr.bf16.mxu0 %v14348_v17  ;;  %5137 = vmatmul.mubr.f32.vlgmr.msra.gmra.mrb[0].mxu1 %v14345_v62  ;;  %v14356_v17 = vld [vmem:[#allocation74_spill] sm:$0xff] }
 0x24e   : > { %8495 = vmatpush1.bf16.msra.mxu1 %v14349_v54  ;;  %5239 = vmatprep.mubr.f32.mxu1 %v13539_v43  ;;  %v14358_v62 = vld [vmem:[#allocation90_spill] sm:$0xff]  ;;  %v14359_v54 = vld [vmem:[#allocation43_spill] sm:$0xff] }
 0x24f   : > { %8497 = vmatprep.subr.bf16.mxu1 %v14350_v57  ;;  %v14361_v57 = vld [vmem:[#allocation13_spill] sm:$0xff] }
 0x250   : > { %8307 = vmatpush1.bf16.msra.mxu0 %v14351_v1  ;;  %v14362_v1 = vld [vmem:[#allocation25_spill] sm:$0xff] }
 0x251   : > { %8309 = vmatprep.subr.bf16.mxu0 %v14352_v48  ;;  %v14363_v48 = vld [vmem:[#allocation44_spill] sm:$0xff] }
 0x252   : > { %8499 = vmatpush1.bf16.msra.mxu1 %v14353_v7  ;;  %v14364_v7 = vld [vmem:[#allocation8_spill] sm:$0xff] }
 0x253   : > { %8501 = vmatprep.subr.bf16.mxu1 %v14354_v63  ;;  %v14365_v63 = vld [vmem:[#allocation71_spill] sm:$0xff] }
 0x254   : > { %8311 = vmatpush1.bf16.msra.mxu0 %v14355_v16  ;;  %v14366_v16 = vld [vmem:[#allocation79_spill] sm:$0xff] }
 0x255   : > { %8313 = vmatprep.subr.bf16.mxu0 %v14356_v17  ;;  %v14367_v17 = vld [vmem:[#allocation80_spill] sm:$0xff] }
 0x256   : > { %8503 = vmatpush1.bf16.msra.mxu1 %v14357_v55  ;;  %v14368_v55 = vld [vmem:[#allocation14_spill] sm:$0xff] }
 0x257   : > { %8505 = vmatprep.subr.bf16.mxu1 %v14358_v62  ;;  %v14369_v62 = vld [vmem:[#allocation15_spill] sm:$0xff] }
 0x258   : > { %8315 = vmatpush1.bf16.msra.mxu0 %v14359_v54  ;;  %v14370_v54 = vld [vmem:[#allocation63_spill] sm:$0xff] }
 0x259   : > { %8317 = vmatprep.subr.bf16.mxu0 %v14360_v33  ;;  %v14371_v33 = vld [vmem:[#allocation10_spill] sm:$0xff] }
 0x25a   : > { %8507 = vmatpush1.bf16.msra.mxu1 %v14361_v57  ;;  %v14372_v57 = vld [vmem:[#allocation100_spill] sm:$0xff] }
 0x25b   : > { %8509 = vmatprep.subr.bf16.mxu1 %v14362_v1 }
 0x25c   : > { %8319 = vmatpush1.bf16.msra.mxu0 %v14363_v48  ;;  %v14373_v48 = vand.u32 4294901760, %v14309_v20  ;;  %v14382_v20 = vand.u32 4294901760, %v14200_v3  ;;  %v14390_v3 = vand.u32 4294901760, %v14321_v46  ;;  %v14398_v46 = vand.u32 4294901760, %v14327_v45 }
 0x25d   : > { %8321 = vmatprep.subr.bf16.mxu0 %v14364_v7  ;;  %v14374_v7 = vand.u32 4294901760, %v14310_v56  ;;  %v14383_v56 = vand.u32 4294901760, %v14315_v32  ;;  %v14391_v32 = vand.u32 4294901760, %v14322_v53  ;;  %v14399_v53 = vand.u32 4294901760, %v14328_v8 }
 0x25e   : > { %8511 = vmatpush1.bf16.msra.mxu1 %v14365_v63  ;;  %v14375_v63 = vld [vmem:[#allocation97_spill] sm:$0xff]  ;;  %v14407_v8 = vand.u32 4294901760, %v14335_v4 }
 0x25f   : > { %8513 = vmatprep.subr.bf16.mxu1 %v14366_v16  ;;  %v8332_v1 = vpack.c.bf16 %v14374_v7, %v14373_v48  ;;  %v14376_v16 = vld [vmem:[#allocation55_spill] sm:$0xff]  ;;  %v8336_v48 = vpack.c.bf16 %v14383_v56, %v14382_v20  ;;  %v14401_v20 = vld [vmem:[#allocation6_spill] sm:$0xff] }
 0x260   : > { %8323 = vmatpush1.bf16.msra.mxu0 %v14367_v17  ;;  %v14377_v17 = vld [vmem:[#allocation89_spill] sm:$0xff]  ;;  %v14384_v7 = vld [vmem:[#allocation91_spill] sm:$0xff]  ;;  %v14402_v56 = vand.u32 4294901760, %v14401_v20  ;;  %v5531_v20 = vld [vmem:[#allocation2 + $0x618] sm:$0xff] }
 0x261   : > { %8325 = vmatprep.subr.bf16.mxu0 %v14368_v55  ;;  %v14378_v55 = vand.u32 4294901760, %v14311_v61  ;;  %v14386_v61 = vand.u32 4294901760, %v14317_v35  ;;  %v14393_v35 = vand.u32 4294901760, %v14324_v36  ;;  %v14400_v36 = vand.u32 4294901760, %v14329_v34 }
 0x262   : > { %8515 = vmatpush1.bf16.msra.mxu1 %v14369_v62  ;;  %v14379_v62 = vand.u32 4294901760, %v14312_v31  ;;  %v14387_v31 = vand.u32 4294901760, %v14318_v26  ;;  %v14408_v34 = vand.u32 4294901760, %v14336_v28  ;;  %v14415_v28 = vand.u32 4294901760, %v11112_v47 }
 0x263   : > { %8517 = vmatprep.subr.bf16.mxu1 %v14370_v54  ;;  %v14424_v47 = vand.u32 4294901760, %v14265_v6 }
 0x264   : > { %8327 = vmatpush1.bf16.msra.mxu0 %v14371_v33  ;;  %v8524_v54 = vpack.c.bf16 %v14379_v62, %v14378_v55  ;;  %v14380_v33 = vand.u32 4294901760, %v14313_v22  ;;  %v8526_v55 = vpack.c.bf16 %v14387_v31, %v14386_v61  ;;  %v14388_v22 = vand.u32 4294901760, %v14319_v10  ;;  %v14396_v10 = vld [vmem:[#allocation17_spill] sm:$0xff] }
 0x265   : > { %8329 = vmatprep.subr.bf16.mxu0 %v14372_v57  ;;  %v14381_v57 = vand.u32 4294901760, %v14314_v27  ;;  %v14389_v27 = vand.u32 4294901760, %v14320_v51  ;;  %v14397_v51 = vand.u32 4294901760, %v14396_v10  ;;  %v14404_v61 = vand.u32 4294901760, %v14332_v2  ;;  %v5533_v10 = vld [vmem:[#allocation2 + $0x628] sm:$0xff] }
 0x266   : > { %8519 = vmatpush1.bf16.msra.mxu1 %v14375_v63  ;;  %v14411_v2 = vand.u32 4294901760, %v14259_v0 }
 0x267   : > { %8521 = vmatprep.subr.bf16.mxu1 %v14376_v16  ;;  %v8334_v12 = vpack.c.bf16 %v14381_v57, %v14380_v33  ;;  %v14385_v16 = vld [vmem:[#allocation82_spill] sm:$0xff]  ;;  %v8528_v33 = vpack.c.bf16 %v14389_v27, %v14388_v22  ;;  %v8338_v57 = vpack.c.bf16 %v14391_v32, %v14390_v3  ;;  %v14406_v22 = vand.u32 4294901760, %v14334_v49 }
 0x268   : > { %8331 = vmatpush1.bf16.msra.mxu0 %v14377_v17  ;;  %v8536_v27 = vpack.c.bf16 %v14408_v34, %v14407_v8  ;;  %v14413_v49 = vand.u32 4294901760, %v14251_v24  ;;  %v14437_v34 = vand.u32 4294901760, %v14289_v30  ;;  %v5541_v30 = vld [vmem:[#allocation2 + $0x668] sm:$0xff] }
 0x269   : > { %8333 = vmatprep.subr.bf16.mxu0 %v8332_v1  ;;  %v14392_v1 = vand.u32 4294901760, %v14323_v13  ;;  %v8532_v13 = vpack.c.bf16 %v14399_v53, %v14398_v46  ;;  %v14428_v53 = vld [vmem:[#allocation70_spill] sm:$0xff] }
 0x26a   : > { %8523 = vmatpush1.bf16.msra.mxu1 %v14384_v7 }
 0x26b   : > { %4388 = vmatmul.mubr.f32.vlgmr.msra.gmra.mrb[0].mxu0 %v14385_v16  ;;  %8525 = vmatprep.subr.bf16.mxu1 %v8524_v54  ;;  %v8340_v62 = vpack.c.bf16 %v14393_v35, %v14392_v1  ;;  %v14417_v1 = vand.u32 4294901760, %v14262_v58  ;;  %v14418_v35 = vld [vmem:[#allocation45_spill] sm:$0xff]  ;;  %v14425_v58 = vand.u32 4294901760, %v14267_v41 }
 0x26c   : > { %8335 = vmatpush1.bf16.msra.mxu0 %v8334_v12  ;;  %4554 = vmatprep.mubr.f32.mxu0 %v13539_v43  ;;  %v14394_v12 = vld [vmem:[#allocation67_spill] sm:$0xff]  ;;  %v14419_v0 = vand.u32 4294901760, %v14418_v35  ;;  %v5532_v41 = vld [vmem:[#allocation2 + $0x620] sm:$0xff] }
 0x26d   : > { %8337 = vmatprep.subr.bf16.mxu0 %v8336_v48  ;;  %5243 = vmatmul.mubr.f32.vlgmr.msra.gmra.mrb[0].mxu1 %v14385_v16  ;;  %v14395_v26 = vand.u32 4294901760, %v14394_v12  ;;  %v8342_v16 = vpack.c.bf16 %v14402_v56, %v14400_v36  ;;  %v14403_v48 = vand.u32 4294901760, %v14331_v50  ;;  %v14410_v50 = vand.u32 4294901760, %v14249_v44  ;;  %v14421_v12 = vld [vmem:[#allocation69_spill] sm:$0xff]  ;;  %v5535_v56 = vld [vmem:[#allocation2 + $0x638] sm:$0xff] }
 0x26e   : > { %8527 = vmatpush1.bf16.msra.mxu1 %v8526_v55  ;;  %5409 = vmatprep.mubr.f32.mxu1 %v13539_v43  ;;  %v14405_v55 = vand.u32 4294901760, %v14333_v60  ;;  %v14412_v60 = vand.u32 4294901760, %v14260_v59  ;;  %v14420_v59 = vand.u32 4294901760, %v14266_v23  ;;  %v14422_v24 = vand.u32 4294901760, %v14421_v12  ;;  %v5543_v12 = vld [vmem:[#allocation2 + $0x678] sm:$0xff] }
 0x26f   : > { %v8530_v54 = vpack.c.bf16 %v14397_v51, %v14395_v26  ;;  %8529 = vmatprep.subr.bf16.mxu1 %v8528_v33  ;;  %v8344_v31 = vpack.c.bf16 %v14404_v61, %v14403_v48  ;;  %v14409_v33 = vand.u32 4294901760, %v14246_v25  ;;  %v14416_v25 = vand.u32 4294901760, %v14261_v29 }
 0x270   : > { %8339 = vmatpush1.bf16.msra.mxu0 %v8338_v57  ;;  %v8534_v45 = vpack.c.bf16 %v14406_v22, %v14405_v55  ;;  %v8348_v32 = vpack.c.bf16 %v14412_v60, %v14411_v2  ;;  %v14414_v57 = vand.u32 4294901760, %v11099_v11  ;;  %v8352_v26 = vpack.c.bf16 %v14422_v24, %v14420_v59  ;;  %v5529_v11 = vld [vmem:[#allocation2 + $0x608] sm:$0xff]  ;;  %v5528_v55 = vld [vmem:[#allocation2 + $0x600] sm:$0xff]  ;;  %v14433_v22 = vld [vmem:[#allocation16_spill] sm:$0xff] }
 0x271   : > { %8341 = vmatprep.subr.bf16.mxu0 %v8340_v62  ;;  %v8346_v3 = vpack.c.bf16 %v14410_v50, %v14409_v33  ;;  %v8540_v44 = vpack.c.bf16 %v14416_v25, %v14415_v28  ;;  %v8350_v62 = vpack.c.bf16 %v14419_v0, %v14417_v1  ;;  %v14423_v51 = vand.u32 4294901760, %v14264_v18  ;;  %v5530_v50 = vld [vmem:[#allocation2 + $0x610] sm:$0xff]  ;;  %v5537_v25 = vld [vmem:[#allocation2 + $0x648] sm:$0xff] }
 0x272   : > { %8531 = vmatpush1.bf16.msra.mxu1 %v8530_v54  ;;  %v8538_v4 = vpack.c.bf16 %v14414_v57, %v14413_v49  ;;  %v14426_v54 = vand.u32 4294901760, %v14268_v40  ;;  %v14427_v23 = vand.u32 4294901760, %v14279_v19  ;;  %v14430_v18 = vand.u32 4294901760, %v14286_v38 }
 0x273   : > { %8533 = vmatprep.subr.bf16.mxu1 %v8532_v13  ;;  %v8542_v29 = vpack.c.bf16 %v14424_v47, %v14423_v51  ;;  %v14429_v13 = vand.u32 4294901760, %v14428_v53  ;;  %v5592_v61 = vand.u32 4294901760, %v5529_v11  ;;  %v14434_v40 = vand.u32 4294901760, %v14433_v22  ;;  %v5540_v53 = vld [vmem:[#allocation2 + $0x660] sm:$0xff]  ;;  %v5545_v22 = vld [vmem:[#allocation2 + $0x688] sm:$0xff] }
 0x274   : > { %8343 = vmatpush1.bf16.msra.mxu0 %v8342_v16  ;;  %v8544_v46 = vpack.c.bf16 %v14426_v54, %v14425_v58  ;;  %v14431_v16 = vld [vmem:[#allocation46_spill] sm:$0xff]  ;;  %v14439_v38 = vand.u32 4294901760, %v14291_v15  ;;  %v14440_v2 = vand.u32 4294901760, %v14339_v52  ;;  %v14442_v49 = vand.u32 4294901760, %v14340_v5  ;;  %v5539_v5 = vld [vmem:[#allocation2 + $0x658] sm:$0xff] }
 0x275   : > { %8345 = vmatprep.subr.bf16.mxu0 %v8344_v31  ;;  %v8354_v36 = vpack.c.bf16 %v14429_v13, %v14427_v23  ;;  %v14432_v6 = vand.u32 4294901760, %v14431_v16  ;;  %v5596_v31 = vand.u32 4294901760, %v5533_v10  ;;  %v6451_v28 = vand.u32 4294901760, %v5535_v56  ;;  %v14447_v52 = vld [vmem:[#allocation86_spill] sm:$0xff]  ;;  %v5536_v23 = vld [vmem:[#allocation2 + $0x640] sm:$0xff] }
 0x276   : > { %8535 = vmatpush1.bf16.msra.mxu1 %v8534_v45  ;;  %v14435_v45 = vld [vmem:[#allocation11_spill] sm:$0xff]  ;;  %v8358_v60 = vpack.c.bf16 %v14440_v2, %v14439_v38  ;;  %v14446_v15 = vand.u32 4294901760, %v14341_v42  ;;  %v14448_v0 = vand.u32 4294901760, %v14447_v52  ;;  %v5598_v59 = vand.u32 4294901760, %v5532_v41  ;;  %v5551_v38 = vld [vmem:[#allocation2 + $0x6b8] sm:$0xff]  ;;  %v5544_v2 = vld [vmem:[#allocation2 + $0x680] sm:$0xff] }
 0x277   : > { %8537 = vmatprep.subr.bf16.mxu1 %v8536_v27  ;;  %v8356_v48 = vpack.c.bf16 %v14432_v6, %v14430_v18  ;;  %v14436_v8 = vand.u32 4294901760, %v14435_v45  ;;  %v14438_v27 = vand.u32 4294901760, %v14290_v37  ;;  %v14443_v37 = vand.u32 4294901760, %v14293_v14  ;;  %v5542_v6 = vld [vmem:[#allocation2 + $0x670] sm:$0xff] }
 0x278   : > { %8347 = vmatpush1.bf16.msra.mxu0 %v8346_v3  ;;  %v5534_v3 = vld [vmem:[#allocation2 + $0x630] sm:$0xff]  ;;  %v14449_v24 = vand.u32 4294901760, %v14343_v21  ;;  %v11852_v47 = vpack.c.bf16 %v5596_v31, %v5592_v61  ;;  %v6449_v14 = vand.u32 4294901760, %v5530_v50  ;;  %v11854_v58 = vsub.f32 %v5529_v11, %v5592_v61 }
 0x279   : > { %8349 = vmatprep.subr.bf16.mxu0 %v8348_v32  ;;  %v8546_v19 = vpack.c.bf16 %v14436_v8, %v14434_v40  ;;  %v8548_v33 = vpack.c.bf16 %v14438_v27, %v14437_v34  ;;  %v14441_v32 = vand.u32 4294901760, %v14295_v39  ;;  %v5594_v39 = vand.u32 4294901760, %v5528_v55  ;;  %v5549_v40 = vld [vmem:[#allocation2 + $0x6a8] sm:$0xff] }
 0x27a   : > { %8539 = vmatpush1.bf16.msra.mxu1 %v8538_v4  ;;  %v6447_v4 = vand.u32 4294901760, %v5531_v20  ;;  %14451 = vst [vmem:[#allocation57_spill] sm:$0xff] %v11852_v47  ;;  %14452 = vst [vmem:[#allocation36_spill] sm:$0xff] %v11854_v58  ;;  %v11856_v42 = vsub.f32 %v5533_v10, %v5596_v31  ;;  %v5600_v54 = vand.u32 4294901760, %v5537_v25  ;;  %v6455_v21 = vand.u32 4294901760, %v5539_v5  ;;  %v5538_v10 = vld [vmem:[#allocation2 + $0x650] sm:$0xff] }
 0x27b   : > { %8541 = vmatprep.subr.bf16.mxu1 %v8540_v44  ;;  %v8550_v57 = vpack.c.bf16 %v14442_v49, %v14441_v32  ;;  %v14444_v44 = vld [vmem:[#allocation47_spill] sm:$0xff]  ;;  %v11862_v18 = vsub.f32 %v5535_v56, %v6451_v28  ;;  %v11864_v16 = vpack.c.bf16 %v5598_v59, %v5594_v39  ;;  %v11866_v11 = vsub.f32 %v5528_v55, %v5594_v39  ;;  %v5547_v55 = vld [vmem:[#allocation2 + $0x698] sm:$0xff] }
 0x27c   : > { %8351 = vmatpush1.bf16.msra.mxu0 %v8350_v62  ;;  %v14445_v1 = vand.u32 4294901760, %v14444_v44  ;;  %v8552_v62 = vpack.c.bf16 %v14448_v0, %v14446_v15  ;;  %14453 = vst [vmem:[#allocation53_spill] sm:$0xff] %v11856_v42  ;;  %v11858_v13 = vpack.c.bf16 %v6451_v28, %v6447_v4  ;;  %v5602_v31 = vand.u32 4294901760, %v5536_v23  ;;  %v5550_v28 = vld [vmem:[#allocation2 + $0x6b0] sm:$0xff]  ;;  %v5555_v39 = vld [vmem:[#allocation2 + $0x6d8] sm:$0xff] }
 0x27d   : > { %8353 = vmatprep.subr.bf16.mxu0 %v8352_v26  ;;  %v14450_v26 = vand.u32 4294901760, %v11271_v9  ;;  %v6459_v9 = vand.u32 4294901760, %v5543_v12  ;;  %14456 = vst [vmem:[#allocation18_spill] sm:$0xff] %v11862_v18  ;;  %14457 = vst [vmem:[#allocation20_spill] sm:$0xff] %v11864_v16  ;;  %v11872_v45 = vsub.f32 %v5530_v50, %v6449_v14  ;;  %v6457_v27 = vand.u32 4294901760, %v5538_v10 }
 0x27e   : > { %8543 = vmatpush1.bf16.msra.mxu1 %v8542_v29  ;;  %v8360_v35 = vpack.c.bf16 %v14445_v1, %v14443_v37  ;;  %v6453_v29 = vand.u32 4294901760, %v5534_v3  ;;  %14454 = vst [vmem:[#allocation64_spill] sm:$0xff] %v11858_v13  ;;  %14458 = vst [vmem:[#allocation23_spill] sm:$0xff] %v11866_v11  ;;  %v11884_v50 = vsub.f32 %v5539_v5, %v6455_v21  ;;  %v5608_v32 = vand.u32 4294901760, %v5545_v22  ;;  %v5553_v1 = vld [vmem:[#allocation2 + $0x6c8] sm:$0xff] }
 0x27f   : > { %8545 = vmatprep.subr.bf16.mxu1 %v8544_v46  ;;  %v8362_v51 = vpack.c.bf16 %v14450_v26, %v14449_v24  ;;  %v5604_v46 = vand.u32 4294901760, %v5541_v30  ;;  %14461 = vst [vmem:[#allocation51_spill] sm:$0xff] %v11872_v45  ;;  %v5612_v49 = vand.u32 4294901760, %v5549_v40  ;;  %v6463_v44 = vand.u32 4294901760, %v5547_v55  ;;  %v14474_v5 = vld [vmem:[#allocation54_spill] sm:$0xff] }
 0x280   : > { %8355 = vmatpush1.bf16.msra.mxu0 %v8354_v36  ;;  %v11860_v36 = vsub.f32 %v5531_v20, %v6447_v4  ;;  %v11870_v61 = vpack.c.bf16 %v6453_v29, %v6449_v14  ;;  %v5606_v20 = vand.u32 4294901760, %v5540_v53  ;;  %v11874_v8 = vsub.f32 %v5534_v3, %v6453_v29  ;;  %14467 = vst [vmem:[#allocation66_spill] sm:$0xff] %v11884_v50  ;;  %v5546_v4 = vld [vmem:[#allocation2 + $0x690] sm:$0xff]  ;;  %v14478_v29 = vld [vmem:[#allocation77_spill] sm:$0xff] }
 0x281   : > { %8357 = vmatprep.subr.bf16.mxu0 %v8356_v48  ;;  %v11868_v48 = vsub.f32 %v5532_v41, %v5598_v59  ;;  %v11876_v56 = vpack.c.bf16 %v5604_v46, %v5600_v54  ;;  %v11880_v34 = vsub.f32 %v5541_v30, %v5604_v46  ;;  %v11882_v41 = vpack.c.bf16 %v6459_v9, %v6455_v21  ;;  %v5559_v59 = vld [vmem:[#allocation2 + $0x6f8] sm:$0xff]  ;;  %v5552_v21 = vld [vmem:[#allocation2 + $0x6c0] sm:$0xff] }
 0x282   : > { %8547 = vmatpush1.bf16.msra.mxu1 %v8546_v19  ;;  %14455 = vst [vmem:[#allocation68_spill] sm:$0xff] %v11860_v36  ;;  %14460 = vst [vmem:[#allocation49_spill] sm:$0xff] %v11870_v61  ;;  %v11878_v19 = vsub.f32 %v5537_v25, %v5600_v54  ;;  %v11886_v3 = vsub.f32 %v5543_v12, %v6459_v9  ;;  %v11889_v25 = vpack.c.bf16 %v5606_v20, %v5602_v31  ;;  %v14475_v12 = vld [vmem:[#allocation95_spill] sm:$0xff]  ;;  %v14483_v9 = vld [vmem:[#allocation34_spill] sm:$0xff] }
 0x283   : > { %8549 = vmatprep.subr.bf16.mxu1 %v8548_v33  ;;  %14459 = vst [vmem:[#allocation38_spill] sm:$0xff] %v11868_v48  ;;  %14462 = vst [vmem:[#allocation60_spill] sm:$0xff] %v11874_v8  ;;  %v6461_v33 = vand.u32 4294901760, %v5542_v6  ;;  %v11891_v30 = vsub.f32 %v5536_v23, %v5602_v31  ;;  %v11893_v37 = vsub.f32 %v5540_v53, %v5606_v20  ;;  %v6467_v15 = vand.u32 4294901760, %v5551_v38  ;;  %v14479_v54 = vld [vmem:[#allocation83_spill] sm:$0xff] }
 0x284   : > { %8359 = vmatpush1.bf16.msra.mxu0 %v8358_v60  ;;  %14463 = vst [vmem:[#allocation73_spill] sm:$0xff] %v11876_v56  ;;  %14464 = vst [vmem:[#allocation76_spill] sm:$0xff] %v11878_v19  ;;  %v5548_v60 = vld [vmem:[#allocation2 + $0x6a0] sm:$0xff]  ;;  %v5610_v52 = vand.u32 4294901760, %v5544_v2  ;;  %v6469_v14 = vand.u32 4294901760, %v5550_v28  ;;  %v11905_v46 = vpack.c.bf16 %v5612_v49, %v5608_v32  ;;  %v11907_v23 = vsub.f32 %v5545_v22, %v5608_v32  ;;  %v5554_v32 = vld [vmem:[#allocation2 + $0x6d0] sm:$0xff] }
 0x285   : > { %8361 = vmatprep.subr.bf16.mxu0 %v8360_v35  ;;  %14465 = vst [vmem:[#allocation58_spill] sm:$0xff] %v11880_v34  ;;  %14466 = vst [vmem:[#allocation21_spill] sm:$0xff] %v11882_v41  ;;  %v11895_v35 = vsub.f32 %v5538_v10, %v6457_v27  ;;  %v5614_v0 = vand.u32 4294901760, %v5548_v60  ;;  %v11899_v24 = vpack.c.bf16 %v6461_v33, %v6457_v27  ;;  %v5616_v10 = vand.u32 4294901760, %v5553_v1  ;;  %v5556_v27 = vld [vmem:[#allocation2 + $0x6e0] sm:$0xff] }
 0x286   : > { %8551 = vmatpush1.bf16.msra.mxu1 %v8550_v57  ;;  %14468 = vst [vmem:[#allocation92_spill] sm:$0xff] %v11886_v3  ;;  %v14469_v57 = vld [vmem:[#allocation61_spill] sm:$0xff]  ;;  %14470 = vst [vmem:[#allocation93_spill] sm:$0xff] %v11889_v25  ;;  %v11901_v26 = vsub.f32 %v5542_v6, %v6461_v33  ;;  %v11909_v53 = vsub.f32 %v5549_v40, %v5612_v49  ;;  %v6471_v31 = vand.u32 4294901760, %v5555_v39  ;;  %v6475_v20 = vand.u32 4294901760, %v5559_v59  ;;  %v14488_v49 = vld [vmem:[#allocation88_spill] sm:$0xff] }
 0x287   : > { %8553 = vmatprep.subr.bf16.mxu1 %v8552_v62  ;;  %14471 = vst [vmem:[#allocation99_spill] sm:$0xff] %v11891_v30  ;;  %14472 = vst [vmem:[#allocation96_spill] sm:$0xff] %v11893_v37  ;;  %v5557_v62 = vld [vmem:[#allocation2 + $0x6e8] sm:$0xff]  ;;  %v11914_v33 = vpack.c.bf16 %v6467_v15, %v6463_v44  ;;  %v11918_v22 = vsub.f32 %v5551_v38, %v6467_v15  ;;  %v11920_v40 = vpack.c.bf16 %v5614_v0, %v5610_v52  ;;  %v14493_v38 = vld [vmem:[#allocation41_spill] sm:$0xff] }
 0x288   : > { %8363 = vmatpush1.bf16.msra.mxu0 %v8362_v51  ;;  %14473 = vst [vmem:[#allocation26_spill] sm:$0xff] %v11895_v35  ;;  %14476 = vst [vmem:[#allocation75_spill] sm:$0xff] %v11899_v24  ;;  %v6465_v51 = vand.u32 4294901760, %v5546_v4  ;;  %v5620_v6 = vand.u32 4294901760, %v5557_v62 }
 0x289   : > { %8365 = vmatprep.subr.bf16.mxu0 %v14469_v57  ;;  %14477 = vst [vmem:[#allocation78_spill] sm:$0xff] %v11901_v26  ;;  %14480 = vst [vmem:[#allocation81_spill] sm:$0xff] %v11905_v46  ;;  %v11916_v57 = vsub.f32 %v5547_v55, %v6463_v44  ;;  %v5565_v55 = vld [vmem:[#allocation2 + $0x728] sm:$0xff]  ;;  %v14492_v44 = vld [vmem:[#allocation40_spill] sm:$0xff] }
 0x28a   : > { %8555 = vmatpush1.bf16.msra.mxu1 %v14474_v5  ;;  %14481 = vst [vmem:[#allocation84_spill] sm:$0xff] %v11907_v23  ;;  %14482 = vst [vmem:[#allocation87_spill] sm:$0xff] %v11909_v53  ;;  %v11924_v5 = vsub.f32 %v5544_v2, %v5610_v52  ;;  %v5558_v53 = vld [vmem:[#allocation2 + $0x6f0] sm:$0xff]  ;;  %v5561_v23 = vld [vmem:[#allocation2 + $0x708] sm:$0xff]  ;;  %v11932_v15 = vsub.f32 %v5546_v4, %v6465_v51  ;;  %v5622_v2 = vand.u32 4294901760, %v5556_v27 }
 0x28b   : > { %4556 = vmatmul.mubr.f32.vlgmr.msra.gmra.mrb[0].mxu0 %v14475_v12  ;;  %8557 = vmatprep.subr.bf16.mxu1 %v14478_v29  ;;  %14484 = vst [vmem:[#allocation39_spill] sm:$0xff] %v11914_v33  ;;  %14485 = vst [vmem:[#allocation29_spill] sm:$0xff] %v11916_v57  ;;  %v11926_v29 = vsub.f32 %v5548_v60, %v5614_v0  ;;  %v5563_v52 = vld [vmem:[#allocation2 + $0x718] sm:$0xff]  ;;  %v14497_v0 = vld [vmem:[#allocation19_spill] sm:$0xff]  ;;  %v11948_v57 = vsub.f32 %v5559_v59, %v6475_v20 }
 0x28c   : > { %8367 = vmatpush1.bf16.msra.mxu0 %v14479_v54  ;;  %4658 = vmatprep.mubr.f32.mxu0 %v13539_v43  ;;  %14486 = vst [vmem:[#allocation31_spill] sm:$0xff] %v11918_v22  ;;  %14487 = vst [vmem:[#allocation56_spill] sm:$0xff] %v11920_v40  ;;  %v11928_v54 = vpack.c.bf16 %v6469_v14, %v6465_v51  ;;  %v11934_v22 = vsub.f32 %v5550_v28, %v6469_v14  ;;  %v5567_v60 = vld [vmem:[#allocation2 + $0x738] sm:$0xff]  ;;  %v5564_v4 = vld [vmem:[#allocation2 + $0x720] sm:$0xff]  ;;  %v6473_v51 = vand.u32 4294901760, %v5554_v32 }
 0x28d   : > { %8369 = vmatprep.subr.bf16.mxu0 %v14483_v9  ;;  %5411 = vmatmul.mubr.f32.vlgmr.msra.gmra.mrb[0].mxu1 %v14475_v12  ;;  %14489 = vst [vmem:[#allocation62_spill] sm:$0xff] %v11924_v5  ;;  %14490 = vst [vmem:[#allocation52_spill] sm:$0xff] %v11926_v29  ;;  %v5618_v9 = vand.u32 4294901760, %v5552_v21  ;;  %v11941_v29 = vsub.f32 %v5557_v62, %v5620_v6  ;;  %v11943_v5 = vpack.c.bf16 %v6475_v20, %v6471_v31  ;;  %v14510_v26 = vld [vmem:[#allocation74_spill] sm:$0xff]  ;;  %v5572_v40 = vld [vmem:[#allocation2 + $0x760] sm:$0xff] }
 0x28e   : > { %8559 = vmatpush1.bf16.msra.mxu1 %v14488_v49  ;;  %5513 = vmatprep.mubr.f32.mxu1 %v13539_v43  ;;  %14491 = vst [vmem:[#allocation65_spill] sm:$0xff] %v11928_v54  ;;  %14494 = vst [vmem:[#allocation22_spill] sm:$0xff] %v11932_v15  ;;  %v11936_v49 = vsub.f32 %v5553_v1, %v5616_v10  ;;  %v11939_v54 = vpack.c.bf16 %v5620_v6, %v5616_v10  ;;  %v6477_v28 = vand.u32 4294901760, %v5558_v53  ;;  %v14502_v15 = vld [vmem:[#allocation5_spill] sm:$0xff]  ;;  %v14518_v33 = vld [vmem:[#allocation90_spill] sm:$0xff] }
 0x28f   : > { %8561 = vmatprep.subr.bf16.mxu1 %v14492_v44  ;;  %14495 = vst [vmem:[#allocation30_spill] sm:$0xff] %v11934_v22  ;;  %14499 = vst [vmem:[#allocation42_spill] sm:$0xff] %v11941_v29  ;;  %v11945_v44 = vsub.f32 %v5555_v39, %v6471_v31  ;;  %v5624_v14 = vand.u32 4294901760, %v5561_v23  ;;  %v5628_v1 = vand.u32 4294901760, %v5565_v55  ;;  %v5566_v22 = vld [vmem:[#allocation2 + $0x730] sm:$0xff]  ;;  %v11950_v10 = vsub.f32 %v5552_v21, %v5618_v9  ;;  %v5569_v29 = vld [vmem:[#allocation2 + $0x748] sm:$0xff] }
 0x290   : > { %8371 = vmatpush1.bf16.msra.mxu0 %v14493_v38  ;;  %14496 = vst [vmem:[#allocation24_spill] sm:$0xff] %v11936_v49  ;;  %14498 = vst [vmem:[#allocation28_spill] sm:$0xff] %v11939_v54  ;;  %v5560_v38 = vld [vmem:[#allocation2 + $0x700] sm:$0xff]  ;;  %v5562_v49 = vld [vmem:[#allocation2 + $0x710] sm:$0xff]  ;;  %v6479_v62 = vand.u32 4294901760, %v5563_v52  ;;  %v6483_v6 = vand.u32 4294901760, %v5567_v60  ;;  %v11954_v31 = vpack.c.bf16 %v5622_v2, %v5618_v9 }
 0x291   : > { %8373 = vmatprep.subr.bf16.mxu0 %v14497_v0  ;;  %14500 = vst [vmem:[#allocation72_spill] sm:$0xff] %v11943_v5  ;;  %14501 = vst [vmem:[#allocation27_spill] sm:$0xff] %v11945_v44  ;;  %v14505_v0 = vld [vmem:[#allocation32_spill] sm:$0xff]  ;;  %v14506_v39 = vld [vmem:[#allocation35_spill] sm:$0xff]  ;;  %v11956_v44 = vsub.f32 %v5556_v27, %v5622_v2  ;;  %v11958_v5 = vsub.f32 %v5554_v32, %v6473_v51  ;;  %v5626_v59 = vand.u32 4294901760, %v5560_v38  ;;  %v5630_v20 = vand.u32 4294901760, %v5564_v4 }
 0x292   : > { %8563 = vmatpush1.bf16.msra.mxu1 %v14502_v15  ;;  %14503 = vst [vmem:[#allocation59_spill] sm:$0xff] %v11948_v57  ;;  %14504 = vst [vmem:[#allocation12_spill] sm:$0xff] %v11950_v10  ;;  %v5573_v54 = vld [vmem:[#allocation2 + $0x768] sm:$0xff]  ;;  %v6481_v21 = vand.u32 4294901760, %v5562_v49  ;;  %v6485_v15 = vand.u32 4294901760, %v5566_v22  ;;  %v5571_v10 = vld [vmem:[#allocation2 + $0x758] sm:$0xff]  ;;  %v11961_v57 = vpack.c.bf16 %v6477_v28, %v6473_v51  ;;  %v11967_v9 = vsub.f32 %v5561_v23, %v5624_v14 }
 0x293   : > { %8565 = vmatprep.subr.bf16.mxu1 %v14505_v0  ;;  %14507 = vst [vmem:[#allocation33_spill] sm:$0xff] %v11954_v31  ;;  %14508 = vst [vmem:[#allocation37_spill] sm:$0xff] %v11956_v44  ;;  %v11963_v0 = vsub.f32 %v5558_v53, %v6477_v28  ;;  %v5575_v27 = vld [vmem:[#allocation2 + $0x778] sm:$0xff]  ;;  %v14515_v32 = vld [vmem:[#allocation7_spill] sm:$0xff]  ;;  %v11970_v2 = vsub.f32 %v5565_v55, %v5628_v1  ;;  %v5636_v44 = vand.u32 4294901760, %v5573_v54 }
 0x294   : > { %8375 = vmatpush1.bf16.msra.mxu0 %v14506_v39  ;;  %14509 = vst [vmem:[#allocation94_spill] sm:$0xff] %v11958_v5  ;;  %14511 = vst [vmem:[#allocation98_spill] sm:$0xff] %v11961_v57  ;;  %v11965_v39 = vpack.c.bf16 %v5628_v1, %v5624_v14  ;;  %v11972_v5 = vpack.c.bf16 %v6483_v6, %v6479_v62  ;;  %v5568_v31 = vld [vmem:[#allocation2 + $0x740] sm:$0xff]  ;;  %v14519_v51 = vld [vmem:[#allocation43_spill] sm:$0xff]  ;;  %v11976_v53 = vsub.f32 %v5563_v52, %v6479_v62 }
 0x295   : > { %8377 = vmatprep.subr.bf16.mxu0 %v14510_v26  ;;  %14512 = vst [vmem:[#allocation48_spill] sm:$0xff] %v11963_v0  ;;  %14514 = vst [vmem:[#allocation50_spill] sm:$0xff] %v11967_v9  ;;  %v5632_v26 = vand.u32 4294901760, %v5569_v29  ;;  %v11978_v28 = vsub.f32 %v5567_v60, %v6483_v6  ;;  %v11980_v23 = vsub.f32 %v5560_v38, %v5626_v59  ;;  %v6487_v14 = vand.u32 4294901760, %v5571_v10  ;;  %v5574_v55 = vld [vmem:[#allocation2 + $0x770] sm:$0xff]  ;;  %v14523_v1 = vld [vmem:[#allocation9_spill] sm:$0xff] }
 0x296   : > { %14513 = vst [vmem:[#allocation85_spill] sm:$0xff] %v11965_v39  ;;  %8567 = vmatpush1.bf16.msra.mxu1 %v14515_v32  ;;  %14516 = vst [vmem:[#allocation97_spill] sm:$0xff] %v11970_v2  ;;  %v5570_v32 = vld [vmem:[#allocation2 + $0x750] sm:$0xff]  ;;  %v11983_v2 = vpack.c.bf16 %v5630_v20, %v5626_v59  ;;  %v11985_v9 = vsub.f32 %v5564_v4, %v5630_v20  ;;  %v11987_v0 = vpack.c.bf16 %v6485_v15, %v6481_v21  ;;  %v5579_v6 = vld [vmem:[#allocation2 + $0x798] sm:$0xff] }
 0x297   : > { %14517 = vst [vmem:[#allocation89_spill] sm:$0xff] %v11972_v5  ;;  %8569 = vmatprep.subr.bf16.mxu1 %v14518_v33  ;;  %14520 = vst [vmem:[#allocation91_spill] sm:$0xff] %v11976_v53  ;;  %v6491_v33 = vand.u32 4294901760, %v5575_v27  ;;  %v5577_v5 = vld [vmem:[#allocation2 + $0x788] sm:$0xff]  ;;  %v11989_v52 = vsub.f32 %v5562_v49, %v6481_v21  ;;  %v11991_v60 = vsub.f32 %v5566_v22, %v6485_v15  ;;  %v5634_v38 = vand.u32 4294901760, %v5568_v31  ;;  %v5580_v53 = vld [vmem:[#allocation2 + $0x7a0] sm:$0xff] }
 0x298   : > { %8379 = vmatpush1.bf16.msra.mxu0 %v14519_v51  ;;  %14521 = vst [vmem:[#allocation82_spill] sm:$0xff] %v11978_v28  ;;  %14522 = vst [vmem:[#allocation67_spill] sm:$0xff] %v11980_v23  ;;  %v5581_v51 = vld [vmem:[#allocation2 + $0x7a8] sm:$0xff]  ;;  %v5638_v62 = vand.u32 4294901760, %v5572_v40  ;;  %v5583_v23 = vld [vmem:[#allocation2 + $0x7b8] sm:$0xff]  ;;  %v11996_v59 = vsub.f32 %v5569_v29, %v5632_v26  ;;  %v6489_v4 = vand.u32 4294901760, %v5570_v32  ;;  %v12000_v22 = vsub.f32 %v5573_v54, %v5636_v44 }
 0x299   : > { %8381 = vmatprep.subr.bf16.mxu0 %v14523_v1  ;;  %14524 = vst [vmem:[#allocation17_spill] sm:$0xff] %v11983_v2  ;;  %14525 = vst [vmem:[#allocation6_spill] sm:$0xff] %v11985_v9  ;;  %v14529_v28 = vld [vmem:[#allocation13_spill] sm:$0xff]  ;;  %v11994_v1 = vpack.c.bf16 %v5636_v44, %v5632_v26  ;;  %v6493_v20 = vand.u32 4294901760, %v5574_v55  ;;  %v14533_v49 = vld [vmem:[#allocation44_spill] sm:$0xff]  ;;  %v12002_v21 = vsub.f32 %v5571_v10, %v6487_v14  ;;  %v5640_v15 = vand.u32 4294901760, %v5577_v5 }
 0x29a   : > { %14526 = vst [vmem:[#allocation45_spill] sm:$0xff] %v11987_v0  ;;  %14527 = vst [vmem:[#allocation69_spill] sm:$0xff] %v11989_v52  ;;  %8571 = vmatpush1.bf16.msra.mxu1 %v14529_v28  ;;  %v5576_v9 = vld [vmem:[#allocation2 + $0x780] sm:$0xff]  ;;  %v14536_v52 = vld [vmem:[#allocation8_spill] sm:$0xff]  ;;  %v12005_v28 = vpack.c.bf16 %v6491_v33, %v6487_v14  ;;  %v12007_v29 = vsub.f32 %v5575_v27, %v6491_v33  ;;  %v6495_v26 = vand.u32 4294901760, %v5579_v6  ;;  %v5646_v44 = vand.u32 4294901760, %v5580_v53 }
 0x29b   : > { %14528 = vst [vmem:[#allocation70_spill] sm:$0xff] %v11991_v60  ;;  %14530 = vst [vmem:[#allocation46_spill] sm:$0xff] %v11994_v1  ;;  %v14532_v0 = vld [vmem:[#allocation25_spill] sm:$0xff]  ;;  %v5644_v60 = vand.u32 4294901760, %v5581_v51  ;;  %v5578_v1 = vld [vmem:[#allocation2 + $0x790] sm:$0xff]  ;;  %v5642_v54 = vand.u32 4294901760, %v5576_v9  ;;  %v12018_v14 = vsub.f32 %v5570_v32, %v6489_v4  ;;  %v12020_v27 = vsub.f32 %v5574_v55, %v6493_v20 }
 0x29c   : > { %14531 = vst [vmem:[#allocation16_spill] sm:$0xff] %v11996_v59  ;;  %8573 = vmatprep.subr.bf16.mxu1 %v14532_v0  ;;  %8383 = vmatpush1.bf16.msra.mxu0 %v14533_v49  ;;  %14534 = vst [vmem:[#allocation11_spill] sm:$0xff] %v12000_v22  ;;  %v6499_v59 = vand.u32 4294901760, %v5583_v23  ;;  %v5582_v2 = vld [vmem:[#allocation2 + $0x7b0] sm:$0xff]  ;;  %v12009_v0 = vpack.c.bf16 %v5638_v62, %v5634_v38  ;;  %v12011_v49 = vsub.f32 %v5568_v31, %v5634_v38  ;;  %v5585_v33 = vld [vmem:[#allocation2 + $0x7c8] sm:$0xff] }
 0x29d   : > { %14535 = vst [vmem:[#allocation47_spill] sm:$0xff] %v12002_v21  ;;  %8385 = vmatprep.subr.bf16.mxu0 %v14536_v52  ;;  %14537 = vst [vmem:[#allocation86_spill] sm:$0xff] %v12005_v28  ;;  %v14541_v10 = vld [vmem:[#allocation71_spill] sm:$0xff]  ;;  %v12014_v21 = vsub.f32 %v5572_v40, %v5638_v62  ;;  %v12016_v52 = vpack.c.bf16 %v6493_v20, %v6489_v4  ;;  %v14547_v28 = vld [vmem:[#allocation80_spill] sm:$0xff]  ;;  %v12025_v31 = vpack.c.bf16 %v5644_v60, %v5640_v15 }
 0x29e   : > { %14538 = vst [vmem:[#allocation61_spill] sm:$0xff] %v12007_v29  ;;  %14539 = vst [vmem:[#allocation54_spill] sm:$0xff] %v12009_v0  ;;  %8575 = vmatpush1.bf16.msra.mxu1 %v14541_v10  ;;  %v7431_v29 = vld [vmem:[%s9451_s6 + $0xc] sm:$0xf]  ;;  %v14546_v22 = vld [vmem:[#allocation79_spill] sm:$0xff]  ;;  %v12027_v38 = vsub.f32 %v5577_v5, %v5640_v15  ;;  %v6501_v10 = vand.u32 4294901760, %v5582_v2  ;;  %v12030_v32 = vsub.f32 %v5581_v51, %v5644_v60 }
 0x29f   : > { %14540 = vst [vmem:[#allocation95_spill] sm:$0xff] %v12011_v49  ;;  %14542 = vst [vmem:[#allocation77_spill] sm:$0xff] %v12014_v21  ;;  %8577 = vmatprep.subr.bf16.mxu1 %v14546_v22  ;;  %v6497_v49 = vand.u32 4294901760, %v5578_v1  ;;  %v5589_v40 = vld [vmem:[#allocation2 + $0x7e8] sm:$0xff]  ;;  %v5587_v62 = vld [vmem:[#allocation2 + $0x7d8] sm:$0xff]  ;;  %v12032_v55 = vpack.c.bf16 %v6499_v59, %v6495_v26  ;;  %v12034_v4 = vsub.f32 %v5579_v6, %v6495_v26  ;;  %v12044_v15 = vand.u32 4294901760, %v7431_v29 }
 0x2a0   : > { %14543 = vst [vmem:[#allocation83_spill] sm:$0xff] %v12016_v52  ;;  %14544 = vst [vmem:[#allocation34_spill] sm:$0xff] %v12018_v14  ;;  %8387 = vmatpush1.bf16.msra.mxu0 %v14547_v28  ;;  %v5591_v21 = vld [vmem:[#allocation2 + $0x7f8] sm:$0xff]  ;;  %v14550_v52 = vld [vmem:[#allocation14_spill] sm:$0xff]  ;;  %v12036_v20 = vsub.f32 %v5583_v23, %v6499_v59  ;;  %v12038_v22 = vpack.c.bf16 %v5646_v44, %v5642_v54  ;;  %v12040_v28 = vsub.f32 %v5576_v9, %v5642_v54 }
 0x2a1   : > { %14545 = vst [vmem:[#allocation88_spill] sm:$0xff] %v12020_v27  ;;  %14548 = vst [vmem:[#allocation40_spill] sm:$0xff] %v12025_v31  ;;  %8389 = vmatprep.subr.bf16.mxu0 %v14550_v52  ;;  %v12042_v5 = vsub.f32 %v5580_v53, %v5646_v44  ;;  %v14557_v27 = vld [vmem:[#allocation15_spill] sm:$0xff]  ;;  %v5652_v52 = vand.u32 4294901760, %v5589_v40  ;;  %v6503_v51 = vand.u32 4294901760, %v5587_v62  ;;  %v6507_v60 = vand.u32 4294901760, %v5591_v21 }
 0x2a2   : > { %14549 = vst [vmem:[#allocation41_spill] sm:$0xff] %v12027_v38  ;;  %14551 = vst [vmem:[#allocation19_spill] sm:$0xff] %v12030_v32  ;;  %8579 = vmatpush1.bf16.msra.mxu1 %v14557_v27  ;;  %v5648_v38 = vand.u32 4294901760, %v5585_v33  ;;  %v5584_v32 = vld [vmem:[#allocation2 + $0x7c0] sm:$0xff]  ;;  %v14558_v14 = vld [vmem:[#allocation63_spill] sm:$0xff]  ;;  %v12049_v23 = vpack.c.bf16 %v6501_v10, %v6497_v49  ;;  %v12051_v59 = vsub.f32 %v5578_v1, %v6497_v49  ;;  %v13324_v26 = vand.u32 4294901760, %v11854_v58 }
 0x2a3   : > { %14552 = vst [vmem:[#allocation5_spill] sm:$0xff] %v12032_v55  ;;  %14553 = vst [vmem:[#allocation32_spill] sm:$0xff] %v12038_v22  ;;  %8581 = vmatprep.subr.bf16.mxu1 %v14558_v14  ;;  %v14559_v6 = vld [vmem:[#allocation10_spill] sm:$0xff]  ;;  %v12053_v9 = vsub.f32 %v5582_v2, %v6501_v10  ;;  %v5588_v53 = vld [vmem:[#allocation2 + $0x7e0] sm:$0xff]  ;;  %v12065_v1 = vsub.f32 %v7431_v29, %v12044_v15  ;;  %v12072_v10 = vsub.f32 %v5589_v40, %v5652_v52 }
 0x2a4   : > { %14554 = vst [vmem:[#allocation35_spill] sm:$0xff] %v12040_v28  ;;  %14555 = vst [vmem:[#allocation74_spill] sm:$0xff] %v12042_v5  ;;  %8391 = vmatpush1.bf16.msra.mxu0 %v14559_v6  ;;  %v14561_v54 = vld [vmem:[#allocation100_spill] sm:$0xff]  ;;  %v12057_v44 = vsub.f32 %v5585_v33, %v5648_v38  ;;  %v12059_v27 = vld [vmem:[#allocation2 + $0x7d0] sm:$0xff]  ;;  %v5650_v28 = vand.u32 4294901760, %v5584_v32  ;;  %v12070_v33 = vpack.c.bf16 %v5652_v52, %v5648_v38  ;;  %v5654_v5 = vand.u32 4294901760, %v5588_v53 }
 0x2a5   : > { %14556 = vst [vmem:[#allocation7_spill] sm:$0xff] %v12044_v15  ;;  %14560 = vst [vmem:[#allocation90_spill] sm:$0xff] %v12049_v23  ;;  %8393 = vmatprep.subr.bf16.mxu0 %v14561_v54  ;;  %v12074_v54 = vpack.c.bf16 %v6507_v60, %v6503_v51  ;;  %v14566_v14 = vld [vmem:[#allocation55_spill] sm:$0xff]  ;;  %v12078_v6 = vsub.f32 %v5587_v62, %v6503_v51  ;;  %v12080_v29 = vsub.f32 %v5591_v21, %v6507_v60 }
 0x2a6   : > { %14562 = vst [vmem:[#allocation43_spill] sm:$0xff] %v12065_v1  ;;  %8583 = vmatpush1.bf16.msra.mxu1 %v14375_v63  ;;  %14563 = vst [vmem:[#allocation9_spill] sm:$0xff] %v12070_v33  ;;  %v5590_v2 = vld [vmem:[#allocation2 + $0x7f0] sm:$0xff]  ;;  %v6505_v49 = vand.u32 4294901760, %v12059_v27  ;;  %v5703_v63 = vsub.f32 %v11854_v58, %v13324_v26  ;;  %v14568_v38 = vand.u32 4294901760, %v11856_v42  ;;  %v14569_v52 = vand.u32 4294901760, %v11860_v36 }
 0x2a7   : > { %14564 = vst [vmem:[#allocation13_spill] sm:$0xff] %v12072_v10  ;;  %14565 = vst [vmem:[#allocation25_spill] sm:$0xff] %v12074_v54  ;;  %8585 = vmatprep.subr.bf16.mxu1 %v14566_v14  ;;  %v14570_v21 = vand.u32 4294901760, %v11862_v18  ;;  %v12098_v60 = vand.u32 4294901760, %v12065_v1  ;;  %v14572_v14 = vand.u32 4294901760, %v11866_v11 }
 0x2a8   : > { %8395 = vmatpush1.bf16.msra.mxu0 %v14377_v17  ;;  %14567 = vst [vmem:[#allocation44_spill] sm:$0xff] %v12080_v29  ;;  %v5715_v40 = vsub.f32 %v11856_v42, %v14568_v38  ;;  %v6558_v17 = vsub.f32 %v11860_v36, %v14569_v52  ;;  %v12109_v52 = vpack.c.bf16 %v5654_v5, %v5650_v28  ;;  %v14623_v36 = vld [vmem:[#allocation46_spill] sm:$0xff] }
 0x2a9   : > { %8589 = vmatprep.subr.bf16.mxu0 %v11852_v47  ;;  %v6570_v62 = vsub.f32 %v11862_v18, %v14570_v21  ;;  %14571 = vst [vmem:[#allocation8_spill] sm:$0xff] %v12098_v60  ;;  %v5709_v26 = vsub.f32 %v11866_v11, %v14572_v14  ;;  %v14573_v47 = vand.u32 4294901760, %v11868_v48  ;;  %v6509_v21 = vand.u32 4294901760, %v5590_v2  ;;  %v14627_v29 = vld [vmem:[#allocation86_spill] sm:$0xff] }
 0x2aa   : > { %8587 = vmatpush1.bf16.msra.mxu1 %v14384_v7  ;;  %14574 = vst [vmem:[#allocation71_spill] sm:$0xff] %v12109_v52  ;;  %v12115_v14 = vsub.f32 %v5584_v32, %v5650_v28  ;;  %v6559_v11 = vand.u32 4294901760, %v6558_v17  ;;  %v14576_v18 = vand.u32 4294901760, %v11872_v45  ;;  %v5692_v32 = vsub.f32 %v12065_v1, %v12098_v60 }
 0x2ab   : > { %v5721_v38 = vsub.f32 %v11868_v48, %v14573_v47  ;;  %4660 = vmatmul.mubr.f32.vlgmr.msra.gmra.mrb[0].mxu0 %v14475_v12  ;;  %8781 = vmatprep.subr.bf16.mxu1 %v11858_v13  ;;  %v5704_v47 = vand.u32 4294901760, %v5703_v63  ;;  %v5716_v48 = vand.u32 4294901760, %v5715_v40  ;;  %v6571_v51 = vand.u32 4294901760, %v6570_v62 }
 0x2ac   : > { %8591 = vmatpush1.bf16.msra.mxu0 %v11864_v16  ;;  %14575 = vst [vmem:[#allocation79_spill] sm:$0xff] %v12115_v14  ;;  %5688 = vmatprep.mubr.f32.mxu0 %v13539_v43  ;;  %v12124_v13 = vsub.f32 %v11872_v45, %v14576_v18  ;;  %v5710_v28 = vand.u32 4294901760, %v5709_v26  ;;  %v14577_v7 = vand.u32 4294901760, %v11874_v8  ;;  %v12135_v40 = vsub.f32 %v5588_v53, %v5654_v5  ;;  %v14602_v45 = vld [vmem:[#allocation72_spill] sm:$0xff]  ;;  %v14603_v16 = vld [vmem:[#allocation33_spill] sm:$0xff] }
 0x2ad   : > { %8593 = vmatprep.subr.bf16.mxu0 %v11876_v56  ;;  %5515 = vmatmul.mubr.f32.vlgmr.msra.gmra.mrb[0].mxu1 %v14475_v12  ;;  %v5722_v63 = vand.u32 4294901760, %v5721_v38  ;;  %v14579_v18 = vand.u32 4294901760, %v11878_v19  ;;  %v14580_v17 = vand.u32 4294901760, %v11880_v34  ;;  %v12152_v5 = vsub.f32 %v12059_v27, %v6505_v49 }
 0x2ae   : > { %v12132_v15 = vsub.f32 %v11874_v8, %v14577_v7  ;;  %8783 = vmatpush1.bf16.msra.mxu1 %v11870_v61  ;;  %14578 = vst [vmem:[#allocation80_spill] sm:$0xff] %v12135_v40  ;;  %6543 = vmatprep.mubr.f32.mxu1 %v13539_v43  ;;  %v14581_v53 = vand.u32 4294901760, %v11884_v50  ;;  %v14582_v7 = vand.u32 4294901760, %v11886_v3  ;;  %v12166_v62 = vpack.c.bf16 %v6509_v21, %v6505_v49  ;;  %v14588_v49 = vld [vmem:[#allocation78_spill] sm:$0xff]  ;;  %v14624_v40 = vld [vmem:[#allocation45_spill] sm:$0xff] }
 0x2af   : > { %v12141_v12 = vsub.f32 %v11878_v19, %v14579_v18  ;;  %v12146_v26 = vsub.f32 %v11880_v34, %v14580_v17  ;;  %8785 = vmatprep.subr.bf16.mxu1 %v11882_v41  ;;  %v12168_v60 = vsub.f32 %v5590_v2, %v6509_v21  ;;  %v12170_v27 = vpack.c.bf16 %v5716_v48, %v5704_v47  ;;  %v14586_v21 = vld [vmem:[#allocation56_spill] sm:$0xff]  ;;  %v14594_v47 = vld [vmem:[#allocation62_spill] sm:$0xff]  ;;  %v14606_v34 = vld [vmem:[#allocation59_spill] sm:$0xff] }
 0x2b0   : > { %8595 = vmatpush1.bf16.msra.mxu0 %v11889_v25  ;;  %v12157_v38 = vsub.f32 %v11884_v50, %v14581_v53  ;;  %v12162_v18 = vsub.f32 %v11886_v3, %v14582_v7  ;;  %14583 = vst [vmem:[#allocation14_spill] sm:$0xff] %v12166_v62  ;;  %v12173_v41 = vpack.c.bf16 %v6571_v51, %v6559_v11  ;;  %v12175_v53 = vand.u32 4294901760, %v5692_v32  ;;  %v14585_v51 = vld [vmem:[#allocation39_spill] sm:$0xff]  ;;  %v14589_v7 = vld [vmem:[#allocation28_spill] sm:$0xff]  ;;  %v14598_v50 = vld [vmem:[#allocation65_spill] sm:$0xff] }
 0x2b1   : > { %8597 = vmatprep.subr.bf16.mxu0 %v11905_v46  ;;  %v12177_v61 = vpack.c.bf16 %v5722_v63, %v5710_v28  ;;  %v14584_v2 = vand.u32 4294901760, %v11891_v30  ;;  %v14587_v28 = vand.u32 4294901760, %v11893_v37  ;;  %v14591_v11 = vld [vmem:[#allocation87_spill] sm:$0xff]  ;;  %v14595_v32 = vld [vmem:[#allocation52_spill] sm:$0xff]  ;;  %v14599_v25 = vand.u32 4294901760, %v11895_v35  ;;  %v14601_v8 = vld [vmem:[#allocation42_spill] sm:$0xff] }
 0x2b2   : > { %8787 = vmatpush1.bf16.msra.mxu1 %v11899_v24  ;;  %v14608_v46 = vand.u32 4294901760, %v14591_v11  ;;  %v14611_v19 = vand.u32 4294901760, %v14594_v47 }
 0x2b3   : > { %v12186_v48 = vsub.f32 %v11891_v30, %v14584_v2  ;;  %8789 = vmatprep.subr.bf16.mxu1 %v14585_v51  ;;  %v12196_v63 = vsub.f32 %v11893_v37, %v14587_v28  ;;  %v14590_v2 = vld [vmem:[#allocation84_spill] sm:$0xff]  ;;  %v14592_v51 = vld [vmem:[#allocation29_spill] sm:$0xff]  ;;  %v14596_v30 = vld [vmem:[#allocation22_spill] sm:$0xff]  ;;  %v6588_v24 = vsub.f32 %v11895_v35, %v14599_v25  ;;  %v14604_v37 = vand.u32 4294901760, %v14588_v49 }
 0x2b4   : > { %8599 = vmatpush1.bf16.msra.mxu0 %v14586_v21  ;;  %v14593_v21 = vld [vmem:[#allocation31_spill] sm:$0xff]  ;;  %v14597_v28 = vld [vmem:[#allocation30_spill] sm:$0xff]  ;;  %v14607_v25 = vand.u32 4294901760, %v14590_v2  ;;  %v14613_v35 = vand.u32 4294901760, %v14596_v30 }
 0x2b5   : > { %8601 = vmatprep.subr.bf16.mxu0 %v14589_v7  ;;  %v5734_v17 = vand.u32 4294901760, %v12186_v48  ;;  %v14600_v7 = vld [vmem:[#allocation24_spill] sm:$0xff]  ;;  %v5746_v3 = vand.u32 4294901760, %v12196_v63  ;;  %v6600_v1 = vsub.f32 %v14588_v49, %v14604_v37  ;;  %v14609_v63 = vand.u32 4294901760, %v14592_v51 }
 0x2b6   : > { %8791 = vmatpush1.bf16.msra.mxu1 %v14598_v50  ;;  %v14605_v50 = vld [vmem:[#allocation27_spill] sm:$0xff]  ;;  %v5751_v56 = vsub.f32 %v14590_v2, %v14607_v25  ;;  %v14610_v37 = vand.u32 4294901760, %v14593_v21  ;;  %v14612_v49 = vand.u32 4294901760, %v14595_v32  ;;  %v14618_v2 = vld [vmem:[#allocation89_spill] sm:$0xff] }
 0x2b7   : > { %8793 = vmatprep.subr.bf16.mxu1 %v14602_v45  ;;  %v6606_v45 = vsub.f32 %v14592_v51, %v14609_v63  ;;  %v6589_v51 = vand.u32 4294901760, %v6588_v24  ;;  %v14621_v24 = vand.u32 4294901760, %v14606_v34 }
 0x2b8   : > { %8603 = vmatpush1.bf16.msra.mxu0 %v14603_v16  ;;  %v5763_v16 = vsub.f32 %v14591_v11, %v14608_v46  ;;  %v6618_v48 = vsub.f32 %v14593_v21, %v14610_v37  ;;  %v5769_v25 = vsub.f32 %v14595_v32, %v14612_v49  ;;  %v6612_v46 = vsub.f32 %v14596_v30, %v14613_v35  ;;  %v14617_v49 = vld [vmem:[#allocation12_spill] sm:$0xff]  ;;  %v14619_v35 = vld [vmem:[#allocation17_spill] sm:$0xff] }
 0x2b9   : > { %8605 = vmatprep.subr.bf16.mxu0 %v11965_v39  ;;  %v5757_v39 = vsub.f32 %v14594_v47, %v14611_v19  ;;  %v14614_v11 = vand.u32 4294901760, %v14597_v28  ;;  %v14615_v37 = vand.u32 4294901760, %v14600_v7  ;;  %v14616_v19 = vand.u32 4294901760, %v14601_v8 }
 0x2ba   : > { %8795 = vmatpush1.bf16.msra.mxu1 %v11961_v57  ;;  %v6601_v30 = vand.u32 4294901760, %v6600_v1  ;;  %v6607_v32 = vand.u32 4294901760, %v6606_v45  ;;  %v6619_v42 = vand.u32 4294901760, %v6618_v48  ;;  %v5770_v58 = vand.u32 4294901760, %v5769_v25 }
 0x2bb   : > { %v6624_v63 = vsub.f32 %v14597_v28, %v14614_v11  ;;  %v5775_v21 = vsub.f32 %v14600_v7, %v14615_v37  ;;  %v5787_v47 = vsub.f32 %v14601_v8, %v14616_v19  ;;  %8797 = vmatprep.subr.bf16.mxu1 %v14618_v2  ;;  %v14620_v11 = vand.u32 4294901760, %v14605_v50  ;;  %v14622_v37 = vld [vmem:[#allocation37_spill] sm:$0xff] }
 0x2bc   : > { %8607 = vmatpush1.bf16.msra.mxu0 %v14619_v35  ;;  %v6642_v28 = vsub.f32 %v14606_v34, %v14621_v24  ;;  %v5752_v19 = vand.u32 4294901760, %v5751_v56  ;;  %v5764_v8 = vand.u32 4294901760, %v5763_v16  ;;  %v5758_v2 = vand.u32 4294901760, %v5757_v39  ;;  %v14626_v34 = vld [vmem:[#allocation94_spill] sm:$0xff] }
 0x2bd   : > { %v6630_v57 = vsub.f32 %v14605_v50, %v14620_v11  ;;  %8609 = vmatprep.subr.bf16.mxu0 %v14623_v36  ;;  %v6613_v35 = vand.u32 4294901760, %v6612_v46  ;;  %v6625_v1 = vand.u32 4294901760, %v6624_v63  ;;  %v5776_v14 = vand.u32 4294901760, %v5775_v21 }
 0x2be   : > { %8799 = vmatpush1.bf16.msra.mxu1 %v14624_v40  ;;  %v5788_v11 = vand.u32 4294901760, %v5787_v47  ;;  %v14625_v50 = vand.u32 4294901760, %v14617_v49  ;;  %v14628_v16 = vand.u32 4294901760, %v12124_v13  ;;  %v14629_v45 = vand.u32 4294901760, %v12132_v15  ;;  %v14667_v40 = vld [vmem:[#allocation34_spill] sm:$0xff] }
 0x2bf   : > { %8801 = vmatprep.subr.bf16.mxu1 %v14627_v29  ;;  %v6631_v39 = vand.u32 4294901760, %v6630_v57  ;;  %v6643_v48 = vand.u32 4294901760, %v6642_v28  ;;  %v14630_v21 = vand.u32 4294901760, %v14622_v37  ;;  %v14632_v25 = vand.u32 4294901760, %v12146_v26  ;;  %v14635_v57 = vld [vmem:[#allocation48_spill] sm:$0xff]  ;;  %v14636_v26 = vld [vmem:[#allocation83_spill] sm:$0xff] }
 0x2c0   : > { %v5781_v24 = vsub.f32 %v14617_v49, %v14625_v50  ;;  %8611 = vmatpush1.bf16.msra.mxu0 %v12009_v0  ;;  %v12277_v56 = vpack.c.bf16 %v14629_v45, %v14628_v16  ;;  %v14631_v50 = vand.u32 4294901760, %v12141_v12  ;;  %v14633_v63 = vand.u32 4294901760, %v12157_v38  ;;  %v14666_v29 = vld [vmem:[#allocation77_spill] sm:$0xff] }
 0x2c1   : > { %v5793_v47 = vsub.f32 %v14622_v37, %v14630_v21  ;;  %8613 = vmatprep.subr.bf16.mxu0 %v12025_v31  ;;  %v14634_v13 = vand.u32 4294901760, %v12162_v18  ;;  %v12293_v16 = vpack.c.bf16 %v5746_v3, %v5734_v17  ;;  %v13399_v28 = vand.u32 4294901760, %v14635_v57 }
 0x2c2   : > { %v8624_v46 = vpack.c.bf16 %v14632_v25, %v14631_v50  ;;  %v12296_v45 = vpack.c.bf16 %v6601_v30, %v6589_v51  ;;  %v12298_v21 = vpack.c.bf16 %v5764_v8, %v5752_v19  ;;  %v12300_v7 = vpack.c.bf16 %v6619_v42, %v6607_v32  ;;  %8803 = vmatpush1.bf16.msra.mxu1 %v14636_v26  ;;  %v14639_v51 = vld [vmem:[#allocation97_spill] sm:$0xff]  ;;  %v14641_v19 = vld [vmem:[#allocation82_spill] sm:$0xff]  ;;  %v14663_v26 = vld [vmem:[#allocation95_spill] sm:$0xff] }
 0x2c3   : > { %v12291_v15 = vpack.c.bf16 %v14634_v13, %v14633_v63  ;;  %v12302_v12 = vpack.c.bf16 %v5770_v58, %v5758_v2  ;;  %v12305_v50 = vpack.c.bf16 %v6625_v1, %v6613_v35  ;;  %v12307_v38 = vpack.c.bf16 %v5788_v11, %v5776_v14  ;;  %8805 = vmatprep.subr.bf16.mxu1 %v12032_v55  ;;  %v14638_v58 = vld [vmem:[#allocation50_spill] sm:$0xff]  ;;  %v14640_v2 = vld [vmem:[#allocation91_spill] sm:$0xff]  ;;  %v14649_v1 = vld [vmem:[#allocation61_spill] sm:$0xff] }
 0x2c4   : > { %v5782_v18 = vand.u32 4294901760, %v5781_v24  ;;  %v14637_v3 = vand.u32 4294901760, %v14626_v34  ;;  %8615 = vmatpush1.bf16.msra.mxu0 %v12038_v22  ;;  %v12314_v8 = vpack.c.bf16 %v6643_v48, %v6631_v39  ;;  %v5794_v42 = vand.u32 4294901760, %v5793_v47  ;;  %v14642_v11 = vld [vmem:[#allocation67_spill] sm:$0xff]  ;;  %v14643_v25 = vld [vmem:[#allocation6_spill] sm:$0xff]  ;;  %v14644_v48 = vld [vmem:[#allocation69_spill] sm:$0xff] }
 0x2c5   : > { %8617 = vmatprep.subr.bf16.mxu0 %v12070_v33  ;;  %v6648_v14 = vsub.f32 %v14635_v57, %v13399_v28  ;;  %v14645_v32 = vld [vmem:[#allocation70_spill] sm:$0xff]  ;;  %v14646_v28 = vld [vmem:[#allocation16_spill] sm:$0xff]  ;;  %v14647_v35 = vld [vmem:[#allocation11_spill] sm:$0xff]  ;;  %v14650_v13 = vand.u32 4294901760, %v12152_v5  ;;  %v14653_v22 = vand.u32 4294901760, %v14638_v58  ;;  %v14654_v30 = vand.u32 4294901760, %v14639_v51 }
 0x2c6   : > { %v6636_v17 = vsub.f32 %v14626_v34, %v14637_v3  ;;  %8807 = vmatpush1.bf16.msra.mxu1 %v12049_v23  ;;  %v12335_v39 = vpack.c.bf16 %v5794_v42, %v5782_v18  ;;  %v14648_v47 = vld [vmem:[#allocation47_spill] sm:$0xff]  ;;  %v14655_v42 = vand.u32 4294901760, %v14640_v2  ;;  %v14656_v24 = vand.u32 4294901760, %v14641_v19 }
 0x2c7   : > { %8809 = vmatprep.subr.bf16.mxu1 %v12074_v54  ;;  %v5799_v33 = vsub.f32 %v14638_v58, %v14653_v22  ;;  %v5811_v18 = vsub.f32 %v14639_v51, %v14654_v30  ;;  %v14659_v54 = vand.u32 4294901760, %v14644_v48  ;;  %v14662_v55 = vand.u32 4294901760, %v14647_v35 }
 0x2c8   : > { %v6637_v3 = vand.u32 4294901760, %v6636_v17  ;;  %8619 = vmatpush1.bf16.msra.mxu0 %v12109_v52  ;;  %v14651_v17 = vand.u32 4294901760, %v12168_v60  ;;  %v6654_v63 = vsub.f32 %v14640_v2, %v14655_v42  ;;  %v6666_v52 = vsub.f32 %v14641_v19, %v14656_v24 }
 0x2c9   : > { %8621 = vmatprep.subr.bf16.mxu0 %v12170_v27  ;;  %v6660_v30 = vsub.f32 %v14644_v48, %v14659_v54  ;;  %v14660_v42 = vand.u32 4294901760, %v14645_v32  ;;  %v14661_v24 = vand.u32 4294901760, %v14646_v28  ;;  %v14664_v54 = vand.u32 4294901760, %v14648_v47 }
 0x2ca   : > { %v12343_v23 = vpack.c.bf16 %v14651_v17, %v14650_v13  ;;  %v6649_v13 = vand.u32 4294901760, %v6648_v14  ;;  %v14657_v17 = vand.u32 4294901760, %v14642_v11  ;;  %8811 = vmatpush1.bf16.msra.mxu1 %v12166_v62  ;;  %v13422_v36 = vand.u32 4294901760, %v14667_v40 }
 0x2cb   : > { %5694 = vmatmul.mubr.f32.vlgmr.msra.gmra.mrb[0].mxu0 %v12175_v53  ;;  %v6672_v14 = vsub.f32 %v14645_v32, %v14660_v42  ;;  %8813 = vmatprep.subr.bf16.mxu1 %v12173_v41  ;;  %v6678_v62 = vsub.f32 %v14648_v47, %v14664_v54  ;;  %v14665_v42 = vand.u32 4294901760, %v14649_v1  ;;  %v5812_v32 = vand.u32 4294901760, %v5811_v18 }
 0x2cc   : > { %14652 = vst [vmem:[#allocation15_spill] sm:$0xff] %v12343_v23  ;;  %v5805_v27 = vsub.f32 %v14642_v11, %v14657_v17  ;;  %v14658_v23 = vand.u32 4294901760, %v14643_v25  ;;  %v5823_v17 = vsub.f32 %v14646_v28, %v14661_v24  ;;  %8623 = vmatpush1.bf16.msra.mxu0 %v12177_v61  ;;  %v6655_v31 = vand.u32 4294901760, %v6654_v63  ;;  %5924 = vmatprep.mubr.f32.mxu0 %v13539_v43 }
 0x2cd   : > { %v6690_v0 = vsub.f32 %v14649_v1, %v14665_v42  ;;  %8625 = vmatprep.subr.bf16.mxu0 %v8624_v46  ;;  %v6667_v48 = vand.u32 4294901760, %v6666_v52  ;;  %6549 = vmatmul.mubr.f32.vlgmr.msra.gmra.mrb[0].mxu1 %v12175_v53  ;;  %v12391_v61 = vpack.c.bf16 %v6649_v13, %v6637_v3  ;;  %v6661_v47 = vand.u32 4294901760, %v6660_v30 }
 0x2ce   : > { %v5817_v22 = vsub.f32 %v14643_v25, %v14658_v23  ;;  %v5835_v23 = vsub.f32 %v14647_v35, %v14662_v55  ;;  %v5800_v55 = vand.u32 4294901760, %v5799_v33  ;;  %v5806_v41 = vand.u32 4294901760, %v5805_v27  ;;  %8815 = vmatpush1.bf16.msra.mxu1 %v12277_v56  ;;  %6779 = vmatprep.mubr.f32.mxu1 %v13539_v43  ;;  %v14670_v27 = vld [vmem:[#allocation41_spill] sm:$0xff] }
 0x2cf   : > { %v6673_v42 = vand.u32 4294901760, %v6672_v14  ;;  %v5824_v24 = vand.u32 4294901760, %v5823_v17  ;;  %v14668_v46 = vand.u32 4294901760, %v14663_v26  ;;  %8817 = vmatprep.subr.bf16.mxu1 %v12291_v15  ;;  %v6679_v52 = vand.u32 4294901760, %v6678_v62  ;;  %v14671_v15 = vld [vmem:[#allocation19_spill] sm:$0xff]  ;;  %v14672_v62 = vld [vmem:[#allocation88_spill] sm:$0xff] }
 0x2d0   : > { %v5818_v54 = vand.u32 4294901760, %v5817_v22  ;;  %v5836_v1 = vand.u32 4294901760, %v5835_v23  ;;  %8627 = vmatpush1.bf16.msra.mxu0 %v12293_v16  ;;  %v6691_v53 = vand.u32 4294901760, %v6690_v0  ;;  %v14669_v63 = vand.u32 4294901760, %v14666_v29 }
 0x2d1   : > { %v5829_v33 = vsub.f32 %v14663_v26, %v14668_v46  ;;  %v12406_v56 = vsub.f32 %v14667_v40, %v13422_v36  ;;  %8629 = vmatprep.subr.bf16.mxu0 %v12298_v21  ;;  %v8636_v18 = vpack.c.bf16 %v5812_v32, %v5800_v55  ;;  %v8828_v13 = vpack.c.bf16 %v6667_v48, %v6655_v31  ;;  %v14674_v21 = vld [vmem:[#allocation74_spill] sm:$0xff] }
 0x2d2   : > { %v5841_v3 = vsub.f32 %v14666_v29, %v14669_v63  ;;  %v13428_v22 = vand.u32 4294901760, %v14670_v27  ;;  %v13426_v30 = vand.u32 4294901760, %v14671_v15  ;;  %v8638_v16 = vpack.c.bf16 %v5818_v54, %v5806_v41  ;;  %8819 = vmatpush1.bf16.msra.mxu1 %v12296_v45  ;;  %v14673_v63 = vld [vmem:[#allocation35_spill] sm:$0xff] }
 0x2d3   : > { %v13425_v0 = vand.u32 4294901760, %v14672_v62  ;;  %v13424_v14 = vand.u32 4294901760, %v12034_v4  ;;  %v13423_v17 = vand.u32 4294901760, %v12036_v20  ;;  %v8830_v23 = vpack.c.bf16 %v6673_v42, %v6661_v47  ;;  %8821 = vmatprep.subr.bf16.mxu1 %v12300_v7 }
 0x2d4   : > { %v8640_v46 = vpack.c.bf16 %v5836_v1, %v5824_v24  ;;  %v13427_v36 = vand.u32 4294901760, %v14673_v63  ;;  %v13429_v32 = vand.u32 4294901760, %v14674_v21  ;;  %8631 = vmatpush1.bf16.msra.mxu0 %v12302_v12  ;;  %v8832_v31 = vpack.c.bf16 %v6691_v53, %v6679_v52 }
 0x2d5   : > { %v5830_v48 = vand.u32 4294901760, %v5829_v33  ;;  %v5842_v55 = vand.u32 4294901760, %v5841_v3  ;;  %v6685_v41 = vand.u32 4294901760, %v12406_v56  ;;  %8633 = vmatprep.subr.bf16.mxu0 %v12307_v38  ;;  %v5847_v45 = vsub.f32 %v14670_v27, %v13428_v22  ;;  %v14675_v56 = vld [vmem:[#allocation44_spill] sm:$0xff] }
 0x2d6   : > { %v5859_v1 = vsub.f32 %v14671_v15, %v13426_v30  ;;  %v13430_v47 = vand.u32 4294901760, %v12057_v44  ;;  %v13433_v7 = vand.u32 4294901760, %v12072_v10  ;;  %v6696_v12 = vsub.f32 %v14672_v62, %v13425_v0  ;;  %8823 = vmatpush1.bf16.msra.mxu1 %v12305_v50  ;;  %v14676_v50 = vld [vmem:[#allocation79_spill] sm:$0xff]  ;;  %v14677_v0 = vld [vmem:[#allocation80_spill] sm:$0xff] }
 0x2d7   : > { %v6702_v38 = vsub.f32 %v12034_v4, %v13424_v14  ;;  %v6714_v24 = vsub.f32 %v12036_v20, %v13423_v17  ;;  %v13432_v54 = vand.u32 4294901760, %v12051_v59  ;;  %v5853_v42 = vsub.f32 %v14673_v63, %v13427_v36  ;;  %8825 = vmatprep.subr.bf16.mxu1 %v12314_v8 }
 0x2d8   : > { %v5865_v33 = vsub.f32 %v14674_v21, %v13429_v32  ;;  %v13431_v52 = vand.u32 4294901760, %v12053_v9  ;;  %8635 = vmatpush1.bf16.msra.mxu0 %v12335_v39  ;;  %v8642_v3 = vpack.c.bf16 %v5842_v55, %v5830_v48  ;;  %v13434_v17 = vand.u32 4294901760, %v14675_v56 }
 0x2d9   : > { %v13436_v14 = vand.u32 4294901760, %v14676_v50  ;;  %8637 = vmatprep.subr.bf16.mxu0 %v8636_v18  ;;  %v5848_v36 = vand.u32 4294901760, %v5847_v45  ;;  %v5860_v22 = vand.u32 4294901760, %v5859_v1  ;;  %v5871_v32 = vsub.f32 %v12057_v44, %v13430_v47 }
 0x2da   : > { %v5883_v8 = vsub.f32 %v12072_v10, %v13433_v7  ;;  %v6697_v53 = vand.u32 4294901760, %v6696_v12  ;;  %v6703_v39 = vand.u32 4294901760, %v6702_v38  ;;  %v6715_v48 = vand.u32 4294901760, %v6714_v24  ;;  %8827 = vmatpush1.bf16.msra.mxu1 %v12391_v61 }
 0x2db   : > { %v6708_v55 = vsub.f32 %v12051_v59, %v13432_v54  ;;  %v5854_v18 = vand.u32 4294901760, %v5853_v42  ;;  %v5866_v45 = vand.u32 4294901760, %v5865_v33  ;;  %v6720_v1 = vsub.f32 %v12053_v9, %v13431_v52  ;;  %8829 = vmatprep.subr.bf16.mxu1 %v8828_v13 }
 0x2dc   : > { %v14678_v47 = vand.u32 4294901760, %v12078_v6  ;;  %8639 = vmatpush1.bf16.msra.mxu0 %v8638_v16  ;;  %v6738_v12 = vsub.f32 %v14675_v56, %v13434_v17  ;;  %v5877_v61 = vsub.f32 %v14676_v50, %v13436_v14  ;;  %v14679_v38 = vand.u32 4294901760, %v14677_v0 }
 0x2dd   : > { %8641 = vmatprep.subr.bf16.mxu0 %v8640_v46  ;;  %v8644_v42 = vpack.c.bf16 %v5860_v22, %v5848_v36  ;;  %v5872_v33 = vand.u32 4294901760, %v5871_v32  ;;  %v5884_v52 = vand.u32 4294901760, %v5883_v8  ;;  %v8834_v54 = vpack.c.bf16 %v6697_v53, %v6685_v41 }
 0x2de   : > { %v6726_v30 = vsub.f32 %v12078_v6, %v14678_v47  ;;  %v5889_v24 = vsub.f32 %v14677_v0, %v14679_v38  ;;  %v8836_v47 = vpack.c.bf16 %v6715_v48, %v6703_v39  ;;  %v6709_v13 = vand.u32 4294901760, %v6708_v55  ;;  %8831 = vmatpush1.bf16.msra.mxu1 %v8830_v23  ;;  %v14682_v48 = vld [vmem:[#allocation36_spill] sm:$0xff]  ;;  %v14683_v55 = vld [vmem:[#allocation53_spill] sm:$0xff] }
 0x2df   : > { %v8646_v16 = vpack.c.bf16 %v5866_v45, %v5854_v18  ;;  %v6721_v7 = vand.u32 4294901760, %v6720_v1  ;;  %v14680_v17 = vand.u32 4294901760, %v12152_v5  ;;  %v14681_v14 = vand.u32 4294901760, %v12168_v60  ;;  %8833 = vmatprep.subr.bf16.mxu1 %v8832_v31  ;;  %v14690_v1 = vld [vmem:[#allocation7_spill] sm:$0xff] }
 0x2e0   : > { %8643 = vmatpush1.bf16.msra.mxu0 %v8642_v3  ;;  %v6727_v46 = vand.u32 4294901760, %v6726_v30  ;;  %v6739_v36 = vand.u32 4294901760, %v6738_v12  ;;  %v5878_v22 = vand.u32 4294901760, %v5877_v61  ;;  %v5890_v32 = vand.u32 4294901760, %v5889_v24  ;;  %v14684_v30 = vld [vmem:[#allocation68_spill] sm:$0xff]  ;;  %v14685_v3 = vld [vmem:[#allocation18_spill] sm:$0xff] }
 0x2e1   : > { %v6732_v56 = vsub.f32 %v12152_v5, %v14680_v17  ;;  %v6744_v50 = vsub.f32 %v12168_v60, %v14681_v14  ;;  %8645 = vmatprep.subr.bf16.mxu0 %v8644_v42  ;;  %v8648_v41 = vpack.c.bf16 %v5884_v52, %v5872_v33  ;;  %v8838_v23 = vpack.c.bf16 %v6721_v7, %v6709_v13  ;;  %v14686_v52 = vld [vmem:[#allocation23_spill] sm:$0xff]  ;;  %v14692_v61 = vld [vmem:[#allocation60_spill] sm:$0xff]  ;;  %v14693_v24 = vld [vmem:[#allocation66_spill] sm:$0xff] }
 0x2e2   : > { %8835 = vmatpush1.bf16.msra.mxu1 %v8834_v54  ;;  %v8840_v39 = vpack.c.bf16 %v6739_v36, %v6727_v46  ;;  %v8650_v17 = vpack.c.bf16 %v5890_v32, %v5878_v22  ;;  %v8652_v14 = vpack.c.bf16 %v14683_v55, %v14682_v48  ;;  %v8844_v18 = vpack.c.bf16 %v14685_v3, %v14684_v30  ;;  %v14687_v54 = vld [vmem:[#allocation38_spill] sm:$0xff]  ;;  %v14691_v12 = vld [vmem:[#allocation51_spill] sm:$0xff]  ;;  %v14694_v42 = vld [vmem:[#allocation92_spill] sm:$0xff] }
 0x2e3   : > { %v6733_v53 = vand.u32 4294901760, %v6732_v56  ;;  %v6745_v8 = vand.u32 4294901760, %v6744_v50  ;;  %8837 = vmatprep.subr.bf16.mxu1 %v8836_v47  ;;  %v8654_v7 = vpack.c.bf16 %v14687_v54, %v14686_v52  ;;  %v14688_v56 = vld [vmem:[#allocation76_spill] sm:$0xff]  ;;  %v14689_v50 = vld [vmem:[#allocation58_spill] sm:$0xff]  ;;  %v8846_v38 = vpack.c.bf16 %v14692_v61, %v14691_v12  ;;  %v14695_v47 = vld [vmem:[#allocation99_spill] sm:$0xff] }
 0x2e4   : > { %8647 = vmatpush1.bf16.msra.mxu0 %v8646_v16  ;;  %v8656_v45 = vpack.c.bf16 %v14689_v50, %v14688_v56  ;;  %v8848_v33 = vpack.c.bf16 %v14694_v42, %v14693_v24  ;;  %v14696_v13 = vld [vmem:[#allocation96_spill] sm:$0xff]  ;;  %v14698_v36 = vld [vmem:[#allocation87_spill] sm:$0xff]  ;;  %v14699_v32 = vld [vmem:[#allocation26_spill] sm:$0xff] }
 0x2e5   : > { %8649 = vmatprep.subr.bf16.mxu0 %v8648_v41  ;;  %v8842_v31 = vpack.c.bf16 %v6745_v8, %v6733_v53  ;;  %v8658_v16 = vpack.c.bf16 %v14696_v13, %v14695_v47  ;;  %v14697_v46 = vld [vmem:[#allocation84_spill] sm:$0xff]  ;;  %v14700_v41 = vld [vmem:[#allocation78_spill] sm:$0xff]  ;;  %v14701_v53 = vld [vmem:[#allocation29_spill] sm:$0xff] }
 0x2e6   : > { %8839 = vmatpush1.bf16.msra.mxu1 %v8838_v23  ;;  %v8660_v22 = vpack.c.bf16 %v14698_v36, %v14697_v46  ;;  %v8850_v23 = vpack.c.bf16 %v14700_v41, %v14699_v32  ;;  %v14702_v8 = vld [vmem:[#allocation31_spill] sm:$0xff] }
 0x2e7   : > { %8841 = vmatprep.subr.bf16.mxu1 %v8840_v39  ;;  %v8852_v39 = vpack.c.bf16 %v14702_v8, %v14701_v53  ;;  %v14709_v41 = vld [vmem:[#allocation27_spill] sm:$0xff] }
 0x2e8   : > { %8651 = vmatpush1.bf16.msra.mxu0 %v8650_v17  ;;  %v14703_v17 = vld [vmem:[#allocation62_spill] sm:$0xff]  ;;  %v14710_v32 = vld [vmem:[#allocation59_spill] sm:$0xff] }
 0x2e9   : > { %8653 = vmatprep.subr.bf16.mxu0 %v8652_v14  ;;  %v14704_v14 = vld [vmem:[#allocation52_spill] sm:$0xff] }
 0x2ea   : > { %8843 = vmatpush1.bf16.msra.mxu1 %v8842_v31  ;;  %v8662_v31 = vpack.c.bf16 %v14704_v14, %v14703_v17  ;;  %v8668_v14 = vpack.c.bf16 %v14639_v51, %v14638_v58 }
 0x2eb   : > { %5926 = vmatmul.mubr.f32.vlgmr.msra.gmra.mrb[0].mxu0 %v14690_v1  ;;  %8845 = vmatprep.subr.bf16.mxu1 %v8844_v18  ;;  %v14705_v18 = vld [vmem:[#allocation24_spill] sm:$0xff] }
 0x2ec   : > { %8655 = vmatpush1.bf16.msra.mxu0 %v8654_v7  ;;  %6060 = vmatprep.mubr.f32.mxu0 %v13539_v43  ;;  %v14706_v7 = vld [vmem:[#allocation42_spill] sm:$0xff] }
 0x2ed   : > { %8657 = vmatprep.subr.bf16.mxu0 %v8656_v45  ;;  %6781 = vmatmul.mubr.f32.vlgmr.msra.gmra.mrb[0].mxu1 %v14690_v1  ;;  %v8664_v45 = vpack.c.bf16 %v14706_v7, %v14705_v18  ;;  %v14707_v1 = vld [vmem:[#allocation22_spill] sm:$0xff] }
 0x2ee   : > { %8847 = vmatpush1.bf16.msra.mxu1 %v8846_v38  ;;  %6915 = vmatprep.mubr.f32.mxu1 %v13539_v43  ;;  %v14708_v38 = vld [vmem:[#allocation30_spill] sm:$0xff] }
 0x2ef   : > { %8849 = vmatprep.subr.bf16.mxu1 %v8848_v33  ;;  %v8854_v36 = vpack.c.bf16 %v14708_v38, %v14707_v1  ;;  %v8856_v33 = vpack.c.bf16 %v14710_v32, %v14709_v41 }
 0x2f0   : > { %8659 = vmatpush1.bf16.msra.mxu0 %v8658_v16  ;;  %v8666_v16 = vpack.c.bf16 %v14622_v37, %v14617_v49  ;;  %v14712_v37 = vld [vmem:[#allocation70_spill] sm:$0xff] }
 0x2f1   : > { %8661 = vmatprep.subr.bf16.mxu0 %v8660_v22  ;;  %v8858_v22 = vpack.c.bf16 %v14635_v57, %v14626_v34  ;;  %v14714_v57 = vld [vmem:[#allocation61_spill] sm:$0xff] }
 0x2f2   : > { %8851 = vmatpush1.bf16.msra.mxu1 %v8850_v23  ;;  %v8860_v23 = vpack.c.bf16 %v14641_v19, %v14640_v2 }
 0x2f3   : > { %8853 = vmatprep.subr.bf16.mxu1 %v8852_v39  ;;  %v8670_v39 = vpack.c.bf16 %v14643_v25, %v14642_v11  ;;  %v8676_v25 = vpack.c.bf16 %v14671_v15, %v14670_v27 }
 0x2f4   : > { %8663 = vmatpush1.bf16.msra.mxu0 %v8662_v31  ;;  %v8672_v31 = vpack.c.bf16 %v14647_v35, %v14646_v28 }
 0x2f5   : > { %8665 = vmatprep.subr.bf16.mxu0 %v8664_v45  ;;  %v14711_v45 = vld [vmem:[#allocation69_spill] sm:$0xff] }
 0x2f6   : > { %8855 = vmatpush1.bf16.msra.mxu1 %v8854_v36  ;;  %v8862_v51 = vpack.c.bf16 %v14712_v37, %v14711_v45  ;;  %v14713_v36 = vld [vmem:[#allocation47_spill] sm:$0xff] }
 0x2f7   : > { %8857 = vmatprep.subr.bf16.mxu1 %v8856_v33  ;;  %v8864_v33 = vpack.c.bf16 %v14714_v57, %v14713_v36 }
 0x2f8   : > { %8667 = vmatpush1.bf16.msra.mxu0 %v8666_v16  ;;  %v8674_v16 = vpack.c.bf16 %v14666_v29, %v14663_v26 }
 0x2f9   : > { %8669 = vmatprep.subr.bf16.mxu0 %v8668_v14  ;;  %v8866_v14 = vpack.c.bf16 %v14672_v62, %v14667_v40 }
 0x2fa   : > { %8859 = vmatpush1.bf16.msra.mxu1 %v8858_v22  ;;  %v8868_v22 = vpack.c.bf16 %v12036_v20, %v12034_v4 }
 0x2fb   : > { %8861 = vmatprep.subr.bf16.mxu1 %v8860_v23  ;;  %v8678_v23 = vpack.c.bf16 %v14674_v21, %v14673_v63 }
 0x2fc   : > { %8671 = vmatpush1.bf16.msra.mxu0 %v8670_v39  ;;  %v8680_v39 = vpack.c.bf16 %v12072_v10, %v12057_v44  ;;  %v14717_v10 = vld [vmem:[#allocation57_spill] sm:$0xff] }
 0x2fd   : > { %8673 = vmatprep.subr.bf16.mxu0 %v8672_v31  ;;  %v8870_v31 = vpack.c.bf16 %v12053_v9, %v12051_v59 }
 0x2fe   : > { %8863 = vmatpush1.bf16.msra.mxu1 %v8862_v51  ;;  %v14715_v51 = vld [vmem:[#allocation44_spill] sm:$0xff] }
 0x2ff   : > { %8865 = vmatprep.subr.bf16.mxu1 %v8864_v33  ;;  %v8872_v33 = vpack.c.bf16 %v14715_v51, %v12078_v6  ;;  %v14721_v51 = vld [vmem:[#allocation73_spill] sm:$0xff] }
 0x300   : > { %8675 = vmatpush1.bf16.msra.mxu0 %v8674_v16  ;;  %v14716_v16 = vld [vmem:[#allocation79_spill] sm:$0xff] }
 0x301   : > { %8677 = vmatprep.subr.bf16.mxu0 %v8676_v25  ;;  %v8682_v62 = vpack.c.bf16 %v14677_v0, %v14716_v16  ;;  %v8874_v25 = vpack.c.bf16 %v12168_v60, %v12152_v5  ;;  %v14723_v60 = vld [vmem:[#allocation21_spill] sm:$0xff] }
 0x302   : > { %8867 = vmatpush1.bf16.msra.mxu1 %v8866_v14  ;;  %v14718_v14 = vld [vmem:[#allocation43_spill] sm:$0xff]  ;;  %v14724_v5 = vld [vmem:[#allocation93_spill] sm:$0xff] }
 0x303   : > { %8869 = vmatprep.subr.bf16.mxu1 %v8868_v22  ;;  %v14719_v22 = vld [vmem:[#allocation64_spill] sm:$0xff] }
 0x304   : > { %8679 = vmatpush1.bf16.msra.mxu0 %v8678_v23  ;;  %v14720_v23 = vld [vmem:[#allocation20_spill] sm:$0xff] }
 0x305   : > { %8681 = vmatprep.subr.bf16.mxu0 %v8680_v39  ;;  %v14722_v39 = vld [vmem:[#allocation49_spill] sm:$0xff] }
 0x306   : > { %8871 = vmatpush1.bf16.msra.mxu1 %v8870_v31  ;;  %v14726_v31 = vld [vmem:[#allocation75_spill] sm:$0xff] }
 0x307   : > { %8873 = vmatprep.subr.bf16.mxu1 %v8872_v33  ;;  %v14727_v33 = vld [vmem:[#allocation39_spill] sm:$0xff] }
 0x308   : > { %8683 = vmatpush1.bf16.msra.mxu0 %v8682_v62  ;;  %v14725_v62 = vld [vmem:[#allocation81_spill] sm:$0xff] }
 0x309   : > { %8685 = vmatprep.subr.bf16.mxu0 %v14717_v10 }
 0x30a   : > { %8875 = vmatpush1.bf16.msra.mxu1 %v8874_v25  ;;  %v14728_v25 = vld [vmem:[#allocation56_spill] sm:$0xff] }
 0x30b   : > { %6063 = vmatmul.mubr.f32.vlgmr.msra.gmra.mrb[0].mxu0 %v14718_v14  ;;  %8877 = vmatprep.subr.bf16.mxu1 %v14719_v22  ;;  %v14733_v22 = vld [vmem:[#allocation85_spill] sm:$0xff] }
 0x30c   : > { %8687 = vmatpush1.bf16.msra.mxu0 %v14720_v23  ;;  %6165 = vmatprep.mubr.f32.mxu0 %v13539_v43  ;;  %v14730_v23 = vld [vmem:[#allocation65_spill] sm:$0xff] }
 0x30d   : > { %8689 = vmatprep.subr.bf16.mxu0 %v14721_v51  ;;  %6918 = vmatmul.mubr.f32.vlgmr.msra.gmra.mrb[0].mxu1 %v14718_v14  ;;  %v14729_v51 = vld [vmem:[#allocation28_spill] sm:$0xff] }
 0x30e   : > { %8879 = vmatpush1.bf16.msra.mxu1 %v14722_v39  ;;  %7020 = vmatprep.mubr.f32.mxu1 %v13539_v43  ;;  %v14731_v14 = vld [vmem:[#allocation72_spill] sm:$0xff]  ;;  %v14732_v39 = vld [vmem:[#allocation33_spill] sm:$0xff] }
 0x30f   : > { %8881 = vmatprep.subr.bf16.mxu1 %v14723_v60  ;;  %v14734_v60 = vld [vmem:[#allocation98_spill] sm:$0xff] }
 0x310   : > { %8691 = vmatpush1.bf16.msra.mxu0 %v14724_v5  ;;  %v14735_v5 = vld [vmem:[#allocation89_spill] sm:$0xff] }
 0x311   : > { %8693 = vmatprep.subr.bf16.mxu0 %v14725_v62  ;;  %v14736_v62 = vld [vmem:[#allocation17_spill] sm:$0xff] }
 0x312   : > { %8883 = vmatpush1.bf16.msra.mxu1 %v14726_v31  ;;  %v14737_v31 = vld [vmem:[#allocation46_spill] sm:$0xff] }
 0x313   : > { %8885 = vmatprep.subr.bf16.mxu1 %v14727_v33  ;;  %v14738_v33 = vld [vmem:[#allocation45_spill] sm:$0xff] }
 0x314   : > { %8695 = vmatpush1.bf16.msra.mxu0 %v14728_v25  ;;  %v14739_v25 = vld [vmem:[#allocation86_spill] sm:$0xff] }
 0x315   : > { %8697 = vmatprep.subr.bf16.mxu0 %v14729_v51  ;;  %v14740_v51 = vld [vmem:[#allocation54_spill] sm:$0xff] }
 0x316   : > { %8887 = vmatpush1.bf16.msra.mxu1 %v14730_v23  ;;  %v14741_v23 = vld [vmem:[#allocation40_spill] sm:$0xff] }
 0x317   : > { %8889 = vmatprep.subr.bf16.mxu1 %v14731_v14  ;;  %v14742_v14 = vld [vmem:[#allocation83_spill] sm:$0xff] }
 0x318   : > { %8699 = vmatpush1.bf16.msra.mxu0 %v14732_v39  ;;  %v14743_v39 = vld [vmem:[#allocation5_spill] sm:$0xff] }
 0x319   : > { %8701 = vmatprep.subr.bf16.mxu0 %v14733_v22  ;;  %v14744_v22 = vld [vmem:[#allocation32_spill] sm:$0xff] }
 0x31a   : > { %8891 = vmatpush1.bf16.msra.mxu1 %v14734_v60  ;;  %v14745_v60 = vld [vmem:[#allocation9_spill] sm:$0xff] }
 0x31b   : > { %8893 = vmatprep.subr.bf16.mxu1 %v14735_v5 }
 0x31c   : > { %8703 = vmatpush1.bf16.msra.mxu0 %v14736_v62  ;;  %v14746_v62 = vand.u32 4294901760, %v14682_v48  ;;  %v14755_v48 = vand.u32 4294901760, %v14688_v56  ;;  %v14763_v56 = vand.u32 4294901760, %v14695_v47  ;;  %v14772_v47 = vand.u32 4294901760, %v14701_v53 }
 0x31d   : > { %8705 = vmatprep.subr.bf16.mxu0 %v14737_v31  ;;  %v14747_v31 = vand.u32 4294901760, %v14683_v55  ;;  %v14756_v55 = vand.u32 4294901760, %v14689_v50  ;;  %v14764_v50 = vand.u32 4294901760, %v14696_v13  ;;  %v14773_v13 = vand.u32 4294901760, %v14702_v8 }
 0x31e   : > { %8895 = vmatpush1.bf16.msra.mxu1 %v14738_v33  ;;  %v14748_v33 = vld [vmem:[#allocation90_spill] sm:$0xff]  ;;  %v14781_v8 = vand.u32 4294901760, %v14709_v41 }
 0x31f   : > { %8897 = vmatprep.subr.bf16.mxu1 %v14739_v25  ;;  %v8716_v5 = vpack.c.bf16 %v14747_v31, %v14746_v62  ;;  %v14749_v25 = vld [vmem:[#allocation25_spill] sm:$0xff]  ;;  %v8720_v62 = vpack.c.bf16 %v14756_v55, %v14755_v48  ;;  %v14757_v31 = vld [vmem:[#allocation14_spill] sm:$0xff]  ;;  %v14774_v55 = vand.u32 4294901760, %v14703_v17  ;;  %v14782_v17 = vand.u32 4294901760, %v14710_v32 }
 0x320   : > { %8707 = vmatpush1.bf16.msra.mxu0 %v14740_v51  ;;  %v14750_v51 = vld [vmem:[#allocation71_spill] sm:$0xff]  ;;  %v14792_v32 = vand.u32 4294901760, %v14640_v2 }
 0x321   : > { %8709 = vmatprep.subr.bf16.mxu0 %v14741_v23  ;;  %v14751_v23 = vand.u32 4294901760, %v14684_v30  ;;  %v14759_v30 = vand.u32 4294901760, %v14691_v12 }
 0x322   : > { %8899 = vmatpush1.bf16.msra.mxu1 %v14742_v14  ;;  %v14752_v14 = vand.u32 4294901760, %v14685_v3  ;;  %v14760_v3 = vand.u32 4294901760, %v14692_v61 }
 0x323   : > { %8901 = vmatprep.subr.bf16.mxu1 %v14743_v39 }
 0x324   : > { %8711 = vmatpush1.bf16.msra.mxu0 %v14744_v22  ;;  %v8908_v39 = vpack.c.bf16 %v14752_v14, %v14751_v23  ;;  %v14753_v22 = vand.u32 4294901760, %v14686_v52  ;;  %v8910_v23 = vpack.c.bf16 %v14760_v3, %v14759_v30  ;;  %v14761_v52 = vand.u32 4294901760, %v14693_v24  ;;  %v14766_v14 = vld [vmem:[#allocation87_spill] sm:$0xff]  ;;  %v14770_v24 = vld [vmem:[#allocation78_spill] sm:$0xff] }
 0x325   : > { %8713 = vmatprep.subr.bf16.mxu0 %v14745_v60  ;;  %v14754_v60 = vand.u32 4294901760, %v14687_v54  ;;  %v14762_v54 = vand.u32 4294901760, %v14694_v42  ;;  %v14767_v12 = vand.u32 4294901760, %v14766_v14  ;;  %v14771_v42 = vand.u32 4294901760, %v14770_v24  ;;  %v14787_v14 = vld [vmem:[#allocation97_spill] sm:$0xff] }
 0x326   : > { %8903 = vmatpush1.bf16.msra.mxu1 %v14748_v33  ;;  %v14777_v3 = vand.u32 4294901760, %v14705_v18  ;;  %v14794_v24 = vand.u32 4294901760, %v14642_v11  ;;  %v14802_v11 = vand.u32 4294901760, %v14714_v57  ;;  %v14810_v57 = vand.u32 4294901760, %v12034_v4 }
 0x327   : > { %8905 = vmatprep.subr.bf16.mxu1 %v14749_v25  ;;  %v8718_v10 = vpack.c.bf16 %v14754_v60, %v14753_v22  ;;  %v14758_v25 = vld [vmem:[#allocation8_spill] sm:$0xff]  ;;  %v8912_v22 = vpack.c.bf16 %v14762_v54, %v14761_v52  ;;  %v8722_v60 = vpack.c.bf16 %v14764_v50, %v14763_v56  ;;  %v14779_v54 = vand.u32 4294901760, %v14707_v1 }
 0x328   : > { %8715 = vmatpush1.bf16.msra.mxu0 %v14750_v51  ;;  %v8920_v56 = vpack.c.bf16 %v14782_v17, %v14781_v8  ;;  %v14783_v50 = vand.u32 4294901760, %v14617_v49  ;;  %v14788_v1 = vand.u32 4294901760, %v14787_v14  ;;  %v14793_v49 = vand.u32 4294901760, %v14641_v19  ;;  %v14829_v14 = vld [vmem:[#allocation73_spill] sm:$0xff] }
 0x329   : > { %8717 = vmatprep.subr.bf16.mxu0 %v8716_v5  ;;  %v14765_v5 = vand.u32 4294901760, %v14697_v46  ;;  %v8916_v46 = vpack.c.bf16 %v14773_v13, %v14772_v47  ;;  %v14797_v47 = vand.u32 4294901760, %v14646_v28  ;;  %v14801_v19 = vand.u32 4294901760, %v14713_v36 }
 0x32a   : > { %8907 = vmatpush1.bf16.msra.mxu1 %v14757_v31  ;;  %v14804_v28 = vand.u32 4294901760, %v14666_v29  ;;  %v14817_v17 = vand.u32 4294901760, %v12051_v59  ;;  %v14824_v59 = vld [vmem:[#allocation57_spill] sm:$0xff] }
 0x32b   : > { %6169 = vmatmul.mubr.f32.vlgmr.msra.gmra.mrb[0].mxu0 %v14758_v25  ;;  %8909 = vmatprep.subr.bf16.mxu1 %v8908_v39  ;;  %v8724_v48 = vpack.c.bf16 %v14767_v12, %v14765_v5 }
 0x32c   : > { %8719 = vmatpush1.bf16.msra.mxu0 %v8718_v10  ;;  %6335 = vmatprep.mubr.f32.mxu0 %v13539_v43  ;;  %v14768_v10 = vld [vmem:[#allocation26_spill] sm:$0xff] }
 0x32d   : > { %8721 = vmatprep.subr.bf16.mxu0 %v8720_v62  ;;  %7024 = vmatmul.mubr.f32.vlgmr.msra.gmra.mrb[0].mxu1 %v14758_v25  ;;  %v14769_v61 = vand.u32 4294901760, %v14768_v10  ;;  %v14775_v62 = vld [vmem:[#allocation52_spill] sm:$0xff] }
 0x32e   : > { %8911 = vmatpush1.bf16.msra.mxu1 %v8910_v23  ;;  %7190 = vmatprep.mubr.f32.mxu1 %v13539_v43  ;;  %v14776_v30 = vand.u32 4294901760, %v14775_v62  ;;  %v14778_v23 = vand.u32 4294901760, %v14706_v7  ;;  %v14786_v7 = vand.u32 4294901760, %v14638_v58  ;;  %v8928_v62 = vpack.c.bf16 %v14802_v11, %v14801_v19  ;;  %v14852_v19 = vld [vmem:[#allocation32_spill] sm:$0xff]  ;;  %v14853_v11 = vld [vmem:[#allocation9_spill] sm:$0xff] }
 0x32f   : > { %v8914_v39 = vpack.c.bf16 %v14771_v42, %v14769_v61  ;;  %8913 = vmatprep.subr.bf16.mxu1 %v8912_v22  ;;  %v14780_v22 = vand.u32 4294901760, %v14708_v38  ;;  %v14789_v38 = vand.u32 4294901760, %v14626_v34  ;;  %v8924_v61 = vpack.c.bf16 %v14793_v49, %v14792_v32  ;;  %v14795_v42 = vld [vmem:[#allocation6_spill] sm:$0xff]  ;;  %v14838_v32 = vld [vmem:[#allocation65_spill] sm:$0xff]  ;;  %v14839_v49 = vld [vmem:[#allocation72_spill] sm:$0xff] }
 0x330   : > { %8723 = vmatpush1.bf16.msra.mxu0 %v8722_v60  ;;  %v8726_v25 = vpack.c.bf16 %v14776_v30, %v14774_v55  ;;  %v8728_v52 = vpack.c.bf16 %v14778_v23, %v14777_v3  ;;  %v14784_v60 = vld [vmem:[#allocation37_spill] sm:$0xff]  ;;  %v8732_v12 = vpack.c.bf16 %v14788_v1, %v14786_v7  ;;  %v14796_v58 = vand.u32 4294901760, %v14795_v42  ;;  %v14808_v23 = vld [vmem:[#allocation88_spill] sm:$0xff] }
 0x331   : > { %8725 = vmatprep.subr.bf16.mxu0 %v8724_v48  ;;  %v8918_v53 = vpack.c.bf16 %v14780_v22, %v14779_v54  ;;  %v14785_v18 = vand.u32 4294901760, %v14784_v60  ;;  %v14790_v48 = vld [vmem:[#allocation48_spill] sm:$0xff]  ;;  %v14798_v34 = vand.u32 4294901760, %v14647_v35  ;;  %v14800_v55 = vand.u32 4294901760, %v14712_v37  ;;  %v14832_v1 = vld [vmem:[#allocation93_spill] sm:$0xff] }
 0x332   : > { %8915 = vmatpush1.bf16.msra.mxu1 %v8914_v39  ;;  %v14791_v10 = vand.u32 4294901760, %v14790_v48  ;;  %v8734_v39 = vpack.c.bf16 %v14796_v58, %v14794_v24  ;;  %v14803_v30 = vand.u32 4294901760, %v14663_v26  ;;  %v14805_v35 = vand.u32 4294901760, %v14670_v27  ;;  %v14827_v7 = vld [vmem:[#allocation64_spill] sm:$0xff]  ;;  %v14835_v48 = vld [vmem:[#allocation39_spill] sm:$0xff]  ;;  %v14842_v24 = vld [vmem:[#allocation98_spill] sm:$0xff] }
 0x333   : > { %8917 = vmatprep.subr.bf16.mxu1 %v8916_v46  ;;  %v8730_v5 = vpack.c.bf16 %v14785_v18, %v14783_v50  ;;  %v8736_v13 = vpack.c.bf16 %v14798_v34, %v14797_v47  ;;  %v14799_v46 = vand.u32 4294901760, %v14711_v45  ;;  %v14806_v45 = vand.u32 4294901760, %v14671_v15  ;;  %v14843_v42 = vld [vmem:[#allocation89_spill] sm:$0xff]  ;;  %v14847_v34 = vld [vmem:[#allocation86_spill] sm:$0xff] }
 0x334   : > { %8727 = vmatpush1.bf16.msra.mxu0 %v8726_v25  ;;  %v8922_v41 = vpack.c.bf16 %v14791_v10, %v14789_v38  ;;  %v8738_v25 = vpack.c.bf16 %v14804_v28, %v14803_v30  ;;  %v14807_v37 = vand.u32 4294901760, %v14667_v40  ;;  %v14811_v26 = vand.u32 4294901760, %v12036_v20  ;;  %v14834_v38 = vld [vmem:[#allocation75_spill] sm:$0xff]  ;;  %v14836_v10 = vld [vmem:[#allocation56_spill] sm:$0xff]  ;;  %v14844_v58 = vld [vmem:[#allocation17_spill] sm:$0xff] }
 0x335   : > { %8729 = vmatprep.subr.bf16.mxu0 %v8728_v52  ;;  %v8926_v2 = vpack.c.bf16 %v14800_v55, %v14799_v46  ;;  %v8740_v3 = vpack.c.bf16 %v14806_v45, %v14805_v35  ;;  %v14809_v52 = vand.u32 4294901760, %v14808_v23  ;;  %v14812_v54 = vand.u32 4294901760, %v14673_v63  ;;  %v14820_v63 = vld [vmem:[#allocation44_spill] sm:$0xff]  ;;  %v14846_v47 = vld [vmem:[#allocation45_spill] sm:$0xff]  ;;  %v14850_v55 = vld [vmem:[#allocation83_spill] sm:$0xff] }
 0x336   : > { %8919 = vmatpush1.bf16.msra.mxu1 %v8918_v53  ;;  %v8932_v29 = vpack.c.bf16 %v14811_v26, %v14810_v57  ;;  %v14813_v27 = vand.u32 4294901760, %v14674_v21  ;;  %v14814_v15 = vand.u32 4294901760, %v12057_v44  ;;  %v14815_v53 = vld [vmem:[#allocation13_spill] sm:$0xff]  ;;  %v14819_v20 = vand.u32 4294901760, %v12078_v6  ;;  %v14828_v6 = vld [vmem:[#allocation20_spill] sm:$0xff] }
 0x337   : > { %8921 = vmatprep.subr.bf16.mxu1 %v8920_v56  ;;  %v8930_v36 = vpack.c.bf16 %v14809_v52, %v14807_v37  ;;  %v14816_v40 = vand.u32 4294901760, %v14815_v53  ;;  %v14818_v56 = vand.u32 4294901760, %v12053_v9  ;;  %v14821_v50 = vand.u32 4294901760, %v14820_v63  ;;  %v14825_v9 = vld [vmem:[#allocation15_spill] sm:$0xff]  ;;  %v14849_v46 = vld [vmem:[#allocation40_spill] sm:$0xff] }
 0x338   : > { %8731 = vmatpush1.bf16.msra.mxu0 %v8730_v5  ;;  %v8742_v22 = vpack.c.bf16 %v14813_v27, %v14812_v54  ;;  %v14822_v60 = vand.u32 4294901760, %v14716_v16  ;;  %v14823_v44 = vand.u32 4294901760, %v14677_v0  ;;  %v14826_v5 = vld [vmem:[#allocation7_spill] sm:$0xff]  ;;  %v14830_v0 = vld [vmem:[#allocation49_spill] sm:$0xff] }
 0x339   : > { %8733 = vmatprep.subr.bf16.mxu0 %v8732_v12  ;;  %v8744_v8 = vpack.c.bf16 %v14816_v40, %v14814_v15  ;;  %v8934_v4 = vpack.c.bf16 %v14818_v56, %v14817_v17  ;;  %v8936_v21 = vpack.c.bf16 %v14821_v50, %v14819_v20  ;;  %v14831_v16 = vld [vmem:[#allocation21_spill] sm:$0xff] }
 0x33a   : > { %8923 = vmatpush1.bf16.msra.mxu1 %v8922_v41  ;;  %v8746_v18 = vpack.c.bf16 %v14823_v44, %v14822_v60  ;;  %v14833_v12 = vld [vmem:[#allocation81_spill] sm:$0xff]  ;;  %v14837_v41 = vld [vmem:[#allocation28_spill] sm:$0xff] }
 0x33b   : > { %8925 = vmatprep.subr.bf16.mxu1 %v8924_v61  ;;  %v14840_v61 = vld [vmem:[#allocation33_spill] sm:$0xff] }
 0x33c   : > { %8735 = vmatpush1.bf16.msra.mxu0 %v8734_v39  ;;  %v14845_v39 = vld [vmem:[#allocation46_spill] sm:$0xff] }
 0x33d   : > { %8737 = vmatprep.subr.bf16.mxu0 %v8736_v13  ;;  %v14848_v13 = vld [vmem:[#allocation54_spill] sm:$0xff] }
 0x33e   : > { %8927 = vmatpush1.bf16.msra.mxu1 %v8926_v2  ;;  %v14851_v2 = vld [vmem:[#allocation5_spill] sm:$0xff] }
 0x33f   : > { %8929 = vmatprep.subr.bf16.mxu1 %v8928_v62  ;;  %v14854_v62 = vld [vmem:[#allocation25_spill] sm:$0xff] }
 0x340   : > { %8739 = vmatpush1.bf16.msra.mxu0 %v8738_v25 }
 0x341   : > { %8741 = vmatprep.subr.bf16.mxu0 %v8740_v3 }
 0x342   : > { %8931 = vmatpush1.bf16.msra.mxu1 %v8930_v36 }
 0x343   : > { %8933 = vmatprep.subr.bf16.mxu1 %v8932_v29 }
 0x344   : > { %8743 = vmatpush1.bf16.msra.mxu0 %v8742_v22 }
 0x345   : > { %8745 = vmatprep.subr.bf16.mxu0 %v8744_v8 }
 0x346   : > { %8935 = vmatpush1.bf16.msra.mxu1 %v8934_v4 }
 0x347   : > { %8937 = vmatprep.subr.bf16.mxu1 %v8936_v21 }
 0x348   : > { %8747 = vmatpush1.bf16.msra.mxu0 %v8746_v18 }
 0x349   : > { %8749 = vmatprep.subr.bf16.mxu0 %v14824_v59 }
 0x34a   : > { %8939 = vmatpush1.bf16.msra.mxu1 %v14825_v9 }
 0x34b   : > { %6337 = vmatmul.mubr.f32.vlgmr.msra.gmra.mrb[0].mxu0 %v14826_v5  ;;  %8941 = vmatprep.subr.bf16.mxu1 %v14827_v7 }
 0x34c   : > { %8751 = vmatpush1.bf16.msra.mxu0 %v14828_v6  ;;  %6439 = vmatprep.mubr.f32.mxu0 %v13539_v43 }
 0x34d   : > { %8753 = vmatprep.subr.bf16.mxu0 %v14829_v14  ;;  %7192 = vmatmul.mubr.f32.vlgmr.msra.gmra.mrb[0].mxu1 %v14826_v5 }
 0x34e   : > { %8943 = vmatpush1.bf16.msra.mxu1 %v14830_v0  ;;  %7294 = vmatprep.mubr.f32.mxu1 %v13539_v43  ;;  %v14841_v43 = vld [vmem:[#allocation85_spill] sm:$0xff] }
 0x34f   : > { %8945 = vmatprep.subr.bf16.mxu1 %v14831_v16 }
 0x350   : > { %8755 = vmatpush1.bf16.msra.mxu0 %v14832_v1 }
 0x351   : > { %8757 = vmatprep.subr.bf16.mxu0 %v14833_v12 }
 0x352   : > { %8947 = vmatpush1.bf16.msra.mxu1 %v14834_v38 }
 0x353   : > { %8949 = vmatprep.subr.bf16.mxu1 %v14835_v48 }
 0x354   : > { %8759 = vmatpush1.bf16.msra.mxu0 %v14836_v10 }
 0x355   : > { %8761 = vmatprep.subr.bf16.mxu0 %v14837_v41 }
 0x356   : > { %8951 = vmatpush1.bf16.msra.mxu1 %v14838_v32 }
 0x357   : > { %8953 = vmatprep.subr.bf16.mxu1 %v14839_v49 }
 0x358   : > { %8763 = vmatpush1.bf16.msra.mxu0 %v14840_v61 }
 0x359   : > { %8765 = vmatprep.subr.bf16.mxu0 %v14841_v43 }
 0x35a   : > { %8955 = vmatpush1.bf16.msra.mxu1 %v14842_v24 }
 0x35b   : > { %8957 = vmatprep.subr.bf16.mxu1 %v14843_v42 }
 0x35c   : > { %8767 = vmatpush1.bf16.msra.mxu0 %v14844_v58 }
 0x35d   : > { %8769 = vmatprep.subr.bf16.mxu0 %v14845_v39 }
 0x35e   : > { %8959 = vmatpush1.bf16.msra.mxu1 %v14846_v47 }
 0x35f   : > { %8961 = vmatprep.subr.bf16.mxu1 %v14847_v34 }
 0x360   : > { %8771 = vmatpush1.bf16.msra.mxu0 %v14848_v13 }
 0x361   : > { %8773 = vmatprep.subr.bf16.mxu0 %v14849_v46 }
 0x362   : > { %8963 = vmatpush1.bf16.msra.mxu1 %v14850_v55 }
 0x363   : > { %8965 = vmatprep.subr.bf16.mxu1 %v14851_v2 }
 0x364   : > { %8775 = vmatpush1.bf16.msra.mxu0 %v14852_v19 }
 0x365   : > { %8777 = vmatprep.subr.bf16.mxu0 %v14853_v11 }
 0x366   : > { %8967 = vmatpush1.bf16.msra.mxu1 %v14748_v33 }
 0x367   : > { %8969 = vmatprep.subr.bf16.mxu1 %v14854_v62 }
 0x368   : > { %8779 = vmatpush1.bf16.msra.mxu0 %v14750_v51 }
 0x36a   : > { %8971 = vmatpush1.bf16.msra.mxu1 %v14757_v31 }
 0x36b   : > { %6441 = vmatmul.mubr.f32.vlgmr.msra.gmra.mrb[0].mxu0 %v14826_v5 }
 0x36d   : > { %7296 = vmatmul.mubr.f32.vlgmr.msra.gmra.mrb[0].mxu1 %v14826_v5 }
 0x43e   : > { %v6442_v30 = vpop.f32.mrb[0].mxu0 }
 0x43f   : > { %v6444_v28 = vpop.f32.mrb[1].mxu0 }
 0x440   : > { %v7310_v25 = vcombine.low %v6442_v30, %v6444_v28  ;;  %v7297_v35 = vpop.f32.mrb[0].mxu1 }
 0x441   : > { %v7299_v33 = vpop.f32.mrb[1].mxu1 }
 0x442   : > { %7314 = vst [vmem:[%s191_s12] sm:$0xff] %v7310_v25  ;;  %v7311_v45 = vcombine.low %v7297_v35, %v7299_v33 }
 0x444   : > { %7315 = vst [vmem:[%s191_s12 + $0x8] sm:$0xff] %v7311_v45 }
 0x445 PF: > { %s13_s11 = sadd.s32 1, %s9156_s11   ;;  %s14855_s9 = smov %s9152_s10 }
 0x446   : > { %p10_p4 = scmp.ge.s32.totalorder %s13_s11, 4   ;;  %s14856_s10 = smov %s14858_s13 }
 0x448   :  { %12 = sbr.rel (!%p10_p4) target bundleno = 2 (0x2), region = 69 }
 0x44f   :  { %7345 = vsyncpa [#allocation3], 1 }
 0x450   :  { %7347 = vsyncpa [#allocation3 + $0x1], 1 }

</bundles_post_ra>
